<compile_context>
chip_gen: v7x
topology: tpu7x:2x2x1
jax: 0.10.0
libtpu: 0.0.40
codegen_flags: <defaults>
</compile_context>

<pallas_src>
import functools

import jax
import jax.numpy as jnp
import numpy as np
from jax import lax
from jax.experimental import pallas as pl
from jax.experimental.pallas import tpu as pltpu


# ---------------------------------------------------------------------------
# Fused kernel: one grid step == one block of B samples, end to end.
# Activation layout everywhere: rows = (h, b) h-major, lanes = (w, c) w-major.
# ---------------------------------------------------------------------------
def fused_cnn_kernel(x_ref, w1_ref, s1_ref, t1_ref,
                     w2_ref, s2_ref, t2_ref,
                     w3_ref, s3_ref, t3_ref,
                     wfc_ref, bfc_ref, o_ref):
    f32 = jnp.float32
    B = x_ref.shape[1] // 30                       # block batch (multiple of 8)
    dot = functools.partial(jnp.dot, preferred_element_type=f32)

    x = x_ref[0]                                   # (30*B, 30) rows (h, b)

    # ---- conv1 (3x3, padding pre-applied) + BN1 + ReLU -> (28*B, 28*10)
    acc = dot(x[0:28 * B, :], w1_ref[0])
    for kh in (1, 2):
        acc = acc + dot(x[kh * B:(kh + 28) * B, :], w1_ref[kh])
    a1 = jnp.maximum(acc * s1_ref[...] + t1_ref[...], 0.0)        # (28B, 280)

    # ---- maxpool 2x2 -> pm1 (14, B, 270); pool1[b,i,j,c] == pm1[i, b, 20j+c]
    a1r = a1.reshape(14, 2 * B, 280)               # tile-aligned row regroup
    rmax = jnp.maximum(a1r[:, :B, :], a1r[:, B:, :])               # (14,B,280)
    pm1 = jnp.maximum(rmax[..., :270], rmax[..., 10:])             # (14,B,270)

    # ---- conv2 (3x3 valid) + BN2 + ReLU -> (12*B, 12*16)
    acc = dot(pm1[0:12].reshape(12 * B, 270), w2_ref[0])
    for kh in (1, 2):
        acc = acc + dot(pm1[kh:kh + 12].reshape(12 * B, 270), w2_ref[kh])
    a2 = jnp.maximum(acc * s2_ref[...] + t2_ref[...], 0.0)         # (12B, 192)
    # dropout(p=0.15): identity at inference.
    # TODO(synk): training-mode dropout / batch-statistics BatchNorm.

    # ---- conv3 (3x3 valid) + BN3 + ReLU -> (10*B, 10*20)
    a2r = a2.reshape(12, B, 192)
    acc = dot(a2r[0:10].reshape(10 * B, 192), w3_ref[0])
    for kh in (1, 2):
        acc = acc + dot(a2r[kh:kh + 10].reshape(10 * B, 192), w3_ref[kh])
    a3 = jnp.maximum(acc * s3_ref[...] + t3_ref[...], 0.0)         # (10B, 200)

    # ---- maxpool 2x2 -> pm2 (5, B, 180); pool2[b,i,j,c] == pm2[i, b, 40j+c]
    a3r = a3.reshape(5, 2 * B, 200)
    rmax2 = jnp.maximum(a3r[:, :B, :], a3r[:, B:, :])              # (5, B, 200)
    pm2 = jnp.maximum(rmax2[..., :180], rmax2[..., 20:])           # (5, B, 180)

    # ---- FC: one (B, 900) @ (900, 10) GEMM (col-select + NCHW flatten folded
    #      into the weight rows), bias added, then log_softmax.
    zin = jnp.concatenate([pm2[i] for i in range(5)], axis=-1)     # (B, 900)
    z = dot(zin, wfc_ref[...]) + bfc_ref[...]                      # (B, 10)

    mx = jnp.max(z, axis=-1, keepdims=True)
    lse = mx + jnp.log(jnp.sum(jnp.exp(z - mx), axis=-1, keepdims=True))
    o_ref[...] = z - lse


@functools.partial(jax.jit, static_argnames=("block_b",))
def forward_pallas(x_nchw, p, block_b=8):
    """x_nchw: (N, 1, 28, 28) -> (N, 10) log-probs."""
    assert block_b % 8 == 0
    n = x_nchw.shape[0]
    g = -(-n // block_b)
    n_pad = g * block_b

    x = x_nchw[:, 0]                                              # (N, 28, 28)
    x = jnp.pad(x, ((0, n_pad - n), (1, 1), (1, 1)))              # conv1 pad=1
    # Rearrange to (G, 30*B, 30) with rows ordered (h, b) inside each chunk.
    x = x.reshape(g, block_b, 30, 30).transpose(0, 2, 1, 3)
    x = x.reshape(g, 30 * block_b, 30)

    out = pl.pallas_call(
        fused_cnn_kernel,
        out_shape=jax.ShapeDtypeStruct((n_pad, 10), jnp.float32),
        grid=(g,),
        in_specs=[
            pl.BlockSpec((1, 30 * block_b, 30), lambda i: (i, 0, 0)),  # x block
            pl.BlockSpec((3, 30, 280), lambda i: (0, 0, 0)),           # W1
            pl.BlockSpec((1, 280), lambda i: (0, 0)),                  # s1
            pl.BlockSpec((1, 280), lambda i: (0, 0)),                  # t1
            pl.BlockSpec((3, 270, 192), lambda i: (0, 0, 0)),          # W2
            pl.BlockSpec((1, 192), lambda i: (0, 0)),                  # s2
            pl.BlockSpec((1, 192), lambda i: (0, 0)),                  # t2
            pl.BlockSpec((3, 192, 200), lambda i: (0, 0, 0)),          # W3
            pl.BlockSpec((1, 200), lambda i: (0, 0)),                  # s3
            pl.BlockSpec((1, 200), lambda i: (0, 0)),                  # t3
            pl.BlockSpec((900, 10), lambda i: (0, 0)),                 # Wfc
            pl.BlockSpec((1, 10), lambda i: (0, 0)),                   # fc bias
        ],
        out_specs=pl.BlockSpec((block_b, 10), lambda i: (i, 0)),
        compiler_params=pltpu.CompilerParams(
            dimension_semantics=("parallel",)),
    )(x, p['w1k'], p['s1t'], p['t1t'], p['w2k'], p['s2t'], p['t2t'],
      p['w3k'], p['s3t'], p['t3t'], p['wfck'], p['fcbt'])
    return out[:n]


# ---------------------------------------------------------------------------
# Parameters (deterministic init mirroring Model_4._initialize_weights) plus
# host-side construction of the kernel-layout (block-diagonal) weights.
# ---------------------------------------------------------------------------
def init_params(key):
    k1, k2, k3, k4 = jax.random.split(key, 4)
    eps = 1e-5
    p = {}

    def conv_init(k, cout, cin):
        std = (2.0 / (cout * 3 * 3)) ** 0.5        # kaiming_normal, fan_out, relu
        w = std * jax.random.normal(k, (cout, cin, 3, 3), jnp.float32)
        b = jnp.zeros((cout,), jnp.float32)
        gamma = jnp.ones((cout,), jnp.float32)
        beta = jnp.zeros((cout,), jnp.float32)
        mean = jnp.zeros((cout,), jnp.float32)
        var = jnp.ones((cout,), jnp.float32)
        s = gamma / jnp.sqrt(var + eps)
        t = beta - mean * s + b * s                # conv bias folded into shift
        return w, s, t

    w1, s1, t1 = conv_init(k1, 10, 1)
    w2, s2, t2 = conv_init(k2, 16, 10)
    w3, s3, t3 = conv_init(k3, 20, 16)
    fcw = 0.01 * jax.random.normal(k4, (10, 500), jnp.float32)    # normal(0,.01)
    fcb = jnp.zeros((10,), jnp.float32)

    # Reference-path (PyTorch-layout) params.
    p.update(w1_pt=w1, w2_pt=w2, w3_pt=w3, fcw_pt=fcw, fcb_v=fcb,
             s1_v=s1, t1_v=t1, s2_v=s2, t2_v=t2, s3_v=s3, t3_v=t3)

    w1n, w2n, w3n, fcn = (np.asarray(a) for a in (w1, w2, w3, fcw))

    # conv1: (3, 30, 280); row = w + kw, col = 10*w + c
    W1 = np.zeros((3, 30, 280), np.float32)
    for kh in range(3):
        for kw in range(3):
            for w in range(28):
                W1[kh, w + kw, 10 * w:10 * w + 10] = w1n[:, 0, kh, kw]

    # conv2: (3, 270, 192); row = 20*(j+kw) + c, col = 16*j + n
    # (input lanes are conv1/pool1 pair-max lanes 20*j' + c)
    W2 = np.zeros((3, 270, 192), np.float32)
    for kh in range(3):
        for kw in range(3):
            for j in range(12):
                W2[kh, 20 * (j + kw):20 * (j + kw) + 10,
                   16 * j:16 * j + 16] = w2n[:, :, kh, kw].T

    # conv3: (3, 192, 200); row = 16*(j+kw) + c, col = 20*j + m
    W3 = np.zeros((3, 192, 200), np.float32)
    for kh in range(3):
        for kw in range(3):
            for j in range(10):
                W3[kh, 16 * (j + kw):16 * (j + kw) + 16,
                   20 * j:20 * j + 20] = w3n[:, :, kh, kw].T

    # fc: (900, 10); kernel row = 180*i + 40*j + c  <->  PyTorch col c*25+5*i+j
    WF = np.zeros((900, 10), np.float32)
    for i in range(5):
        for j in range(5):
            for c in range(20):
                WF[180 * i + 40 * j + c, :] = fcn[:, c * 25 + 5 * i + j]

    p['w1k'] = jnp.asarray(W1)
    p['w2k'] = jnp.asarray(W2)
    p['w3k'] = jnp.asarray(W3)
    p['wfck'] = jnp.asarray(WF)
    p['s1t'] = jnp.asarray(np.tile(np.asarray(s1), 28).reshape(1, 280))
    p['t1t'] = jnp.asarray(np.tile(np.asarray(t1), 28).reshape(1, 280))
    p['s2t'] = jnp.asarray(np.tile(np.asarray(s2), 12).reshape(1, 192))
    p['t2t'] = jnp.asarray(np.tile(np.asarray(t2), 12).reshape(1, 192))
    p['s3t'] = jnp.asarray(np.tile(np.asarray(s3), 10).reshape(1, 200))
    p['t3t'] = jnp.asarray(np.tile(np.asarray(t3), 10).reshape(1, 200))
    p['fcbt'] = jnp.asarray(np.asarray(fcb).reshape(1, 10))
    return p


# ---------------------------------------------------------------------------
# Pure-JAX reference (inference semantics, same folded BN scale/shift).
# ---------------------------------------------------------------------------
def forward_ref(x_nchw, p):
    dn = ('NCHW', 'OIHW', 'NCHW')
    hp = lax.Precision.HIGHEST

    def bn_relu(y, s, t):
        return jnp.maximum(y * s[None, :, None, None] + t[None, :, None, None], 0.0)

    def pool(y):
        return lax.reduce_window(y, -jnp.inf, lax.max,
                                 (1, 1, 2, 2), (1, 1, 2, 2), 'VALID')

    y = lax.conv_general_dilated(x_nchw, p['w1_pt'], (1, 1), ((1, 1), (1, 1)),
                                 dimension_numbers=dn, precision=hp)
    y = pool(bn_relu(y, p['s1_v'], p['t1_v']))
    y = lax.conv_general_dilated(y, p['w2_pt'], (1, 1), ((0, 0), (0, 0)),
                                 dimension_numbers=dn, precision=hp)
    y = bn_relu(y, p['s2_v'], p['t2_v'])
    y = lax.conv_general_dilated(y, p['w3_pt'], (1, 1), ((0, 0), (0, 0)),
                                 dimension_numbers=dn, precision=hp)
    y = pool(bn_relu(y, p['s3_v'], p['t3_v']))
    y = y.reshape(y.shape[0], -1)
    z = jnp.dot(y, p['fcw_pt'].T, precision=hp) + p['fcb_v']
    return jax.nn.log_softmax(z, axis=1)


if __name__ == "__main__":
    key = jax.random.PRNGKey(0)
    pkey, xkey = jax.random.split(key)
    params = init_params(pkey)
    # Input shape implied by the module: fc1 expects 20*5*5 -> 28x28, 1 channel.
    x = jax.random.normal(xkey, (2, 1, 28, 28), jnp.float32)

    out = jax.block_until_ready(forward_pallas(x, params))
    ref = jax.block_until_ready(forward_ref(x, params))

    assert out.shape == (2, 10), out.shape
    np.testing.assert_allclose(np.asarray(out), np.asarray(ref),
                               atol=1e-2, rtol=1e-2)
    print("KERNEL_OK")
</pallas_src>

<mosaic_0001>
module attributes {stable_mosaic.version = 11 : i64} {
  func.func @fused_cnn_kernel(%arg0: i32, %arg1: memref<1x240x30xf32, #tpu.memory_space<vmem>>, %arg2: memref<3x30x280xf32, #tpu.memory_space<vmem>>, %arg3: memref<1x280xf32, #tpu.memory_space<vmem>>, %arg4: memref<1x280xf32, #tpu.memory_space<vmem>>, %arg5: memref<3x270x192xf32, #tpu.memory_space<vmem>>, %arg6: memref<1x192xf32, #tpu.memory_space<vmem>>, %arg7: memref<1x192xf32, #tpu.memory_space<vmem>>, %arg8: memref<3x192x200xf32, #tpu.memory_space<vmem>>, %arg9: memref<1x200xf32, #tpu.memory_space<vmem>>, %arg10: memref<1x200xf32, #tpu.memory_space<vmem>>, %arg11: memref<900x10xf32, #tpu.memory_space<vmem>>, %arg12: memref<1x10xf32, #tpu.memory_space<vmem>>, %arg13: memref<8x10xf32, #tpu.memory_space<vmem>>) attributes {dimension_semantics = [#tpu.dimension_semantics<parallel>], iteration_bounds = array<i64: 1>, scalar_prefetch = 0 : i64, scratch_operands = 0 : i64, tpu.core_type = #tpu.core_type<tc>, window_params = [{transform_indices = @transform_0, window_bounds = array<i64: 1, 240, 30>}, {pipeline_mode = #tpu.pipeline_mode<synchronous>, transform_indices = @transform_1, window_bounds = array<i64: 3, 30, 280>}, {pipeline_mode = #tpu.pipeline_mode<synchronous>, transform_indices = @transform_2, window_bounds = array<i64: 1, 280>}, {pipeline_mode = #tpu.pipeline_mode<synchronous>, transform_indices = @transform_3, window_bounds = array<i64: 1, 280>}, {pipeline_mode = #tpu.pipeline_mode<synchronous>, transform_indices = @transform_4, window_bounds = array<i64: 3, 270, 192>}, {pipeline_mode = #tpu.pipeline_mode<synchronous>, transform_indices = @transform_5, window_bounds = array<i64: 1, 192>}, {pipeline_mode = #tpu.pipeline_mode<synchronous>, transform_indices = @transform_6, window_bounds = array<i64: 1, 192>}, {pipeline_mode = #tpu.pipeline_mode<synchronous>, transform_indices = @transform_7, window_bounds = array<i64: 3, 192, 200>}, {pipeline_mode = #tpu.pipeline_mode<synchronous>, transform_indices = @transform_8, window_bounds = array<i64: 1, 200>}, {pipeline_mode = #tpu.pipeline_mode<synchronous>, transform_indices = @transform_9, window_bounds = array<i64: 1, 200>}, {pipeline_mode = #tpu.pipeline_mode<synchronous>, transform_indices = @transform_10, window_bounds = array<i64: 900, 10>}, {pipeline_mode = #tpu.pipeline_mode<synchronous>, transform_indices = @transform_11, window_bounds = array<i64: 1, 10>}, {transform_indices = @transform_12, window_bounds = array<i64: 8, 10>}]} {
    %c0 = arith.constant 0 : index
    %c0_0 = arith.constant 0 : index
    %c0_1 = arith.constant 0 : index
    %0 = vector.load %arg1[%c0, %c0_0, %c0_1] : memref<1x240x30xf32, #tpu.memory_space<vmem>>, vector<1x240x30xf32>
    %1 = vector.shape_cast %0 : vector<1x240x30xf32> to vector<240x30xf32>
    %2 = vector.extract_strided_slice %1 {offsets = [0, 0], sizes = [224, 30], strides = [1, 1]} : vector<240x30xf32> to vector<224x30xf32>
    %c0_2 = arith.constant 0 : index
    %c0_3 = arith.constant 0 : index
    %c0_4 = arith.constant 0 : index
    %3 = vector.load %arg2[%c0_2, %c0_3, %c0_4] : memref<3x30x280xf32, #tpu.memory_space<vmem>>, vector<1x30x280xf32>
    %4 = vector.shape_cast %3 : vector<1x30x280xf32> to vector<30x280xf32>
    %cst = arith.constant dense<0.000000e+00> : vector<224x280xf32>
    %5 = tpu.matmul %2, %4, %cst {dimension_numbers = #tpu.dot_dimension_numbers<[1], [0], [0], [1], [0, 0, 1, 1], [], []>} : vector<224x30xf32>, vector<30x280xf32>, vector<224x280xf32> -> vector<224x280xf32>
    %6 = vector.extract_strided_slice %1 {offsets = [8, 0], sizes = [224, 30], strides = [1, 1]} : vector<240x30xf32> to vector<224x30xf32>
    %c1 = arith.constant 1 : index
    %c0_5 = arith.constant 0 : index
    %c0_6 = arith.constant 0 : index
    %7 = vector.load %arg2[%c1, %c0_5, %c0_6] : memref<3x30x280xf32, #tpu.memory_space<vmem>>, vector<1x30x280xf32>
    %8 = vector.shape_cast %7 : vector<1x30x280xf32> to vector<30x280xf32>
    %cst_7 = arith.constant dense<0.000000e+00> : vector<224x280xf32>
    %9 = tpu.matmul %6, %8, %cst_7 {dimension_numbers = #tpu.dot_dimension_numbers<[1], [0], [0], [1], [0, 0, 1, 1], [], []>} : vector<224x30xf32>, vector<30x280xf32>, vector<224x280xf32> -> vector<224x280xf32>
    %10 = arith.addf %5, %9 : vector<224x280xf32>
    %11 = vector.extract_strided_slice %1 {offsets = [16, 0], sizes = [224, 30], strides = [1, 1]} : vector<240x30xf32> to vector<224x30xf32>
    %c2 = arith.constant 2 : index
    %c0_8 = arith.constant 0 : index
    %c0_9 = arith.constant 0 : index
    %12 = vector.load %arg2[%c2, %c0_8, %c0_9] : memref<3x30x280xf32, #tpu.memory_space<vmem>>, vector<1x30x280xf32>
    %13 = vector.shape_cast %12 : vector<1x30x280xf32> to vector<30x280xf32>
    %cst_10 = arith.constant dense<0.000000e+00> : vector<224x280xf32>
    %14 = tpu.matmul %11, %13, %cst_10 {dimension_numbers = #tpu.dot_dimension_numbers<[1], [0], [0], [1], [0, 0, 1, 1], [], []>} : vector<224x30xf32>, vector<30x280xf32>, vector<224x280xf32> -> vector<224x280xf32>
    %15 = arith.addf %10, %14 : vector<224x280xf32>
    %c0_11 = arith.constant 0 : index
    %c0_12 = arith.constant 0 : index
    %16 = vector.load %arg3[%c0_11, %c0_12] : memref<1x280xf32, #tpu.memory_space<vmem>>, vector<1x280xf32>
    %17 = vector.broadcast %16 : vector<1x280xf32> to vector<224x280xf32>
    %18 = arith.mulf %15, %17 : vector<224x280xf32>
    %c0_13 = arith.constant 0 : index
    %c0_14 = arith.constant 0 : index
    %19 = vector.load %arg4[%c0_13, %c0_14] : memref<1x280xf32, #tpu.memory_space<vmem>>, vector<1x280xf32>
    %20 = vector.broadcast %19 : vector<1x280xf32> to vector<224x280xf32>
    %21 = arith.addf %18, %20 : vector<224x280xf32>
    %cst_15 = arith.constant 0.000000e+00 : f32
    %22 = vector.broadcast %cst_15 : f32 to vector<224x280xf32>
    %23 = arith.maximumf %21, %22 : vector<224x280xf32>
    %24 = vector.shape_cast %23 : vector<224x280xf32> to vector<14x16x280xf32>
    %25 = vector.extract_strided_slice %24 {offsets = [0, 0, 0], sizes = [14, 8, 280], strides = [1, 1, 1]} : vector<14x16x280xf32> to vector<14x8x280xf32>
    %26 = vector.extract_strided_slice %24 {offsets = [0, 8, 0], sizes = [14, 8, 280], strides = [1, 1, 1]} : vector<14x16x280xf32> to vector<14x8x280xf32>
    %27 = arith.maximumf %25, %26 : vector<14x8x280xf32>
    %28 = vector.extract_strided_slice %27 {offsets = [0, 0, 0], sizes = [14, 8, 270], strides = [1, 1, 1]} : vector<14x8x280xf32> to vector<14x8x270xf32>
    %29 = vector.extract_strided_slice %27 {offsets = [0, 0, 10], sizes = [14, 8, 270], strides = [1, 1, 1]} : vector<14x8x280xf32> to vector<14x8x270xf32>
    %30 = arith.maximumf %28, %29 : vector<14x8x270xf32>
    %31 = vector.extract_strided_slice %30 {offsets = [0, 0, 0], sizes = [12, 8, 270], strides = [1, 1, 1]} : vector<14x8x270xf32> to vector<12x8x270xf32>
    %32 = vector.shape_cast %31 : vector<12x8x270xf32> to vector<96x270xf32>
    %c0_16 = arith.constant 0 : index
    %c0_17 = arith.constant 0 : index
    %c0_18 = arith.constant 0 : index
    %33 = vector.load %arg5[%c0_16, %c0_17, %c0_18] : memref<3x270x192xf32, #tpu.memory_space<vmem>>, vector<1x270x192xf32>
    %34 = vector.shape_cast %33 : vector<1x270x192xf32> to vector<270x192xf32>
    %cst_19 = arith.constant dense<0.000000e+00> : vector<96x192xf32>
    %35 = tpu.matmul %32, %34, %cst_19 {dimension_numbers = #tpu.dot_dimension_numbers<[1], [0], [0], [1], [0, 0, 1, 1], [], []>} : vector<96x270xf32>, vector<270x192xf32>, vector<96x192xf32> -> vector<96x192xf32>
    %36 = vector.extract_strided_slice %30 {offsets = [1, 0, 0], sizes = [12, 8, 270], strides = [1, 1, 1]} : vector<14x8x270xf32> to vector<12x8x270xf32>
    %37 = vector.shape_cast %36 : vector<12x8x270xf32> to vector<96x270xf32>
    %c1_20 = arith.constant 1 : index
    %c0_21 = arith.constant 0 : index
    %c0_22 = arith.constant 0 : index
    %38 = vector.load %arg5[%c1_20, %c0_21, %c0_22] : memref<3x270x192xf32, #tpu.memory_space<vmem>>, vector<1x270x192xf32>
    %39 = vector.shape_cast %38 : vector<1x270x192xf32> to vector<270x192xf32>
    %cst_23 = arith.constant dense<0.000000e+00> : vector<96x192xf32>
    %40 = tpu.matmul %37, %39, %cst_23 {dimension_numbers = #tpu.dot_dimension_numbers<[1], [0], [0], [1], [0, 0, 1, 1], [], []>} : vector<96x270xf32>, vector<270x192xf32>, vector<96x192xf32> -> vector<96x192xf32>
    %41 = arith.addf %35, %40 : vector<96x192xf32>
    %42 = vector.extract_strided_slice %30 {offsets = [2, 0, 0], sizes = [12, 8, 270], strides = [1, 1, 1]} : vector<14x8x270xf32> to vector<12x8x270xf32>
    %43 = vector.shape_cast %42 : vector<12x8x270xf32> to vector<96x270xf32>
    %c2_24 = arith.constant 2 : index
    %c0_25 = arith.constant 0 : index
    %c0_26 = arith.constant 0 : index
    %44 = vector.load %arg5[%c2_24, %c0_25, %c0_26] : memref<3x270x192xf32, #tpu.memory_space<vmem>>, vector<1x270x192xf32>
    %45 = vector.shape_cast %44 : vector<1x270x192xf32> to vector<270x192xf32>
    %cst_27 = arith.constant dense<0.000000e+00> : vector<96x192xf32>
    %46 = tpu.matmul %43, %45, %cst_27 {dimension_numbers = #tpu.dot_dimension_numbers<[1], [0], [0], [1], [0, 0, 1, 1], [], []>} : vector<96x270xf32>, vector<270x192xf32>, vector<96x192xf32> -> vector<96x192xf32>
    %47 = arith.addf %41, %46 : vector<96x192xf32>
    %c0_28 = arith.constant 0 : index
    %c0_29 = arith.constant 0 : index
    %48 = vector.load %arg6[%c0_28, %c0_29] : memref<1x192xf32, #tpu.memory_space<vmem>>, vector<1x192xf32>
    %49 = vector.broadcast %48 : vector<1x192xf32> to vector<96x192xf32>
    %50 = arith.mulf %47, %49 : vector<96x192xf32>
    %c0_30 = arith.constant 0 : index
    %c0_31 = arith.constant 0 : index
    %51 = vector.load %arg7[%c0_30, %c0_31] : memref<1x192xf32, #tpu.memory_space<vmem>>, vector<1x192xf32>
    %52 = vector.broadcast %51 : vector<1x192xf32> to vector<96x192xf32>
    %53 = arith.addf %50, %52 : vector<96x192xf32>
    %cst_32 = arith.constant 0.000000e+00 : f32
    %54 = vector.broadcast %cst_32 : f32 to vector<96x192xf32>
    %55 = arith.maximumf %53, %54 : vector<96x192xf32>
    %56 = vector.shape_cast %55 : vector<96x192xf32> to vector<12x8x192xf32>
    %57 = vector.extract_strided_slice %56 {offsets = [0, 0, 0], sizes = [10, 8, 192], strides = [1, 1, 1]} : vector<12x8x192xf32> to vector<10x8x192xf32>
    %58 = vector.shape_cast %57 : vector<10x8x192xf32> to vector<80x192xf32>
    %c0_33 = arith.constant 0 : index
    %c0_34 = arith.constant 0 : index
    %c0_35 = arith.constant 0 : index
    %59 = vector.load %arg8[%c0_33, %c0_34, %c0_35] : memref<3x192x200xf32, #tpu.memory_space<vmem>>, vector<1x192x200xf32>
    %60 = vector.shape_cast %59 : vector<1x192x200xf32> to vector<192x200xf32>
    %cst_36 = arith.constant dense<0.000000e+00> : vector<80x200xf32>
    %61 = tpu.matmul %58, %60, %cst_36 {dimension_numbers = #tpu.dot_dimension_numbers<[1], [0], [0], [1], [0, 0, 1, 1], [], []>} : vector<80x192xf32>, vector<192x200xf32>, vector<80x200xf32> -> vector<80x200xf32>
    %62 = vector.extract_strided_slice %56 {offsets = [1, 0, 0], sizes = [10, 8, 192], strides = [1, 1, 1]} : vector<12x8x192xf32> to vector<10x8x192xf32>
    %63 = vector.shape_cast %62 : vector<10x8x192xf32> to vector<80x192xf32>
    %c1_37 = arith.constant 1 : index
    %c0_38 = arith.constant 0 : index
    %c0_39 = arith.constant 0 : index
    %64 = vector.load %arg8[%c1_37, %c0_38, %c0_39] : memref<3x192x200xf32, #tpu.memory_space<vmem>>, vector<1x192x200xf32>
    %65 = vector.shape_cast %64 : vector<1x192x200xf32> to vector<192x200xf32>
    %cst_40 = arith.constant dense<0.000000e+00> : vector<80x200xf32>
    %66 = tpu.matmul %63, %65, %cst_40 {dimension_numbers = #tpu.dot_dimension_numbers<[1], [0], [0], [1], [0, 0, 1, 1], [], []>} : vector<80x192xf32>, vector<192x200xf32>, vector<80x200xf32> -> vector<80x200xf32>
    %67 = arith.addf %61, %66 : vector<80x200xf32>
    %68 = vector.extract_strided_slice %56 {offsets = [2, 0, 0], sizes = [10, 8, 192], strides = [1, 1, 1]} : vector<12x8x192xf32> to vector<10x8x192xf32>
    %69 = vector.shape_cast %68 : vector<10x8x192xf32> to vector<80x192xf32>
    %c2_41 = arith.constant 2 : index
    %c0_42 = arith.constant 0 : index
    %c0_43 = arith.constant 0 : index
    %70 = vector.load %arg8[%c2_41, %c0_42, %c0_43] : memref<3x192x200xf32, #tpu.memory_space<vmem>>, vector<1x192x200xf32>
    %71 = vector.shape_cast %70 : vector<1x192x200xf32> to vector<192x200xf32>
    %cst_44 = arith.constant dense<0.000000e+00> : vector<80x200xf32>
    %72 = tpu.matmul %69, %71, %cst_44 {dimension_numbers = #tpu.dot_dimension_numbers<[1], [0], [0], [1], [0, 0, 1, 1], [], []>} : vector<80x192xf32>, vector<192x200xf32>, vector<80x200xf32> -> vector<80x200xf32>
    %73 = arith.addf %67, %72 : vector<80x200xf32>
    %c0_45 = arith.constant 0 : index
    %c0_46 = arith.constant 0 : index
    %74 = vector.load %arg9[%c0_45, %c0_46] : memref<1x200xf32, #tpu.memory_space<vmem>>, vector<1x200xf32>
    %75 = vector.broadcast %74 : vector<1x200xf32> to vector<80x200xf32>
    %76 = arith.mulf %73, %75 : vector<80x200xf32>
    %c0_47 = arith.constant 0 : index
    %c0_48 = arith.constant 0 : index
    %77 = vector.load %arg10[%c0_47, %c0_48] : memref<1x200xf32, #tpu.memory_space<vmem>>, vector<1x200xf32>
    %78 = vector.broadcast %77 : vector<1x200xf32> to vector<80x200xf32>
    %79 = arith.addf %76, %78 : vector<80x200xf32>
    %cst_49 = arith.constant 0.000000e+00 : f32
    %80 = vector.broadcast %cst_49 : f32 to vector<80x200xf32>
    %81 = arith.maximumf %79, %80 : vector<80x200xf32>
    %82 = vector.shape_cast %81 : vector<80x200xf32> to vector<5x16x200xf32>
    %83 = vector.extract_strided_slice %82 {offsets = [0, 0, 0], sizes = [5, 8, 200], strides = [1, 1, 1]} : vector<5x16x200xf32> to vector<5x8x200xf32>
    %84 = vector.extract_strided_slice %82 {offsets = [0, 8, 0], sizes = [5, 8, 200], strides = [1, 1, 1]} : vector<5x16x200xf32> to vector<5x8x200xf32>
    %85 = arith.maximumf %83, %84 : vector<5x8x200xf32>
    %86 = vector.extract_strided_slice %85 {offsets = [0, 0, 0], sizes = [5, 8, 180], strides = [1, 1, 1]} : vector<5x8x200xf32> to vector<5x8x180xf32>
    %87 = vector.extract_strided_slice %85 {offsets = [0, 0, 20], sizes = [5, 8, 180], strides = [1, 1, 1]} : vector<5x8x200xf32> to vector<5x8x180xf32>
    %88 = arith.maximumf %86, %87 : vector<5x8x180xf32>
    %89 = vector.extract_strided_slice %88 {offsets = [0, 0, 0], sizes = [1, 8, 180], strides = [1, 1, 1]} : vector<5x8x180xf32> to vector<1x8x180xf32>
    %90 = vector.shape_cast %89 : vector<1x8x180xf32> to vector<8x180xf32>
    %91 = vector.extract_strided_slice %88 {offsets = [1, 0, 0], sizes = [1, 8, 180], strides = [1, 1, 1]} : vector<5x8x180xf32> to vector<1x8x180xf32>
    %92 = vector.shape_cast %91 : vector<1x8x180xf32> to vector<8x180xf32>
    %93 = vector.extract_strided_slice %88 {offsets = [2, 0, 0], sizes = [1, 8, 180], strides = [1, 1, 1]} : vector<5x8x180xf32> to vector<1x8x180xf32>
    %94 = vector.shape_cast %93 : vector<1x8x180xf32> to vector<8x180xf32>
    %95 = vector.extract_strided_slice %88 {offsets = [3, 0, 0], sizes = [1, 8, 180], strides = [1, 1, 1]} : vector<5x8x180xf32> to vector<1x8x180xf32>
    %96 = vector.shape_cast %95 : vector<1x8x180xf32> to vector<8x180xf32>
    %97 = vector.extract_strided_slice %88 {offsets = [4, 0, 0], sizes = [1, 8, 180], strides = [1, 1, 1]} : vector<5x8x180xf32> to vector<1x8x180xf32>
    %98 = vector.shape_cast %97 : vector<1x8x180xf32> to vector<8x180xf32>
    %99 = tpu.concatenate %90, %92, %94, %96, %98 in 1 : vector<8x180xf32>, vector<8x180xf32>, vector<8x180xf32>, vector<8x180xf32>, vector<8x180xf32> -> vector<8x900xf32>
    %c0_50 = arith.constant 0 : index
    %c0_51 = arith.constant 0 : index
    %100 = vector.load %arg11[%c0_50, %c0_51] : memref<900x10xf32, #tpu.memory_space<vmem>>, vector<900x10xf32>
    %cst_52 = arith.constant dense<0.000000e+00> : vector<8x10xf32>
    %101 = tpu.matmul %99, %100, %cst_52 {dimension_numbers = #tpu.dot_dimension_numbers<[1], [0], [0], [1], [0, 0, 1, 1], [], []>} : vector<8x900xf32>, vector<900x10xf32>, vector<8x10xf32> -> vector<8x10xf32>
    %c0_53 = arith.constant 0 : index
    %c0_54 = arith.constant 0 : index
    %102 = vector.load %arg12[%c0_53, %c0_54] : memref<1x10xf32, #tpu.memory_space<vmem>>, vector<1x10xf32>
    %103 = vector.broadcast %102 : vector<1x10xf32> to vector<8x10xf32>
    %104 = arith.addf %101, %103 : vector<8x10xf32>
    %cst_55 = arith.constant dense<0xFF800000> : vector<8xf32>
    %105 = vector.multi_reduction <maximumf>, %104, %cst_55 [1] : vector<8x10xf32> to vector<8xf32>
    %106 = vector.shape_cast %105 : vector<8xf32> to vector<8x1xf32>
    %107 = vector.broadcast %106 : vector<8x1xf32> to vector<8x10xf32>
    %108 = arith.subf %104, %107 : vector<8x10xf32>
    %109 = math.exp %108 : vector<8x10xf32>
    %cst_56 = arith.constant dense<0.000000e+00> : vector<8xf32>
    %110 = vector.multi_reduction <add>, %109, %cst_56 [1] : vector<8x10xf32> to vector<8xf32>
    %111 = vector.shape_cast %110 : vector<8xf32> to vector<8x1xf32>
    %112 = math.log %111 : vector<8x1xf32>
    %113 = arith.addf %106, %112 : vector<8x1xf32>
    %114 = vector.broadcast %113 : vector<8x1xf32> to vector<8x10xf32>
    %115 = arith.subf %104, %114 : vector<8x10xf32>
    %c0_57 = arith.constant 0 : index
    %c0_58 = arith.constant 0 : index
    %116 = vector.load %arg13[%c0_57, %c0_58] : memref<8x10xf32, #tpu.memory_space<vmem>>, vector<8x10xf32>
    tpu.vector_store %arg13[%c0_57, %c0_58], %115 {strides = array<i32>} : memref<8x10xf32, #tpu.memory_space<vmem>>, vector<8x10xf32>,
    return
  }
  func.func @transform_0(%arg0: i32) -> (i32, i32, i32) {
    %c0_i32 = arith.constant 0 : i32
    %c0_i32_0 = arith.constant 0 : i32
    %c0_i32_1 = arith.constant 0 : i32
    return %arg0, %c0_i32, %c0_i32_0 : i32, i32, i32
  }
  func.func @transform_1(%arg0: i32) -> (i32, i32, i32) {
    %c0_i32 = arith.constant 0 : i32
    %c0_i32_0 = arith.constant 0 : i32
    %c0_i32_1 = arith.constant 0 : i32
    %c0_i32_2 = arith.constant 0 : i32
    return %c0_i32, %c0_i32_0, %c0_i32_1 : i32, i32, i32
  }
  func.func @transform_2(%arg0: i32) -> (i32, i32) {
    %c0_i32 = arith.constant 0 : i32
    %c0_i32_0 = arith.constant 0 : i32
    %c0_i32_1 = arith.constant 0 : i32
    return %c0_i32, %c0_i32_0 : i32, i32
  }
  func.func @transform_3(%arg0: i32) -> (i32, i32) {
    %c0_i32 = arith.constant 0 : i32
    %c0_i32_0 = arith.constant 0 : i32
    %c0_i32_1 = arith.constant 0 : i32
    return %c0_i32, %c0_i32_0 : i32, i32
  }
  func.func @transform_4(%arg0: i32) -> (i32, i32, i32) {
    %c0_i32 = arith.constant 0 : i32
    %c0_i32_0 = arith.constant 0 : i32
    %c0_i32_1 = arith.constant 0 : i32
    %c0_i32_2 = arith.constant 0 : i32
    return %c0_i32, %c0_i32_0, %c0_i32_1 : i32, i32, i32
  }
  func.func @transform_5(%arg0: i32) -> (i32, i32) {
    %c0_i32 = arith.constant 0 : i32
    %c0_i32_0 = arith.constant 0 : i32
    %c0_i32_1 = arith.constant 0 : i32
    return %c0_i32, %c0_i32_0 : i32, i32
  }
  func.func @transform_6(%arg0: i32) -> (i32, i32) {
    %c0_i32 = arith.constant 0 : i32
    %c0_i32_0 = arith.constant 0 : i32
    %c0_i32_1 = arith.constant 0 : i32
    return %c0_i32, %c0_i32_0 : i32, i32
  }
  func.func @transform_7(%arg0: i32) -> (i32, i32, i32) {
    %c0_i32 = arith.constant 0 : i32
    %c0_i32_0 = arith.constant 0 : i32
    %c0_i32_1 = arith.constant 0 : i32
    %c0_i32_2 = arith.constant 0 : i32
    return %c0_i32, %c0_i32_0, %c0_i32_1 : i32, i32, i32
  }
  func.func @transform_8(%arg0: i32) -> (i32, i32) {
    %c0_i32 = arith.constant 0 : i32
    %c0_i32_0 = arith.constant 0 : i32
    %c0_i32_1 = arith.constant 0 : i32
    return %c0_i32, %c0_i32_0 : i32, i32
  }
  func.func @transform_9(%arg0: i32) -> (i32, i32) {
    %c0_i32 = arith.constant 0 : i32
    %c0_i32_0 = arith.constant 0 : i32
    %c0_i32_1 = arith.constant 0 : i32
    return %c0_i32, %c0_i32_0 : i32, i32
  }
  func.func @transform_10(%arg0: i32) -> (i32, i32) {
    %c0_i32 = arith.constant 0 : i32
    %c0_i32_0 = arith.constant 0 : i32
    %c0_i32_1 = arith.constant 0 : i32
    return %c0_i32, %c0_i32_0 : i32, i32
  }
  func.func @transform_11(%arg0: i32) -> (i32, i32) {
    %c0_i32 = arith.constant 0 : i32
    %c0_i32_0 = arith.constant 0 : i32
    %c0_i32_1 = arith.constant 0 : i32
    return %c0_i32, %c0_i32_0 : i32, i32
  }
  func.func @transform_12(%arg0: i32) -> (i32, i32) {
    %c0_i32 = arith.constant 0 : i32
    %c0_i32_0 = arith.constant 0 : i32
    return %arg0, %c0_i32 : i32, i32
  }
}

</mosaic_0001>

<bundles_post_ra>
// kernel: forward_pallas.1
= control target key start
LH: loop header
LB: loop body
LE: loop exit
PB: predicated region body
PF: predicated region fallthrough
CT: control target
= control target key end

     0   :  { %17 = vsyncpa [#allocation3], 0  ;;  %s6350_s21 = smov [#allocation2]   ;;  %s9036_s0 = inlined_call_operand.vmem [shape: f32[1,240,30], index: 0, kind: input, shape index: {}]   ;;  %s9037_s1 = inlined_call_operand.vmem [shape: f32[3,30,280], index: 1, kind: input, shape index: {}]   ;;  %s9038_s2 = inlined_call_operand.vmem [shape: f32[1,280], index: 2, kind: input, shape index: {}]   ;;  %s9039_s3 = inlined_call_operand.vmem [shape: f32[1,280], index: 3, kind: input, shape index: {}]   ;;  %s9040_s4 = inlined_call_operand.hbm [shape: f32[3,270,192], index: 4, kind: input, shape index: {}]   ;;  %s9041_s5 = inlined_call_operand.vmem [shape: f32[1,192], index: 5, kind: input, shape index: {}]   ;;  %s9042_s6 = inlined_call_operand.vmem [shape: f32[1,192], index: 6, kind: input, shape index: {}]   ;;  %s9043_s7 = inlined_call_operand.vmem [shape: f32[3,192,200], index: 7, kind: input, shape index: {}]   ;;  %s9044_s8 = inlined_call_operand.vmem [shape: f32[1,200], index: 8, kind: input, shape index: {}]   ;;  %s9045_s9 = inlined_call_operand.vmem [shape: f32[1,200], index: 9, kind: input, shape index: {}]   ;;  %s9046_s10 = inlined_call_operand.vmem [shape: f32[900,10], index: 10, kind: input, shape index: {}]   ;;  %s9047_s11 = inlined_call_operand.vmem [shape: f32[1,10], index: 11, kind: input, shape index: {}]   ;;  %s9048_s12 = inlined_call_operand.vmem [shape: f32[8,10], index: 12, kind: output, shape index: {}]  }
   0x1   :  { %s31_s22 = sshll.u32 %s6350_s21, 4  ;;  %s6326_s25 = scalar_lea.hbm %s9040_s4, 26112  ;;  %s32_s22 = int_to_ptr.vmem [resolvable:$true] %s31_s22 }
   0x2   :  { %p6327_p0 = scmp.ne.s32.totalorder %s9040_s4, %s6326_s25  ;;  %p6330_p1 = scmp.lt.u32.totalorder %s6326_s25, %s9040_s4 }
   0x4   :  { %p6332_p2 = pnand %p6330_p1, %p6327_p0 }
   0x6   :  { %6335 = shalt.err (!%p6332_p2)
}
   0x7   :  { %s6336_s30 = scalar_lea.vmem %s32_s22, 26112  ;;  %p6341_p4 = scmp.lt.s32.totalorder %s32_s22, %s32_s22 }
   0x8   :  { %p6337_p3 = scmp.ne.s32.totalorder %s32_s22, %s6336_s30  ;;  %p6342_p5 = scmp.lt.s32.totalorder %s6336_s30, %s6336_s30 }
   0xa   :  { %p6343_p6 = por %p6342_p5, %p6341_p4 }
   0xc   :  { %p6344_p7 = pnand %p6343_p6, %p6337_p3 }
   0xe   :  { %6347 = shalt.err (!%p6344_p7)
}
   0xf   :  { %s6351_s13 = smov 256   ;;  %s6352_s14 = smov 16  }
  0x10   :  { %37 = dma.hbm_to_vmem [thread:$0]  %s9040_s4, 26112, %s32_s22, [#allocation3], %s6351_s13, %s6351_s13, %s6352_s14  }
  0x11   :  { %6348 = dma.done.wait [#allocation3], 26112  }
  0x12   :  { %6349 = vsyncadd [#allocation3], 4294941184  ;;  %v9049_v0 = vmov 0.0   ;;  %vm195_vm0 = vcmask 1045504   ;;  %v4617_v1 = vld [vmem:[%s9037_s1 + $0x68] sm:$0xff]  ;;  %v4620_v2 = vld [vmem:[%s9037_s1 + $0x80] sm:$0xff] }
  0x13   :  { %269 = vmatprep.mubr.f32.mxu0 %v9049_v0  ;;  %v4616_v3 = vld [vmem:[%s9037_s1 + $0x60] sm:$0xff]  ;;  %v5339_v4 = vpack.c.bf16 %v4620_v2, %v4617_v1  ;;  %v4619_v5 = vld [vmem:[%s9037_s1 + $0x78] sm:$0xff]  ;;  %v4626_v7 = vld [vmem:[%s9037_s1 + $0xb0] sm:$0x3f]  ;;  %vm6354_vm1 = vmmov 1   ;;  %vm110_vm3 = vcmask 244736  }
  0x14   :  { %v4623_v6 = vld [vmem:[%s9037_s1 + $0x98] sm:$0xff]  ;;  %v5341_v8 = vpack.c.bf16 %v4619_v5, %v4616_v3  ;;  %vm6458_vm2 = vmpackc.low %vm195_vm0, %vm6354_vm1  ;;  %v4622_v11 = vld [vmem:[%s9037_s1 + $0x90] sm:$0xff]  ;;  %vm2094_vm4 = vcmask 965632   ;;  %vm2344_vm5 = vcmask 113664   ;;  %vm3513_vm6 = vcmask 523264   ;;  %s6358_s17 = smov 52  }
  0x15   :  { %v5343_v9 = vpack.c.bf16 %v4626_v7, %v4623_v6  ;;  %v4625_v12 = vld [vmem:[%s9037_s1 + $0xa8] sm:$0x3f]  ;;  %5340 = vmatprep.subr.bf16.mxu0 %v5339_v4  ;;  %v4618_v13 = vld [vmem:[%s9037_s1 + $0x70] sm:$0xff]  ;;  %v4624_v17 = vld [vmem:[%s9037_s1 + $0xa0] sm:$0xff]  ;;  %vm4118_vm7 = vcmask 883712   ;;  %vm4150_vm8 = vcmask 424960  }
  0x16   :  { %v4621_v14 = vld [vmem:[%s9037_s1 + $0x88] sm:$0xff]  ;;  %5342 = vmatpush1.bf16.msra.mxu0 %v5341_v8  ;;  %v5346_v15 = vpack.c.bf16 %v4625_v12, %v4622_v11  ;;  %v4627_v18 = vld [vmem:[%s9037_s1 + $0xb8] sm:$0x3f]  ;;  %v6505_v22 = vld [vmem:[%s9036_s0 + $0x40] sm:$0xff]  ;;  %vm4160_vm9 = vcmask 850944   ;;  %vm4171_vm10 = vcmask 228352  }
  0x17   :  { %v5349_v16 = vpack.c.bf16 %v4621_v14, %v4618_v13  ;;  %5345 = vmatprep.subr.msk.bf16.mxu0 %vm6458_vm2, %v5343_v9  ;;  %v5353_v19 = vpack.c.bf16 %v4627_v18, %v4624_v17  ;;  %v6485_v20 = vld [vmem:[%s9036_s0 + $0x38] sm:$0xff]  ;;  %v6494_v21 = vld [vmem:[%s9036_s0 + $0x8] sm:$0xff]  ;;  %v6511_v23 = vld [vmem:[%s9036_s0 + $0x10] sm:$0xff]  ;;  %vm4181_vm11 = vcmask 654336   ;;  %vm4309_vm12 = vcmask 31744  }
  0x18   :  { %5206 = vmatprep.mubr.msk.f32.mxu1 %vm110_vm3, %v6485_v20  ;;  %v6516_v24 = vld [vmem:[%s9036_s0 + $0x48] sm:$0xff]  ;;  %v87_v25 = vld [vmem:[%s9037_s1 + $0x10] sm:$0xff]  ;;  %v6529_v27 = vld [vmem:[%s9036_s0 + $0x18] sm:$0xff]  ;;  %vm4312_vm13 = vcmask 1043456   ;;  %vm4596_vm14 = vcmask 80896  }
  0x19   :  { %5873 = vmatprep.subr.bf16.mxu1 %v5349_v16  ;;  %v90_v26 = vld [vmem:[%s9037_s1 + $0x28] sm:$0xff]  ;;  %v93_v29 = vld [vmem:[%s9037_s1 + $0x40] sm:$0xff]  ;;  %v96_v30 = vld [vmem:[%s9037_s1 + $0x58] sm:$0x3f] }
  0x1a   :  { %5875 = vmatpush3.bf16.msra.mxu1 %v5349_v16  ;;  %5348 = vmatpush1.bf16.msk.msra.mxu0 %vm6458_vm2, %v5346_v15  ;;  %v5369_v28 = vpack.c.bf16 %v90_v26, %v87_v25  ;;  %v6546_v31 = vld [vmem:[%s9036_s0 + $0x50] sm:$0xff]  ;;  %v5373_v32 = vpack.c.bf16 %v96_v30, %v93_v29  ;;  %v4751_v34 = vld [vmem:[%s9037_s1 + $0xe8] sm:$0xff]  ;;  %v6558_v35 = vld [vmem:[%s9036_s0 + $0x58] sm:$0xff] }
  0x1b   :  { %5874 = vmatprep.subr.msk.bf16.mxu1 %vm6458_vm2, %v5353_v19  ;;  %5350 = vmatprep.subr.bf16.mxu0 %v5349_v16  ;;  %v4748_v33 = vld [vmem:[%s9037_s1 + $0xd0] sm:$0xff]  ;;  %v86_v36 = vld [vmem:[%s9037_s1 + $0x8] sm:$0xff]  ;;  %v89_v37 = vld [vmem:[%s9037_s1 + $0x20] sm:$0xff] }
  0x1c   :  { %v5359_v38 = vpack.c.bf16 %v89_v37, %v86_v36  ;;  %v6572_v39 = vpack.c.bf16 %v4751_v34, %v4748_v33  ;;  %v6581_v40 = vld [vmem:[%s9036_s0 + $0x60] sm:$0xff]  ;;  %v6592_v42 = vld [vmem:[%s9036_s0 + $0x68] sm:$0xff]  ;;  %v6606_v43 = vld [vmem:[%s9036_s0 + $0x70] sm:$0xff] }
  0x1d   :  { %4630 = vmatmul.mubr.msk.f32.vlgmr.msra.gmra.mrb[0].mxu0 %vm110_vm3, %v6494_v21  ;;  %v6587_v41 = vld [vmem:[%s9036_s0 + $0x20] sm:$0xff]  ;;  %v6612_v44 = vld [vmem:[%s9036_s0 + $0x28] sm:$0xff]  ;;  %v6617_v45 = vld [vmem:[%s9036_s0 + $0x78] sm:$0xff] }
  0x1e   :  { %5876 = vmatpush3.bf16.msk.msra.mxu1 %vm6458_vm2, %v5353_v19  ;;  %5352 = vmatpush3.bf16.msra.mxu0 %v5349_v16  ;;  %v6628_v46 = vld [vmem:[%s9036_s0 + $0x80] sm:$0xff]  ;;  %v6634_v47 = vld [vmem:[%s9036_s0 + $0x30] sm:$0xff]  ;;  %v6639_v48 = vld [vmem:[%s9036_s0 + $0x88] sm:$0xff] }
  0x1f   :  { %275 = vmatprep.mubr.f32.mxu0 %v9049_v0  ;;  %5355 = vmatprep.subr.msk.bf16.mxu0 %vm6458_vm2, %v5353_v19  ;;  %v6650_v49 = vld [vmem:[%s9036_s0 + $0x90] sm:$0xff]  ;;  %v6656_v50 = vld [vmem:[%s9036_s0 + $0x98] sm:$0xff]  ;;  %v6667_v51 = vld [vmem:[%s9036_s0 + $0xa0] sm:$0xff] }
  0x20   :  { %5370 = vmatprep.subr.bf16.mxu1 %v5369_v28  ;;  %v6673_v52 = vld [vmem:[%s9036_s0 + $0xa8] sm:$0xff]  ;;  %v6684_v53 = vld [vmem:[%s9036_s0 + $0xb0] sm:$0xff]  ;;  %v6690_v54 = vld [vmem:[%s9036_s0 + $0xb8] sm:$0xff] }
  0x21   :  { %5207 = vmatmul.mubr.msk.f32.vlgmr.msra.gmra.mrb[0].mxu1 %vm110_vm3, %v6505_v22  ;;  %4631 = vmatmul.mubr.msk.f32.gmra.mrb[2].mxu0 %vm110_vm3, %v6511_v23  ;;  %v6701_v55 = vld [vmem:[%s9036_s0 + $0xc0] sm:$0xff]  ;;  %v6707_v56 = vld [vmem:[%s9036_s0 + $0xc8] sm:$0xff]  ;;  %v6718_v57 = vld [vmem:[%s9036_s0 + $0xd0] sm:$0xff] }
  0x22   :  { %5209 = vmatprep.mubr.msk.f32.mxu1 %vm110_vm3, %v6516_v24  ;;  %281 = vmatprep.mubr.f32.mxu0 %v9049_v0  ;;  %v6724_v58 = vld [vmem:[%s9036_s0 + $0xd8] sm:$0xff]  ;;  %v6735_v59 = vld [vmem:[%s9036_s0 + $0xe0] sm:$0xff]  ;;  %v95_v4 = vld [vmem:[%s9037_s1 + $0x50] sm:$0x3f] }
  0x23   :  { %5372 = vmatpush3.bf16.msra.mxu1 %v5369_v28  ;;  %5358 = vmatpush3.bf16.msk.msra.mxu0 %vm6458_vm2, %v5353_v19  ;;  %v6741_v60 = vld [vmem:[%s9036_s0] sm:$0xff]  ;;  %v4757_v62 = vld [vmem:[%s9037_s1 + $0x118] sm:$0x3f]  ;;  %v91_v7 = vld [vmem:[%s9037_s1 + $0x30] sm:$0xff] }
  0x24   :  { %5375 = vmatprep.subr.msk.bf16.mxu1 %vm6458_vm2, %v5373_v32  ;;  %5360 = vmatprep.subr.bf16.mxu0 %v5359_v38  ;;  %v4754_v61 = vld [vmem:[%s9037_s1 + $0x100] sm:$0xff]  ;;  %v88_v2 = vld [vmem:[%s9037_s1 + $0x18] sm:$0xff]  ;;  %v94_v8 = vld [vmem:[%s9037_s1 + $0x48] sm:$0x3f] }
  0x25   :  { %5210 = vmatmul.mubr.msk.f32.gmra.mrb[2].mxu1 %vm110_vm3, %v6546_v31  ;;  %4632 = vmatmul.mubr.msk.f32.gmra.mrb[4].mxu0 %vm110_vm3, %v6529_v27  ;;  %v5393_v63 = vpack.c.bf16 %v4757_v62, %v4754_v61  ;;  %v85_v1 = vld [vmem:[%s9037_s1] sm:$0xff]  ;;  %v92_v3 = vld [vmem:[%s9037_s1 + $0x38] sm:$0xff]  ;;  %v4747_v9 = vld [vmem:[%s9037_s1 + $0xc8] sm:$0xff]  ;;  %v5366_v12 = vpack.c.bf16 %v94_v8, %v91_v7 }
  0x26   :  { %5212 = vmatprep.mubr.msk.f32.mxu1 %vm110_vm3, %v6558_v35  ;;  %287 = vmatprep.mubr.f32.mxu0 %v9049_v0  ;;  %v5361_v5 = vpack.c.bf16 %v88_v2, %v85_v1  ;;  %v5363_v6 = vpack.c.bf16 %v95_v4, %v92_v3  ;;  %v4750_v11 = vld [vmem:[%s9037_s1 + $0xe0] sm:$0xff]  ;;  %v4749_v15 = vld [vmem:[%s9037_s1 + $0xd8] sm:$0xff]  ;;  %v4756_v17 = vld [vmem:[%s9037_s1 + $0x110] sm:$0x3f] }
  0x27   :  { %5378 = vmatpush3.bf16.msk.msra.mxu1 %vm6458_vm2, %v5373_v32  ;;  %v5379_v13 = vpack.c.bf16 %v4750_v11, %v4747_v9  ;;  %v4746_v14 = vld [vmem:[%s9037_s1 + $0xc0] sm:$0xff]  ;;  %v4753_v16 = vld [vmem:[%s9037_s1 + $0xf8] sm:$0xff]  ;;  %v4752_v25 = vld [vmem:[%s9037_s1 + $0xf0] sm:$0xff] }
  0x28   :  { %5390 = vmatprep.subr.bf16.mxu1 %v6572_v39  ;;  %v5381_v18 = vpack.c.bf16 %v4749_v15, %v4746_v14  ;;  %v5383_v19 = vpack.c.bf16 %v4756_v17, %v4753_v16  ;;  %v4755_v26 = vld [vmem:[%s9037_s1 + $0x108] sm:$0x3f]  ;;  %v7139_v30 = vld [vmem:[%s9038_s2] sm:$0x7]  ;;  %s6355_s2 = smov 118  }
  0x29   :  { %5213 = vmatmul.mubr.msk.f32.gmra.mrb[4].mxu1 %vm110_vm3, %v6581_v40  ;;  %4633 = vmatmul.mubr.msk.f32.gmra.mrb[6].mxu0 %vm110_vm3, %v6587_v41  ;;  %v5386_v28 = vpack.c.bf16 %v4755_v26, %v4752_v25  ;;  %v7147_v32 = vld [vmem:[%s9039_s3] sm:$0x7]  ;;  %s6361_s3 = smov 80  }
  0x2a   :  { %5215 = vmatprep.mubr.msk.f32.mxu1 %vm110_vm3, %v6592_v42  ;;  %293 = vmatprep.mubr.f32.mxu0 %v9049_v0 }
  0x2d   :  { %5216 = vmatmul.mubr.msk.f32.gmra.mrb[6].mxu1 %vm110_vm3, %v6606_v43  ;;  %4634 = vmatmul.mubr.msk.f32.gmra.mrb[8].mxu0 %vm110_vm3, %v6612_v44 }
  0x2e   :  { %5218 = vmatprep.mubr.msk.f32.mxu1 %vm110_vm3, %v6617_v45  ;;  %299 = vmatprep.mubr.f32.mxu0 %v9049_v0 }
  0x31   :  { %5219 = vmatmul.mubr.msk.f32.gmra.mrb[8].mxu1 %vm110_vm3, %v6628_v46  ;;  %4635 = vmatmul.mubr.msk.f32.gmra.mrb[10].mxu0 %vm110_vm3, %v6634_v47 }
  0x32   :  { %5221 = vmatprep.mubr.msk.f32.mxu1 %vm110_vm3, %v6639_v48  ;;  %305 = vmatprep.mubr.f32.mxu0 %v9049_v0 }
  0x35   :  { %5222 = vmatmul.mubr.msk.f32.gmra.mrb[10].mxu1 %vm110_vm3, %v6650_v49  ;;  %4636 = vmatmul.mubr.msk.f32.gmra.mrb[12].mxu0 %vm110_vm3, %v6485_v20 }
  0x36   :  { %5224 = vmatprep.mubr.msk.f32.mxu1 %vm110_vm3, %v6656_v50  ;;  %311 = vmatprep.mubr.f32.mxu0 %v9049_v0 }
  0x39   :  { %5225 = vmatmul.mubr.msk.f32.gmra.mrb[12].mxu1 %vm110_vm3, %v6667_v51  ;;  %4637 = vmatmul.mubr.msk.f32.gmra.mrb[14].mxu0 %vm110_vm3, %v6505_v22 }
  0x3a   :  { %5227 = vmatprep.mubr.msk.f32.mxu1 %vm110_vm3, %v6673_v52  ;;  %317 = vmatprep.mubr.f32.mxu0 %v9049_v0 }
  0x3d   :  { %5228 = vmatmul.mubr.msk.f32.gmra.mrb[14].mxu1 %vm110_vm3, %v6684_v53  ;;  %4638 = vmatmul.mubr.msk.f32.gmra.mrb[16].mxu0 %vm110_vm3, %v6516_v24 }
  0x3e   :  { %5230 = vmatprep.mubr.msk.f32.mxu1 %vm110_vm3, %v6690_v54  ;;  %323 = vmatprep.mubr.f32.mxu0 %v9049_v0 }
  0x41   :  { %5231 = vmatmul.mubr.msk.f32.gmra.mrb[16].mxu1 %vm110_vm3, %v6701_v55  ;;  %4639 = vmatmul.mubr.msk.f32.gmra.mrb[18].mxu0 %vm110_vm3, %v6546_v31 }
  0x42   :  { %5233 = vmatprep.mubr.msk.f32.mxu1 %vm110_vm3, %v6707_v56  ;;  %329 = vmatprep.mubr.f32.mxu0 %v9049_v0 }
  0x45   :  { %5234 = vmatmul.mubr.msk.f32.gmra.mrb[18].mxu1 %vm110_vm3, %v6718_v57  ;;  %4640 = vmatmul.mubr.msk.f32.gmra.mrb[20].mxu0 %vm110_vm3, %v6558_v35 }
  0x46   :  { %5236 = vmatprep.mubr.msk.f32.mxu1 %vm110_vm3, %v6724_v58  ;;  %335 = vmatprep.mubr.f32.mxu0 %v9049_v0 }
  0x49   :  { %5237 = vmatmul.mubr.msk.f32.gmra.mrb[20].mxu1 %vm110_vm3, %v6735_v59  ;;  %4641 = vmatmul.mubr.msk.f32.gmra.mrb[22].mxu0 %vm110_vm3, %v6581_v40 }
  0x4a   :  { %5247 = vmatprep.mubr.msk.f32.mxu1 %vm110_vm3, %v6741_v60  ;;  %341 = vmatprep.mubr.f32.mxu0 %v9049_v0 }
  0x4d   :  { %5248 = vmatmul.mubr.msk.f32.vlgmr.msra.gmra.mrb[22].mxu1 %vm110_vm3, %v6494_v21  ;;  %4642 = vmatmul.mubr.msk.f32.gmra.mrb[24].mxu0 %vm110_vm3, %v6592_v42 }
  0x4e   :  { %5250 = vmatprep.mubr.msk.f32.mxu1 %vm110_vm3, %v6511_v23  ;;  %347 = vmatprep.mubr.f32.mxu0 %v9049_v0 }
  0x4f   :  { %5392 = vmatpush3.bf16.msra.mxu1 %v6572_v39 }
  0x50   :  { %5395 = vmatprep.subr.msk.bf16.mxu1 %vm6458_vm2, %v5393_v63 }
  0x51   :  { %5251 = vmatmul.mubr.msk.f32.gmra.mrb[24].mxu1 %vm110_vm3, %v6529_v27  ;;  %4643 = vmatmul.mubr.msk.f32.gmra.mrb[26].mxu0 %vm110_vm3, %v6606_v43 }
  0x52   :  { %5253 = vmatprep.mubr.msk.f32.mxu1 %vm110_vm3, %v6587_v41  ;;  %353 = vmatprep.mubr.f32.mxu0 %v9049_v0 }
  0x53   :  { %5398 = vmatpush3.bf16.msk.msra.mxu1 %vm6458_vm2, %v5393_v63 }
  0x55   :  { %5254 = vmatmul.mubr.msk.f32.gmra.mrb[26].mxu1 %vm110_vm3, %v6612_v44  ;;  %4644 = vmatmul.mubr.msk.f32.gmra.mrb[28].mxu0 %vm110_vm3, %v6617_v45 }
  0x56   :  { %5256 = vmatprep.mubr.msk.f32.mxu1 %vm110_vm3, %v6634_v47  ;;  %359 = vmatprep.mubr.f32.mxu0 %v9049_v0 }
  0x59   :  { %5257 = vmatmul.mubr.msk.f32.gmra.mrb[0].mxu1 %vm110_vm3, %v6485_v20  ;;  %4645 = vmatmul.mubr.msk.f32.gmra.mrb[30].mxu0 %vm110_vm3, %v6628_v46 }
  0x5a   :  { %5259 = vmatprep.mubr.msk.f32.mxu1 %vm110_vm3, %v6505_v22  ;;  %365 = vmatprep.mubr.f32.mxu0 %v9049_v0 }
  0x5d   :  { %5260 = vmatmul.mubr.msk.f32.gmra.mrb[2].mxu1 %vm110_vm3, %v6516_v24  ;;  %4646 = vmatmul.mubr.msk.f32.gmra.mrb[32].mxu0 %vm110_vm3, %v6639_v48 }
  0x5e   :  { %5262 = vmatprep.mubr.msk.f32.mxu1 %vm110_vm3, %v6546_v31  ;;  %371 = vmatprep.mubr.f32.mxu0 %v9049_v0 }
  0x61   :  { %5263 = vmatmul.mubr.msk.f32.gmra.mrb[4].mxu1 %vm110_vm3, %v6558_v35  ;;  %4647 = vmatmul.mubr.msk.f32.gmra.mrb[34].mxu0 %vm110_vm3, %v6650_v49 }
  0x62   :  { %5265 = vmatprep.mubr.msk.f32.mxu1 %vm110_vm3, %v6581_v40  ;;  %377 = vmatprep.mubr.f32.mxu0 %v9049_v0 }
  0x65   :  { %5266 = vmatmul.mubr.msk.f32.gmra.mrb[6].mxu1 %vm110_vm3, %v6592_v42  ;;  %4648 = vmatmul.mubr.msk.f32.gmra.mrb[36].mxu0 %vm110_vm3, %v6656_v50 }
  0x66   :  { %5268 = vmatprep.mubr.msk.f32.mxu1 %vm110_vm3, %v6606_v43  ;;  %383 = vmatprep.mubr.f32.mxu0 %v9049_v0 }
  0x69   :  { %5269 = vmatmul.mubr.msk.f32.gmra.mrb[8].mxu1 %vm110_vm3, %v6617_v45  ;;  %4649 = vmatmul.mubr.msk.f32.gmra.mrb[38].mxu0 %vm110_vm3, %v6667_v51 }
  0x6a   :  { %5271 = vmatprep.mubr.msk.f32.mxu1 %vm110_vm3, %v6628_v46  ;;  %389 = vmatprep.mubr.f32.mxu0 %v9049_v0 }
  0x6d   :  { %5272 = vmatmul.mubr.msk.f32.gmra.mrb[10].mxu1 %vm110_vm3, %v6639_v48  ;;  %4650 = vmatmul.mubr.msk.f32.gmra.mrb[40].mxu0 %vm110_vm3, %v6673_v52 }
  0x6e   :  { %5274 = vmatprep.mubr.msk.f32.mxu1 %vm110_vm3, %v6650_v49  ;;  %395 = vmatprep.mubr.f32.mxu0 %v9049_v0 }
  0x71   :  { %5275 = vmatmul.mubr.msk.f32.gmra.mrb[12].mxu1 %vm110_vm3, %v6656_v50  ;;  %4651 = vmatmul.mubr.msk.f32.gmra.mrb[42].mxu0 %vm110_vm3, %v6684_v53 }
  0x72   :  { %5277 = vmatprep.mubr.msk.f32.mxu1 %vm110_vm3, %v6667_v51  ;;  %401 = vmatprep.mubr.f32.mxu0 %v9049_v0 }
  0x75   :  { %5278 = vmatmul.mubr.msk.f32.gmra.mrb[14].mxu1 %vm110_vm3, %v6673_v52  ;;  %4652 = vmatmul.mubr.msk.f32.gmra.mrb[44].mxu0 %vm110_vm3, %v6690_v54 }
  0x76   :  { %5280 = vmatprep.mubr.msk.f32.mxu1 %vm110_vm3, %v6684_v53  ;;  %407 = vmatprep.mubr.f32.mxu0 %v9049_v0 }
  0x79   :  { %5281 = vmatmul.mubr.msk.f32.gmra.mrb[16].mxu1 %vm110_vm3, %v6690_v54  ;;  %4653 = vmatmul.mubr.msk.f32.gmra.mrb[46].mxu0 %vm110_vm3, %v6701_v55 }
  0x7a   :  { %5283 = vmatprep.mubr.msk.f32.mxu1 %vm110_vm3, %v6701_v55  ;;  %413 = vmatprep.mubr.f32.mxu0 %v9049_v0 }
  0x7d   :  { %5284 = vmatmul.mubr.msk.f32.gmra.mrb[18].mxu1 %vm110_vm3, %v6707_v56  ;;  %4654 = vmatmul.mubr.msk.f32.gmra.mrb[48].mxu0 %vm110_vm3, %v6707_v56 }
  0x7e   :  { %5286 = vmatprep.mubr.msk.f32.mxu1 %vm110_vm3, %v6718_v57  ;;  %419 = vmatprep.mubr.f32.mxu0 %v9049_v0 }
  0x81   :  { %5287 = vmatmul.mubr.msk.f32.gmra.mrb[20].mxu1 %vm110_vm3, %v6724_v58  ;;  %4655 = vmatmul.mubr.msk.f32.gmra.mrb[50].mxu0 %vm110_vm3, %v6718_v57 }
  0x82   :  { %5297 = vmatprep.mubr.msk.f32.mxu1 %vm110_vm3, %v6511_v23  ;;  %425 = vmatprep.mubr.f32.mxu0 %v9049_v0 }
  0x85   :  { %5298 = vmatmul.mubr.msk.f32.vlgmr.msra.gmra.mrb[22].mxu1 %vm110_vm3, %v6529_v27  ;;  %4656 = vmatmul.mubr.msk.f32.gmra.mrb[52].mxu0 %vm110_vm3, %v6724_v58 }
  0x86   :  { %5300 = vmatprep.mubr.msk.f32.mxu1 %vm110_vm3, %v6587_v41  ;;  %431 = vmatprep.mubr.f32.mxu0 %v9049_v0 }
  0x89   :  { %5301 = vmatmul.mubr.msk.f32.gmra.mrb[24].mxu1 %vm110_vm3, %v6612_v44  ;;  %4657 = vmatmul.mubr.msk.f32.gmra.mrb[54].mxu0 %vm110_vm3, %v6735_v59 }
  0x8a   :  { %5303 = vmatprep.mubr.msk.f32.mxu1 %vm110_vm3, %v6634_v47  ;;  %5197 = vmatprep.mubr.msk.f32.mxu0 %vm110_vm3, %v6494_v21 }
  0x8d   :  { %5304 = vmatmul.mubr.msk.f32.gmra.mrb[26].mxu1 %vm110_vm3, %v6485_v20  ;;  %5198 = vmatmul.mubr.msk.f32.vlgmr.msra.gmra.mrb[56].mxu0 %vm110_vm3, %v6511_v23 }
  0x8e   :  { %5306 = vmatprep.mubr.msk.f32.mxu1 %vm110_vm3, %v6505_v22  ;;  %5362 = vmatpush1.bf16.msra.mxu0 %v5361_v5 }
  0x8f   :  { %5200 = vmatprep.mubr.msk.f32.mxu0 %vm110_vm3, %v6529_v27  ;;  %5365 = vmatprep.subr.msk.bf16.mxu0 %vm6458_vm2, %v5363_v6 }
  0x91   :  { %5307 = vmatmul.mubr.msk.f32.gmra.mrb[0].mxu1 %vm110_vm3, %v6516_v24  ;;  %5201 = vmatmul.mubr.msk.f32.gmra.mrb[58].mxu0 %vm110_vm3, %v6587_v41 }
  0x92   :  { %5309 = vmatprep.mubr.msk.f32.mxu1 %vm110_vm3, %v6546_v31  ;;  %5203 = vmatprep.mubr.msk.f32.mxu0 %vm110_vm3, %v6612_v44 }
  0x93   :  { %5368 = vmatpush1.bf16.msk.msra.mxu0 %vm6458_vm2, %v5366_v12 }
  0x94   :  { %5380 = vmatprep.subr.bf16.mxu0 %v5379_v13 }
  0x95   :  { %5310 = vmatmul.mubr.msk.f32.gmra.mrb[2].mxu1 %vm110_vm3, %v6558_v35  ;;  %5204 = vmatmul.mubr.msk.f32.gmra.mrb[60].mxu0 %vm110_vm3, %v6634_v47 }
  0x96   :  { %5312 = vmatprep.mubr.msk.f32.mxu1 %vm110_vm3, %v6581_v40  ;;  %719 = vmatprep.mubr.f32.mxu0 %v9049_v0 }
  0x99   :  { %5313 = vmatmul.mubr.msk.f32.gmra.mrb[4].mxu1 %vm110_vm3, %v6592_v42  ;;  %4689 = vmatmul.mubr.msk.f32.vlgmr.msra.gmra.mrb[0].mxu0 %vm110_vm3, %v6741_v60 }
  0x9a   :  { %5315 = vmatprep.mubr.msk.f32.mxu1 %vm110_vm3, %v6606_v43  ;;  %5382 = vmatpush1.bf16.msra.mxu0 %v5381_v18 }
  0x9b   :  { %725 = vmatprep.mubr.f32.mxu0 %v9049_v0  ;;  %5385 = vmatprep.subr.msk.bf16.mxu0 %vm6458_vm2, %v5383_v19 }
  0x9d   :  { %5316 = vmatmul.mubr.msk.f32.gmra.mrb[6].mxu1 %vm110_vm3, %v6617_v45  ;;  %4690 = vmatmul.mubr.msk.f32.gmra.mrb[2].mxu0 %vm110_vm3, %v6494_v21  ;;  %v7005_v21 = vld [vmem:[%s9036_s0 + $0xe8] sm:$0xff] }
  0x9e   :  { %5318 = vmatprep.mubr.msk.f32.mxu1 %vm110_vm3, %v6628_v46  ;;  %731 = vmatprep.mubr.f32.mxu0 %v9049_v0 }
  0x9f   :  { %5388 = vmatpush1.bf16.msk.msra.mxu0 %vm6458_vm2, %v5386_v28 }
  0xa1   :  { %5319 = vmatmul.mubr.msk.f32.gmra.mrb[8].mxu1 %vm110_vm3, %v6639_v48  ;;  %4691 = vmatmul.mubr.msk.f32.gmra.mrb[4].mxu0 %vm110_vm3, %v6511_v23 }
  0xa2   :  { %5321 = vmatprep.mubr.msk.f32.mxu1 %vm110_vm3, %v6650_v49  ;;  %737 = vmatprep.mubr.f32.mxu0 %v9049_v0 }
  0xa5   :  { %5322 = vmatmul.mubr.msk.f32.gmra.mrb[10].mxu1 %vm110_vm3, %v6656_v50  ;;  %4692 = vmatmul.mubr.msk.f32.gmra.mrb[6].mxu0 %vm110_vm3, %v6529_v27 }
  0xa6   :  { %5324 = vmatprep.mubr.msk.f32.mxu1 %vm110_vm3, %v6667_v51  ;;  %743 = vmatprep.mubr.f32.mxu0 %v9049_v0 }
  0xa9   :  { %5325 = vmatmul.mubr.msk.f32.gmra.mrb[12].mxu1 %vm110_vm3, %v6673_v52  ;;  %4693 = vmatmul.mubr.msk.f32.gmra.mrb[8].mxu0 %vm110_vm3, %v6587_v41 }
  0xaa   :  { %5327 = vmatprep.mubr.msk.f32.mxu1 %vm110_vm3, %v6684_v53  ;;  %749 = vmatprep.mubr.f32.mxu0 %v9049_v0 }
  0xad   :  { %5328 = vmatmul.mubr.msk.f32.gmra.mrb[14].mxu1 %vm110_vm3, %v6690_v54  ;;  %4694 = vmatmul.mubr.msk.f32.gmra.mrb[10].mxu0 %vm110_vm3, %v6612_v44 }
  0xae   :  { %5330 = vmatprep.mubr.msk.f32.mxu1 %vm110_vm3, %v6701_v55  ;;  %755 = vmatprep.mubr.f32.mxu0 %v9049_v0 }
  0xb1   :  { %5331 = vmatmul.mubr.msk.f32.gmra.mrb[16].mxu1 %vm110_vm3, %v6707_v56  ;;  %4695 = vmatmul.mubr.msk.f32.gmra.mrb[12].mxu0 %vm110_vm3, %v6634_v47 }
  0xb2   :  { %5333 = vmatprep.mubr.msk.f32.mxu1 %vm110_vm3, %v6718_v57  ;;  %761 = vmatprep.mubr.f32.mxu0 %v9049_v0 }
  0xb5   :  { %5334 = vmatmul.mubr.msk.f32.gmra.mrb[18].mxu1 %vm110_vm3, %v6724_v58  ;;  %4696 = vmatmul.mubr.msk.f32.gmra.mrb[14].mxu0 %vm110_vm3, %v6485_v20 }
  0xb6   :  { %5336 = vmatprep.mubr.msk.f32.mxu1 %vm110_vm3, %v6735_v59  ;;  %767 = vmatprep.mubr.f32.mxu0 %v9049_v0 }
  0xb9   :  { %5337 = vmatmul.mubr.msk.f32.gmra.mrb[20].mxu1 %vm110_vm3, %v7005_v21  ;;  %4697 = vmatmul.mubr.msk.f32.gmra.mrb[16].mxu0 %vm110_vm3, %v6505_v22 }
  0xba   :  { %773 = vmatprep.mubr.f32.mxu0 %v9049_v0 }
  0xbd   :  { %4698 = vmatmul.mubr.msk.f32.gmra.mrb[18].mxu0 %vm110_vm3, %v6516_v24 }
  0xbe   :  { %779 = vmatprep.mubr.f32.mxu0 %v9049_v0 }
  0xc1   :  { %4699 = vmatmul.mubr.msk.f32.gmra.mrb[20].mxu0 %vm110_vm3, %v6546_v31 }
  0xc2   :  { %785 = vmatprep.mubr.f32.mxu0 %v9049_v0 }
  0xc5   :  { %4700 = vmatmul.mubr.msk.f32.gmra.mrb[22].mxu0 %vm110_vm3, %v6558_v35 }
  0xc6   :  { %791 = vmatprep.mubr.f32.mxu0 %v9049_v0 }
  0xc9   :  { %4701 = vmatmul.mubr.msk.f32.gmra.mrb[24].mxu0 %vm110_vm3, %v6581_v40 }
  0xca   :  { %797 = vmatprep.mubr.f32.mxu0 %v9049_v0 }
  0xcd   :  { %4702 = vmatmul.mubr.msk.f32.gmra.mrb[26].mxu0 %vm110_vm3, %v6592_v42 }
  0xce   :  { %803 = vmatprep.mubr.f32.mxu0 %v9049_v0 }
  0xd1   :  { %4703 = vmatmul.mubr.msk.f32.gmra.mrb[28].mxu0 %vm110_vm3, %v6606_v43 }
  0xd2   :  { %809 = vmatprep.mubr.f32.mxu0 %v9049_v0 }
  0xd5   :  { %4704 = vmatmul.mubr.msk.f32.gmra.mrb[30].mxu0 %vm110_vm3, %v6617_v45 }
  0xd6   :  { %815 = vmatprep.mubr.f32.mxu0 %v9049_v0 }
  0xd9   :  { %4705 = vmatmul.mubr.msk.f32.gmra.mrb[32].mxu0 %vm110_vm3, %v6628_v46 }
  0xda   :  { %821 = vmatprep.mubr.f32.mxu0 %v9049_v0 }
  0xdd   :  { %4706 = vmatmul.mubr.msk.f32.gmra.mrb[34].mxu0 %vm110_vm3, %v6639_v48 }
  0xde   :  { %827 = vmatprep.mubr.f32.mxu0 %v9049_v0 }
  0xe1   :  { %4707 = vmatmul.mubr.msk.f32.gmra.mrb[36].mxu0 %vm110_vm3, %v6650_v49 }
  0xe2   :  { %833 = vmatprep.mubr.f32.mxu0 %v9049_v0 }
  0xe5   :  { %4708 = vmatmul.mubr.msk.f32.gmra.mrb[38].mxu0 %vm110_vm3, %v6656_v50 }
  0xe6   :  { %839 = vmatprep.mubr.f32.mxu0 %v9049_v0 }
  0xe9   :  { %4709 = vmatmul.mubr.msk.f32.gmra.mrb[40].mxu0 %vm110_vm3, %v6667_v51 }
  0xea   :  { %845 = vmatprep.mubr.f32.mxu0 %v9049_v0 }
  0xed   :  { %4710 = vmatmul.mubr.msk.f32.gmra.mrb[42].mxu0 %vm110_vm3, %v6673_v52 }
  0xee   :  { %851 = vmatprep.mubr.f32.mxu0 %v9049_v0 }
  0xf1   :  { %4711 = vmatmul.mubr.msk.f32.gmra.mrb[44].mxu0 %vm110_vm3, %v6684_v53 }
  0xf2   :  { %857 = vmatprep.mubr.f32.mxu0 %v9049_v0 }
  0xf5   :  { %4712 = vmatmul.mubr.msk.f32.gmra.mrb[46].mxu0 %vm110_vm3, %v6690_v54 }
  0xf6   :  { %863 = vmatprep.mubr.f32.mxu0 %v9049_v0 }
  0xf9   :  { %4713 = vmatmul.mubr.msk.f32.gmra.mrb[48].mxu0 %vm110_vm3, %v6701_v55 }
  0xfa   :  { %869 = vmatprep.mubr.f32.mxu0 %v9049_v0 }
  0xfd   :  { %4714 = vmatmul.mubr.msk.f32.gmra.mrb[50].mxu0 %vm110_vm3, %v6707_v56 }
  0xfe   :  { %875 = vmatprep.mubr.f32.mxu0 %v9049_v0 }
 0x101   :  { %4715 = vmatmul.mubr.msk.f32.gmra.mrb[52].mxu0 %vm110_vm3, %v6718_v57 }
 0x102   :  { %881 = vmatprep.mubr.f32.mxu0 %v9049_v0 }
 0x105   :  { %4716 = vmatmul.mubr.msk.f32.gmra.mrb[54].mxu0 %vm110_vm3, %v6724_v58 }
 0x106   :  { %1182 = vmatprep.mubr.f32.mxu0 %v9049_v0 }
 0x109   :  { %4760 = vmatmul.mubr.msk.f32.vlgmr.msra.gmra.mrb[0].mxu0 %vm110_vm3, %v6511_v23 }
 0x10a   :  { %1188 = vmatprep.mubr.f32.mxu0 %v9049_v0 }
 0x10d   :  { %4761 = vmatmul.mubr.msk.f32.gmra.mrb[2].mxu0 %vm110_vm3, %v6529_v27 }
 0x10e   :  { %1194 = vmatprep.mubr.f32.mxu0 %v9049_v0 }
 0x111   :  { %4762 = vmatmul.mubr.msk.f32.gmra.mrb[4].mxu0 %vm110_vm3, %v6587_v41 }
 0x112   :  { %1200 = vmatprep.mubr.f32.mxu0 %v9049_v0 }
 0x115   :  { %4763 = vmatmul.mubr.msk.f32.gmra.mrb[6].mxu0 %vm110_vm3, %v6612_v44 }
 0x116   :  { %1206 = vmatprep.mubr.f32.mxu0 %v9049_v0 }
 0x119   :  { %4764 = vmatmul.mubr.msk.f32.gmra.mrb[8].mxu0 %vm110_vm3, %v6634_v47 }
 0x11a   :  { %1212 = vmatprep.mubr.f32.mxu0 %v9049_v0 }
 0x11d   :  { %4765 = vmatmul.mubr.msk.f32.gmra.mrb[10].mxu0 %vm110_vm3, %v6485_v20  ;;  %v1642_v20 = vlaneseq }
 0x11e   :  { %1218 = vmatprep.mubr.f32.mxu0 %v9049_v0 }
 0x11f   :  { %v7130_v23 = vshrl.u32 %v1642_v20, 7 }
 0x121   :  { %4766 = vmatmul.mubr.msk.f32.gmra.mrb[12].mxu0 %vm110_vm3, %v6505_v22  ;;  %v1652_v27 = vsub.s32 2, %v7130_v23 }
 0x122   :  { %1224 = vmatprep.mubr.f32.mxu0 %v9049_v0 }
 0x123   :  { %v7150_v33 = vrot.slane %v7139_v30, %v1652_v27  ;;  %v7153_v38 = vrot.slane %v7147_v32, %v1652_v27 }
 0x125   :  { %4767 = vmatmul.mubr.msk.f32.gmra.mrb[14].mxu0 %vm110_vm3, %v6516_v24 }
 0x126   :  { %1230 = vmatprep.mubr.f32.mxu0 %v9049_v0 }
 0x129   :  { %4768 = vmatmul.mubr.msk.f32.gmra.mrb[16].mxu0 %vm110_vm3, %v6546_v31 }
 0x12a   :  { %1236 = vmatprep.mubr.f32.mxu0 %v9049_v0 }
 0x12d   :  { %4769 = vmatmul.mubr.msk.f32.gmra.mrb[18].mxu0 %vm110_vm3, %v6558_v35 }
 0x12e   :  { %1242 = vmatprep.mubr.f32.mxu0 %v9049_v0 }
 0x131   :  { %4770 = vmatmul.mubr.msk.f32.gmra.mrb[20].mxu0 %vm110_vm3, %v6581_v40 }
 0x132   :  { %1248 = vmatprep.mubr.f32.mxu0 %v9049_v0 }
 0x135   :  { %4771 = vmatmul.mubr.msk.f32.gmra.mrb[22].mxu0 %vm110_vm3, %v6592_v42 }
 0x136   :  { %1254 = vmatprep.mubr.f32.mxu0 %v9049_v0 }
 0x139   :  { %4772 = vmatmul.mubr.msk.f32.gmra.mrb[24].mxu0 %vm110_vm3, %v6606_v43 }
 0x13a   :  { %1260 = vmatprep.mubr.f32.mxu0 %v9049_v0 }
 0x13d   :  { %4773 = vmatmul.mubr.msk.f32.gmra.mrb[26].mxu0 %vm110_vm3, %v6617_v45 }
 0x13e   :  { %1266 = vmatprep.mubr.f32.mxu0 %v9049_v0 }
 0x141   :  { %4774 = vmatmul.mubr.msk.f32.gmra.mrb[28].mxu0 %vm110_vm3, %v6628_v46 }
 0x142   :  { %1272 = vmatprep.mubr.f32.mxu0 %v9049_v0 }
 0x145   :  { %4775 = vmatmul.mubr.msk.f32.gmra.mrb[30].mxu0 %vm110_vm3, %v6639_v48 }
 0x146   :  { %1278 = vmatprep.mubr.f32.mxu0 %v9049_v0 }
 0x149   :  { %4776 = vmatmul.mubr.msk.f32.gmra.mrb[32].mxu0 %vm110_vm3, %v6650_v49 }
 0x14a   :  { %1284 = vmatprep.mubr.f32.mxu0 %v9049_v0 }
 0x14d   :  { %4777 = vmatmul.mubr.msk.f32.gmra.mrb[34].mxu0 %vm110_vm3, %v6656_v50 }
 0x14e   :  { %1290 = vmatprep.mubr.f32.mxu0 %v9049_v0 }
 0x151   :  { %4778 = vmatmul.mubr.msk.f32.gmra.mrb[36].mxu0 %vm110_vm3, %v6667_v51 }
 0x152   :  { %1296 = vmatprep.mubr.f32.mxu0 %v9049_v0 }
 0x155   :  { %4779 = vmatmul.mubr.msk.f32.gmra.mrb[38].mxu0 %vm110_vm3, %v6673_v52 }
 0x156   :  { %1302 = vmatprep.mubr.f32.mxu0 %v9049_v0 }
 0x158   :  { %v5299_v22 = vpop.f32.mrb[22].mxu1 }
 0x159   :  { %v1417_v24 = vpop.f32.mrb[23].mxu1  ;;  %4780 = vmatmul.mubr.msk.f32.gmra.mrb[40].mxu0 %vm110_vm3, %v6684_v53 }
 0x15a   :  { %1308 = vmatprep.mubr.f32.mxu0 %v9049_v0 }
 0x15c   :  { %v5302_v29 = vpop.f32.mrb[24].mxu1 }
 0x15d   :  { %v1427_v31 = vpop.f32.mrb[25].mxu1  ;;  %4781 = vmatmul.mubr.msk.f32.gmra.mrb[42].mxu0 %vm110_vm3, %v6690_v54 }
 0x15e   :  { %1314 = vmatprep.mubr.f32.mxu0 %v9049_v0 }
 0x160   :  { %v5305_v34 = vpop.f32.mrb[26].mxu1  ;;  %v5199_v35 = vpop.f32.mrb[56].mxu0 }
 0x161   :  { %v1437_v36 = vpop.f32.mrb[27].mxu1  ;;  %v5877_v37 = vadd.f32 %v5299_v22, %v5199_v35  ;;  %v504_v39 = vpop.f32.mrb[57].mxu0  ;;  %4782 = vmatmul.mubr.msk.f32.gmra.mrb[44].mxu0 %vm110_vm3, %v6701_v55 }
 0x162   :  { %v5878_v40 = vadd.f32 %v1417_v24, %v504_v39  ;;  %1320 = vmatprep.mubr.f32.mxu0 %v9049_v0 }
 0x163   :  { %v1662_v41 = vmul.f32 %v5877_v37, %v7150_v33 }
 0x164   :  { %v5308_v42 = vpop.f32.mrb[0].mxu1  ;;  %v1659_v43 = vmul.f32 %v5878_v40, %v7150_v33  ;;  %v5202_v44 = vpop.f32.mrb[58].mxu0 }
 0x165   :  { %v1680_v45 = vmul.f32 %v5308_v42, %v7150_v33  ;;  %v1447_v46 = vpop.f32.mrb[1].mxu1  ;;  %v1763_v47 = vadd.f32 %v7153_v38, %v1662_v41  ;;  %v5879_v48 = vadd.f32 %v5302_v29, %v5202_v44  ;;  %v514_v49 = vpop.f32.mrb[59].mxu0  ;;  %4783 = vmatmul.mubr.msk.f32.gmra.mrb[46].mxu0 %vm110_vm3, %v6707_v56 }
 0x166   :  { %v1677_v50 = vmul.f32 %v7150_v33, %v1447_v46  ;;  %v1760_v51 = vadd.f32 %v7153_v38, %v1659_v43  ;;  %v5880_v52 = vadd.f32 %v1427_v31, %v514_v49  ;;  %1326 = vmatprep.mubr.f32.mxu0 %v9049_v0 }
 0x167   :  { %v1781_v53 = vadd.f32 %v7153_v38, %v1680_v45  ;;  %v1847_v54 = vmax.f32 %v1763_v47, 0.0  ;;  %v1668_v55 = vmul.f32 %v5879_v48, %v7150_v33 }
 0x168   :  { %v1778_v60 = vadd.f32 %v7153_v38, %v1677_v50  ;;  %v5311_v61 = vpop.f32.mrb[2].mxu1  ;;  %v1844_v62 = vmax.f32 %v1760_v51, 0.0  ;;  %v1665_v63 = vmul.f32 %v5880_v52, %v7150_v33  ;;  %v5205_v1 = vpop.f32.mrb[60].mxu0 }
 0x169   :  { %v1865_v56 = vmax.f32 %v1781_v53, 0.0  ;;  %v1686_v2 = vmul.f32 %v5311_v61, %v7150_v33  ;;  %v1457_v3 = vpop.f32.mrb[3].mxu1  ;;  %v1769_v4 = vadd.f32 %v7153_v38, %v1668_v55  ;;  %v5881_v5 = vadd.f32 %v5305_v34, %v5205_v1  ;;  %v524_v6 = vpop.f32.mrb[61].mxu0  ;;  %4784 = vmatmul.mubr.msk.f32.gmra.mrb[48].mxu0 %vm110_vm3, %v6718_v57 }
 0x16a   :  { %v1862_v7 = vmax.f32 %v1778_v60, 0.0  ;;  %v1683_v8 = vmul.f32 %v7150_v33, %v1457_v3  ;;  %v1766_v9 = vadd.f32 %v7153_v38, %v1665_v63  ;;  %v5882_v11 = vadd.f32 %v1437_v36, %v524_v6  ;;  %1332 = vmatprep.mubr.f32.mxu0 %v9049_v0 }
 0x16b   :  { %v1787_v12 = vadd.f32 %v7153_v38, %v1686_v2  ;;  %v7179_v13 = vmax.f32 %v1844_v62, %v1847_v54  ;;  %v1853_v14 = vmax.f32 %v1769_v4, 0.0  ;;  %v1674_v15 = vmul.f32 %v5881_v5, %v7150_v33 }
 0x16c   :  { %v1784_v16 = vadd.f32 %v7153_v38, %v1683_v8  ;;  %v5314_v17 = vpop.f32.mrb[4].mxu1  ;;  %v7183_v18 = vmax.f32 %v1862_v7, %v1865_v56  ;;  %v1850_v57 = vmax.f32 %v1766_v9, 0.0  ;;  %v1671_v19 = vmul.f32 %v5882_v11, %v7150_v33 }
 0x16d   :  { %v1871_v25 = vmax.f32 %v1787_v12, 0.0  ;;  %v1692_v26 = vmul.f32 %v5314_v17, %v7150_v33  ;;  %v1467_v28 = vpop.f32.mrb[5].mxu1  ;;  %4785 = vmatmul.mubr.msk.f32.gmra.mrb[50].mxu0 %vm110_vm3, %v6724_v58  ;;  %v1775_v20 = vadd.f32 %v7153_v38, %v1674_v15 }
 0x16e   :  { %v1868_v22 = vmax.f32 %v1784_v16, 0.0  ;;  %v1689_v24 = vmul.f32 %v7150_v33, %v1467_v28  ;;  %1338 = vmatprep.mubr.f32.mxu0 %v9049_v0  ;;  %v1772_v27 = vadd.f32 %v7153_v38, %v1671_v19  ;;  %v7194_v31 = vmax.f32 %v1850_v57, %v1853_v14 }
 0x16f   :  { %v1793_v29 = vadd.f32 %v7153_v38, %v1692_v26  ;;  %v1859_v34 = vmax.f32 %v1775_v20, 0.0 }
 0x170   :  { %v1790_v35 = vadd.f32 %v7153_v38, %v1689_v24  ;;  %v5317_v36 = vpop.f32.mrb[6].mxu1  ;;  %v7197_v37 = vmax.f32 %v1868_v22, %v1871_v25  ;;  %v1856_v58 = vmax.f32 %v1772_v27, 0.0 }
 0x171   :  { %v1877_v39 = vmax.f32 %v1793_v29, 0.0  ;;  %v1698_v40 = vmul.f32 %v5317_v36, %v7150_v33  ;;  %v1477_v41 = vpop.f32.mrb[7].mxu1  ;;  %4786 = vmatmul.mubr.msk.f32.gmra.mrb[52].mxu0 %vm110_vm3, %v6735_v59 }
 0x172   :  { %v1874_v42 = vmax.f32 %v1790_v35, 0.0  ;;  %v1695_v43 = vmul.f32 %v7150_v33, %v1477_v41  ;;  %v7203_v44 = vmax.f32 %v1856_v58, %v1859_v34  ;;  %1344 = vmatprep.mubr.f32.mxu0 %v9049_v0 }
 0x173   :  { %v1799_v45 = vadd.f32 %v7153_v38, %v1698_v40 }
 0x174   :  { %v1796_v46 = vadd.f32 %v7153_v38, %v1695_v43  ;;  %v5320_v47 = vpop.f32.mrb[8].mxu1  ;;  %v7208_v48 = vmax.f32 %v1874_v42, %v1877_v39  ;;  %2026 = vrot.lane.b32.xlu1 %v7203_v44, %s6355_s2 }
 0x175   :  { %v1883_v49 = vmax.f32 %v1799_v45, 0.0  ;;  %v1704_v59 = vmul.f32 %v5320_v47, %v7150_v33  ;;  %v1487_v50 = vpop.f32.mrb[9].mxu1  ;;  %4787 = vmatmul.mubr.msk.f32.gmra.mrb[54].mxu0 %vm110_vm3, %v7005_v21 }
 0x176   :  { %v1880_v51 = vmax.f32 %v1796_v46, 0.0  ;;  %v1701_v52 = vmul.f32 %v7150_v33, %v1487_v50 }
 0x177   :  { %v1805_v53 = vadd.f32 %v7153_v38, %v1704_v59 }
 0x178   :  { %v1802_v54 = vadd.f32 %v7153_v38, %v1701_v52  ;;  %v5323_v55 = vpop.f32.mrb[10].mxu1  ;;  %v7218_v60 = vmax.f32 %v1880_v51, %v1883_v49 }
 0x179   :  { %v1889_v61 = vmax.f32 %v1805_v53, 0.0  ;;  %v1710_v62 = vmul.f32 %v5323_v55, %v7150_v33  ;;  %v1497_v63 = vpop.f32.mrb[11].mxu1 }
 0x17a   :  { %v1886_v1 = vmax.f32 %v1802_v54, 0.0  ;;  %v1707_v56 = vmul.f32 %v7150_v33, %v1497_v63 }
 0x17b   :  { %v1811_v2 = vadd.f32 %v7153_v38, %v1710_v62 }
 0x17c   :  { %v1808_v21 = vadd.f32 %v7153_v38, %v1707_v56  ;;  %v5326_v3 = vpop.f32.mrb[12].mxu1  ;;  %v7224_v4 = vmax.f32 %v1886_v1, %v1889_v61 }
 0x17d   :  { %v1895_v5 = vmax.f32 %v1811_v2, 0.0  ;;  %v1716_v6 = vmul.f32 %v5326_v3, %v7150_v33  ;;  %v1507_v7 = vpop.f32.mrb[13].mxu1  ;;  %v2279_v3 = vld [vmem:[#allocation2 + $0x238] sm:$0xff] }
 0x17e   :  { %v1892_v8 = vmax.f32 %v1808_v21, 0.0  ;;  %v1713_v9 = vmul.f32 %v7150_v33, %v1507_v7  ;;  %v2277_v21 = vld [vmem:[#allocation2 + $0x228] sm:$0xff]  ;;  %v2278_v7 = vld [vmem:[#allocation2 + $0x230] sm:$0xff] }
 0x17f   :  { %v1817_v11 = vadd.f32 %v7153_v38, %v1716_v6  ;;  %v2276_v6 = vld [vmem:[#allocation2 + $0x220] sm:$0xff] }
 0x180   :  { %v1814_v12 = vadd.f32 %v7153_v38, %v1713_v9  ;;  %v5329_v14 = vpop.f32.mrb[14].mxu1  ;;  %v7230_v15 = vmax.f32 %v1892_v8, %v1895_v5  ;;  %v5399_v5 = vpack.c.bf16 %v2279_v3, %v2277_v21  ;;  %v5401_v8 = vpack.c.bf16 %v2278_v7, %v2276_v6  ;;  %v2281_v9 = vld [vmem:[#allocation2 + $0x248] sm:$0xff]  ;;  %v2304_v21 = vld [vmem:[#allocation2 + $0x300] sm:$0xff]  ;;  %v2306_v3 = vld [vmem:[#allocation2 + $0x310] sm:$0xff] }
 0x181   :  { %v1901_v16 = vmax.f32 %v1817_v11, 0.0  ;;  %v1722_v17 = vmul.f32 %v5329_v14, %v7150_v33  ;;  %v1517_v57 = vpop.f32.mrb[15].mxu1  ;;  %v2282_v14 = vld [vmem:[#allocation2 + $0x250] sm:$0xff]  ;;  %v2309_v6 = vld [vmem:[#allocation2 + $0x328] sm:$0xff]  ;;  %v2311_v7 = vld [vmem:[#allocation2 + $0x338] sm:$0xff] }
 0x182   :  { %v1898_v19 = vmax.f32 %v1814_v12, 0.0  ;;  %v1719_v25 = vmul.f32 %v7150_v33, %v1517_v57  ;;  %5400 = vmatprep.subr.bf16.mxu1 %v5399_v5  ;;  %v2280_v12 = vld [vmem:[#allocation2 + $0x240] sm:$0xff]  ;;  %v5429_v5 = vpack.c.bf16 %v2306_v3, %v2304_v21 }
 0x183   :  { %v1823_v26 = vadd.f32 %v7153_v38, %v1722_v17  ;;  %5402 = vmatpush1.bf16.msra.mxu1 %v5401_v8  ;;  %v2287_v17 = vld [vmem:[#allocation2 + $0x278] sm:$0xff]  ;;  %v5431_v8 = vpack.c.bf16 %v2311_v7, %v2309_v6 }
 0x184   :  { %v1820_v28 = vadd.f32 %v7153_v38, %v1719_v25  ;;  %v5332_v20 = vpop.f32.mrb[16].mxu1  ;;  %v7236_v22 = vmax.f32 %v1898_v19, %v1901_v16  ;;  %v2285_v16 = vld [vmem:[#allocation2 + $0x268] sm:$0xff]  ;;  %v2284_v19 = vld [vmem:[#allocation2 + $0x260] sm:$0xff]  ;;  %v2286_v25 = vld [vmem:[#allocation2 + $0x270] sm:$0xff] }
 0x185   :  { %v1907_v24 = vmax.f32 %v1823_v26, 0.0  ;;  %v1728_v27 = vmul.f32 %v5332_v20, %v7150_v33  ;;  %v1527_v29 = vpop.f32.mrb[17].mxu1  ;;  %v5407_v57 = vpack.c.bf16 %v2287_v17, %v2285_v16  ;;  %v5409_v26 = vpack.c.bf16 %v2286_v25, %v2284_v19  ;;  %v2291_v20 = vld [vmem:[#allocation2 + $0x298] sm:$0xff]  ;;  %v2314_v17 = vld [vmem:[#allocation2 + $0x350] sm:$0xff]  ;;  %v2317_v19 = vld [vmem:[#allocation2 + $0x368] sm:$0xff] }
 0x186   :  { %v1904_v34 = vmax.f32 %v1820_v28, 0.0  ;;  %v1725_v35 = vmul.f32 %v7150_v33, %v1527_v29  ;;  %v2289_v28 = vld [vmem:[#allocation2 + $0x288] sm:$0xff]  ;;  %v2290_v29 = vld [vmem:[#allocation2 + $0x290] sm:$0xff]  ;;  %v2319_v25 = vld [vmem:[#allocation2 + $0x378] sm:$0xff] }
 0x187   :  { %v1829_v36 = vadd.f32 %v7153_v38, %v1728_v27  ;;  %v2288_v27 = vld [vmem:[#allocation2 + $0x280] sm:$0xff] }
 0x188   :  { %v1826_v58 = vadd.f32 %v7153_v38, %v1725_v35  ;;  %v5335_v39 = vpop.f32.mrb[18].mxu1  ;;  %v7242_v40 = vmax.f32 %v1904_v34, %v1907_v24  ;;  %v5411_v24 = vpack.c.bf16 %v2291_v20, %v2289_v28  ;;  %v5413_v34 = vpack.c.bf16 %v2290_v29, %v2288_v27  ;;  %v2293_v35 = vld [vmem:[#allocation2 + $0x2a8] sm:$0xff]  ;;  %v2323_v29 = vld [vmem:[#allocation2 + $0x398] sm:$0xff] }
 0x189   :  { %v1913_v41 = vmax.f32 %v1829_v36, 0.0  ;;  %v1734_v42 = vmul.f32 %v5335_v39, %v7150_v33  ;;  %v1537_v43 = vpop.f32.mrb[19].mxu1  ;;  %v2295_v36 = vld [vmem:[#allocation2 + $0x2b8] sm:$0xff]  ;;  %v2292_v39 = vld [vmem:[#allocation2 + $0x2a0] sm:$0xff]  ;;  %v7259_v28 = vsub.s32 0, %v7130_v23  ;;  %v5439_v20 = vpack.c.bf16 %v2319_v25, %v2317_v19  ;;  %v2321_v27 = vld [vmem:[#allocation2 + $0x388] sm:$0xff] }
 0x18a   :  { %v1910_v45 = vmax.f32 %v1826_v58, 0.0  ;;  %v1731_v46 = vmul.f32 %v7150_v33, %v1537_v43  ;;  %v5415_v58 = vpack.c.bf16 %v2295_v36, %v2293_v35  ;;  %v2297_v43 = vld [vmem:[#allocation2 + $0x2c8] sm:$0xff]  ;;  %v5443_v36 = vpack.c.bf16 %v2323_v29, %v2321_v27 }
 0x18b   :  { %v1835_v47 = vadd.f32 %v7153_v38, %v1734_v42  ;;  %9063 = vst [vmem:[#allocation6_spill] sm:$0xff] %v7259_v28 }
 0x18c   :  { %v1832_v49 = vadd.f32 %v7153_v38, %v1731_v46  ;;  %v5338_v59 = vpop.f32.mrb[20].mxu1  ;;  %v7248_v50 = vmax.f32 %v1910_v45, %v1913_v41  ;;  %v2294_v41 = vld [vmem:[#allocation2 + $0x2b0] sm:$0xff]  ;;  %v2299_v45 = vld [vmem:[#allocation2 + $0x2d8] sm:$0xff] }
 0x18d   :  { %v1919_v51 = vmax.f32 %v1835_v47, 0.0  ;;  %v1740_v52 = vmul.f32 %v5338_v59, %v7150_v33  ;;  %v1547_v53 = vpop.f32.mrb[21].mxu1  ;;  %v5417_v42 = vpack.c.bf16 %v2294_v41, %v2292_v39  ;;  %v5419_v46 = vpack.c.bf16 %v2299_v45, %v2297_v43  ;;  %v2296_v47 = vld [vmem:[#allocation2 + $0x2c0] sm:$0xff]  ;;  %v2322_v39 = vld [vmem:[#allocation2 + $0x390] sm:$0xff]  ;;  %v2325_v41 = vld [vmem:[#allocation2 + $0x3a8] sm:$0xff] }
 0x18e   :  { %v1916_v54 = vmax.f32 %v1832_v49, 0.0  ;;  %v1737_v55 = vmul.f32 %v7150_v33, %v1547_v53  ;;  %v2283_v33 = vld [vmem:[#allocation2 + $0x258] sm:$0xff]  ;;  %v2298_v49 = vld [vmem:[#allocation2 + $0x2d0] sm:$0xff]  ;;  %v7266_v45 = vrot.slane %v7139_v30, %v7259_v28 }
 0x18f   :  { %v1841_v61 = vadd.f32 %v7153_v38, %v1740_v52  ;;  %v5403_v11 = vpack.c.bf16 %v2283_v33, %v2281_v9  ;;  %v5421_v59 = vpack.c.bf16 %v2298_v49, %v2296_v47  ;;  %v2303_v52 = vld [vmem:[#allocation2 + $0x2f8] sm:$0xff]  ;;  %v2308_v9 = vld [vmem:[#allocation2 + $0x320] sm:$0xff]  ;;  %v2310_v33 = vld [vmem:[#allocation2 + $0x330] sm:$0xff] }
 0x190   :  { %v1838_v62 = vadd.f32 %v7153_v38, %v1737_v55  ;;  %v7254_v63 = vmax.f32 %v1916_v54, %v1919_v51  ;;  %v5405_v38 = vpack.c.bf16 %v2282_v14, %v2280_v12  ;;  %v2301_v51 = vld [vmem:[#allocation2 + $0x2e8] sm:$0xff]  ;;  %v2300_v54 = vld [vmem:[#allocation2 + $0x2e0] sm:$0xff]  ;;  %v2302_v55 = vld [vmem:[#allocation2 + $0x2f0] sm:$0xff] }
 0x191   :  { %v1925_v1 = vmax.f32 %v1841_v61, 0.0  ;;  %5404 = vmatprep.subr.bf16.mxu1 %v5403_v11  ;;  %v5423_v53 = vpack.c.bf16 %v2303_v52, %v2301_v51  ;;  %v5425_v61 = vpack.c.bf16 %v2302_v55, %v2300_v54  ;;  %v5433_v11 = vpack.c.bf16 %v2310_v33, %v2308_v9  ;;  %v2313_v12 = vld [vmem:[#allocation2 + $0x348] sm:$0xff]  ;;  %v2315_v14 = vld [vmem:[#allocation2 + $0x358] sm:$0xff]  ;;  %v2324_v47 = vld [vmem:[#allocation2 + $0x3a0] sm:$0xff] }
 0x192   :  { %v1922_v56 = vmax.f32 %v1838_v62, 0.0  ;;  %5406 = vmatpush1.bf16.msra.mxu1 %v5405_v38  ;;  %v2305_v62 = vld [vmem:[#allocation2 + $0x308] sm:$0xff]  ;;  %v2312_v38 = vld [vmem:[#allocation2 + $0x340] sm:$0xff]  ;;  %v5435_v16 = vpack.c.bf16 %v2315_v14, %v2313_v12  ;;  %v2326_v49 = vld [vmem:[#allocation2 + $0x3b0] sm:$0xff]  ;;  %v7275_v55 = vrot.slane %v7147_v32, %v7259_v28 }
 0x193   :  { %5408 = vmatprep.subr.bf16.mxu1 %v5407_v57  ;;  %v5437_v57 = vpack.c.bf16 %v2314_v17, %v2312_v38  ;;  %v2331_v51 = vld [vmem:[#allocation2 + $0x3d8] sm:$0xff] }
 0x194   :  { %v7256_v2 = vmax.f32 %v1922_v56, %v1925_v1  ;;  %v2307_v1 = vld [vmem:[#allocation2 + $0x318] sm:$0xff] }
 0x195   :  { %v5427_v56 = vpack.c.bf16 %v2307_v1, %v2305_v62  ;;  %v2328_v1 = vld [vmem:[#allocation2 + $0x3c0] sm:$0xff]  ;;  %v2335_v38 = vld [vmem:[#allocation2 + $0x3f8] sm:$0xff] }
 0x196   :  { %9062 = vst [vmem:[#allocation5_spill] sm:$0xff] %v7256_v2  ;;  %5410 = vmatpush1.bf16.msra.mxu1 %v5409_v26  ;;  %v2316_v26 = vld [vmem:[#allocation2 + $0x360] sm:$0xff] }
 0x197   :  { %5412 = vmatprep.subr.bf16.mxu1 %v5411_v24  ;;  %v2318_v24 = vld [vmem:[#allocation2 + $0x370] sm:$0xff] }
 0x198   :  { %v5441_v35 = vpack.c.bf16 %v2318_v24, %v2316_v26  ;;  %v2332_v26 = vld [vmem:[#allocation2 + $0x3e0] sm:$0xff] }
 0x19a   :  { %5414 = vmatpush1.bf16.msra.mxu1 %v5413_v34  ;;  %v7262_v34 = vsub.s32 1, %v7130_v23 }
 0x19b   :  { %5416 = vmatprep.subr.bf16.mxu1 %v5415_v58  ;;  %v2320_v58 = vld [vmem:[#allocation2 + $0x380] sm:$0xff] }
 0x19c   :  { %9064 = vst [vmem:[#allocation7_spill] sm:$0xff] %v7262_v34  ;;  %v5445_v43 = vpack.c.bf16 %v2322_v39, %v2320_v58  ;;  %v7270_v23 = vrot.slane %v7139_v30, %v7262_v34  ;;  %v7280_v30 = vrot.slane %v7147_v32, %v7262_v34  ;;  %v2333_v32 = vld [vmem:[#allocation2 + $0x3e8] sm:$0xff] }
 0x19d   :  { %v5455_v25 = vpack.c.bf16 %v2335_v38, %v2333_v32 }
 0x19e   :  { %5418 = vmatpush1.bf16.msra.mxu1 %v5417_v42  ;;  %v2327_v42 = vld [vmem:[#allocation2 + $0x3b8] sm:$0xff] }
 0x19f   :  { %5420 = vmatprep.subr.bf16.mxu1 %v5419_v46  ;;  %v5447_v46 = vpack.c.bf16 %v2327_v42, %v2325_v41  ;;  %v2337_v41 = vld [vmem:[#allocation2 + $0x408] sm:$0xff]  ;;  %v2339_v42 = vld [vmem:[#allocation2 + $0x418] sm:$0xff] }
 0x1a2   :  { %5422 = vmatpush1.bf16.msra.mxu1 %v5421_v59  ;;  %v2329_v59 = vld [vmem:[#allocation2 + $0x3c8] sm:$0xff] }
 0x1a3   :  { %5424 = vmatprep.subr.bf16.mxu1 %v5423_v53  ;;  %v5449_v53 = vpack.c.bf16 %v2326_v49, %v2324_v47  ;;  %v5451_v62 = vpack.c.bf16 %v2331_v51, %v2329_v59  ;;  %v5459_v49 = vpack.c.bf16 %v2339_v42, %v2337_v41  ;;  %v2336_v59 = vld [vmem:[#allocation2 + $0x400] sm:$0xff]  ;;  %v2338_v51 = vld [vmem:[#allocation2 + $0x410] sm:$0xff] }
 0x1a6   :  { %5426 = vmatpush1.bf16.msra.mxu1 %v5425_v61 }
 0x1a7   :  { %5428 = vmatprep.subr.bf16.mxu1 %v5427_v56  ;;  %v2330_v56 = vld [vmem:[#allocation2 + $0x3d0] sm:$0xff] }
 0x1aa   :  { %5430 = vmatpush1.bf16.msra.mxu1 %v5429_v5  ;;  %v5453_v5 = vpack.c.bf16 %v2330_v56, %v2328_v1 }
 0x1ab   :  { %5432 = vmatprep.subr.bf16.mxu1 %v5431_v8 }
 0x1ae   :  { %5434 = vmatpush1.bf16.msra.mxu1 %v5433_v11 }
 0x1af   :  { %5436 = vmatprep.subr.bf16.mxu1 %v5435_v16 }
 0x1b2   :  { %5438 = vmatpush1.bf16.msra.mxu1 %v5437_v57 }
 0x1b3   :  { %5440 = vmatprep.subr.bf16.mxu1 %v5439_v20  ;;  %v2334_v20 = vld [vmem:[#allocation2 + $0x3f0] sm:$0xff] }
 0x1b6   :  { %5442 = vmatpush1.bf16.msra.mxu1 %v5441_v35  ;;  %v5457_v35 = vpack.c.bf16 %v2334_v20, %v2332_v26 }
 0x1b7   :  { %5444 = vmatprep.subr.bf16.mxu1 %v5443_v36 }
 0x1ba   :  { %5446 = vmatpush1.bf16.msra.mxu1 %v5445_v43 }
 0x1bb   :  { %5448 = vmatprep.subr.bf16.mxu1 %v5447_v46 }
 0x1be   :  { %5450 = vmatpush1.bf16.msra.mxu1 %v5449_v53 }
 0x1bf   :  { %5452 = vmatprep.subr.bf16.mxu1 %v5451_v62 }
 0x1c2   :  { %5454 = vmatpush1.bf16.msra.mxu1 %v5453_v5 }
 0x1c3   :  { %5456 = vmatprep.subr.bf16.mxu1 %v5455_v25 }
 0x1c6   :  { %5458 = vmatpush1.bf16.msra.mxu1 %v5457_v35 }
 0x1c7   :  { %5460 = vmatprep.subr.bf16.mxu1 %v5459_v49 }
 0x1dc   :  { %v1184_v52 = vpop.f32.mrb[0].mxu0 }
 0x1dd   :  { %v1657_v54 = vmul.f32 %v7266_v45, %v1184_v52  ;;  %v1186_v61 = vpop.f32.mrb[1].mxu0 }
 0x1de   :  { %v1658_v21 = vmul.f32 %v7270_v23, %v1186_v61 }
 0x1df   :  { %v1758_v6 = vadd.f32 %v7275_v55, %v1657_v54  ;;  %v5461_v54 = vpack.c.bf16 %v2338_v51, %v2336_v59 }
 0x1e0   :  { %v1190_v3 = vpop.f32.mrb[2].mxu0  ;;  %v1759_v9 = vadd.f32 %v7280_v30, %v1658_v21 }
 0x1e1   :  { %v1660_v7 = vmul.f32 %v7266_v45, %v1190_v3  ;;  %v1192_v8 = vpop.f32.mrb[3].mxu0  ;;  %v1842_v16 = vmax.f32 %v1758_v6, 0.0  ;;  %5462 = vmatpush1.bf16.msra.mxu1 %v5461_v54 }
 0x1e2   :  { %v1661_v33 = vmul.f32 %v7270_v23, %v1192_v8  ;;  %v1843_v24 = vmax.f32 %v1759_v9, 0.0 }
 0x1e3   :  { %v1761_v11 = vadd.f32 %v7275_v55, %v1660_v7 }
 0x1e4   :  { %v1762_v12 = vadd.f32 %v7280_v30, %v1661_v33  ;;  %v1196_v14 = vpop.f32.mrb[4].mxu0 }
 0x1e5   :  { %v1845_v17 = vmax.f32 %v1761_v11, 0.0  ;;  %v1663_v57 = vmul.f32 %v7266_v45, %v1196_v14  ;;  %v1198_v19 = vpop.f32.mrb[5].mxu0 }
 0x1e6   :  { %v1846_v27 = vmax.f32 %v1762_v12, 0.0  ;;  %v1664_v29 = vmul.f32 %v7270_v23, %v1198_v19 }
 0x1e7   :  { %v7290_v36 = vmax.f32 %v1842_v16, %v1845_v17  ;;  %v1764_v43 = vadd.f32 %v7275_v55, %v1663_v57 }
 0x1e8   :  { %v7292_v58 = vmax.f32 %v1843_v24, %v1846_v27  ;;  %v1202_v39 = vpop.f32.mrb[6].mxu0  ;;  %v1765_v52 = vadd.f32 %v7280_v30, %v1664_v29 }
 0x1e9   :  { %v1666_v46 = vmul.f32 %v7266_v45, %v1202_v39  ;;  %v1204_v47 = vpop.f32.mrb[7].mxu0  ;;  %v1848_v56 = vmax.f32 %v1764_v43, 0.0 }
 0x1ea   :  { %v1667_v53 = vmul.f32 %v7270_v23, %v1204_v47  ;;  %v1849_v6 = vmax.f32 %v1765_v52, 0.0 }
 0x1eb   :  { %v1767_v61 = vadd.f32 %v7275_v55, %v1666_v46 }
 0x1ec   :  { %v1768_v62 = vadd.f32 %v7280_v30, %v1667_v53  ;;  %v1208_v1 = vpop.f32.mrb[8].mxu0 }
 0x1ed   :  { %v1851_v21 = vmax.f32 %v1767_v61, 0.0  ;;  %v1669_v3 = vmul.f32 %v7266_v45, %v1208_v1  ;;  %v1210_v5 = vpop.f32.mrb[9].mxu0 }
 0x1ee   :  { %v1852_v7 = vmax.f32 %v1768_v62, 0.0  ;;  %v1670_v8 = vmul.f32 %v7270_v23, %v1210_v5 }
 0x1ef   :  { %v7302_v9 = vmax.f32 %v1848_v56, %v1851_v21  ;;  %v1770_v12 = vadd.f32 %v7275_v55, %v1669_v3 }
 0x1f0   :  { %v1214_v33 = vpop.f32.mrb[10].mxu0  ;;  %v7304_v11 = vmax.f32 %v1849_v6, %v1852_v7  ;;  %v1771_v38 = vadd.f32 %v7280_v30, %v1670_v8 }
 0x1f1   :  { %v1672_v14 = vmul.f32 %v7266_v45, %v1214_v33  ;;  %v1216_v32 = vpop.f32.mrb[11].mxu0  ;;  %v1854_v26 = vmax.f32 %v1770_v12, 0.0 }
 0x1f2   :  { %v1673_v16 = vmul.f32 %v7270_v23, %v1216_v32  ;;  %v6217_v17 = vpack.i.bf16 %v7302_v9, %v7304_v11  ;;  %v1855_v29 = vmax.f32 %v1771_v38, 0.0 }
 0x1f3   :  { %v1773_v57 = vadd.f32 %v7275_v55, %v1672_v14 }
 0x1f4   :  { %v1774_v19 = vadd.f32 %v7280_v30, %v1673_v16  ;;  %6218 = vrot.lane.b32.xlu0 %v6217_v17, %s6355_s2  ;;  %v1220_v25 = vpop.f32.mrb[12].mxu0 }
 0x1f5   :  { %v1857_v20 = vmax.f32 %v1773_v57, 0.0  ;;  %v1675_v24 = vmul.f32 %v7266_v45, %v1220_v25  ;;  %v1222_v27 = vpop.f32.mrb[13].mxu0 }
 0x1f6   :  { %v1858_v35 = vmax.f32 %v1774_v19, 0.0  ;;  %v1676_v39 = vmul.f32 %v7270_v23, %v1222_v27 }
 0x1f7   :  { %v7317_v41 = vmax.f32 %v1854_v26, %v1857_v20  ;;  %v1776_v46 = vadd.f32 %v7275_v55, %v1675_v24 }
 0x1f8   :  { %v7319_v42 = vmax.f32 %v1855_v29, %v1858_v35  ;;  %2020 = vrot.lane.b32.xlu0 %v7194_v31, %s6355_s2  ;;  %v1226_v43 = vpop.f32.mrb[14].mxu0  ;;  %v1777_v59 = vadd.f32 %v7280_v30, %v1676_v39 }
 0x1f9   :  { %v1678_v47 = vmul.f32 %v7266_v45, %v1226_v43  ;;  %v1228_v49 = vpop.f32.mrb[15].mxu0  ;;  %v1860_v62 = vmax.f32 %v1776_v46, 0.0 }
 0x1fa   :  { %v1679_v51 = vmul.f32 %v7270_v23, %v1228_v49  ;;  %v6222_v52 = vpack.i.bf16 %v7317_v41, %v7319_v42  ;;  %v1861_v3 = vmax.f32 %v1777_v59, 0.0 }
 0x1fb   :  { %v1779_v53 = vadd.f32 %v7275_v55, %v1678_v47 }
 0x1fc   :  { %v1780_v54 = vadd.f32 %v7280_v30, %v1679_v51  ;;  %6223 = vrot.lane.b32.xlu1 %v6222_v52, %s6355_s2  ;;  %v1232_v61 = vpop.f32.mrb[16].mxu0 }
 0x1fd   :  { %v1863_v1 = vmax.f32 %v1779_v53, 0.0  ;;  %v1681_v56 = vmul.f32 %v7266_v45, %v1232_v61  ;;  %v1234_v21 = vpop.f32.mrb[17].mxu0 }
 0x1fe   :  { %v1864_v5 = vmax.f32 %v1780_v54, 0.0  ;;  %v1682_v6 = vmul.f32 %v7270_v23, %v1234_v21 }
 0x1ff   :  { %v7334_v7 = vmax.f32 %v1860_v62, %v1863_v1  ;;  %v1782_v12 = vadd.f32 %v7275_v55, %v1681_v56 }
 0x200   :  { %v7336_v8 = vmax.f32 %v1861_v3, %v1864_v5  ;;  %2032 = vrot.lane.b32.xlu1 %v7183_v18, %s6355_s2  ;;  %v1238_v33 = vpop.f32.mrb[18].mxu0  ;;  %v1783_v38 = vadd.f32 %v7280_v30, %v1682_v6 }
 0x201   :  { %v1684_v14 = vmul.f32 %v7266_v45, %v1238_v33  ;;  %v1240_v32 = vpop.f32.mrb[19].mxu0  ;;  %v1866_v26 = vmax.f32 %v1782_v12, 0.0 }
 0x202   :  { %v1685_v16 = vmul.f32 %v7270_v23, %v1240_v32  ;;  %v6227_v17 = vpack.i.bf16 %v7334_v7, %v7336_v8  ;;  %v1867_v29 = vmax.f32 %v1783_v38, 0.0 }
 0x203   :  { %v1785_v57 = vadd.f32 %v7275_v55, %v1684_v14 }
 0x204   :  { %v1786_v19 = vadd.f32 %v7280_v30, %v1685_v16  ;;  %2038 = vrot.lane.b32.xlu1 %v7197_v37, %s6355_s2  ;;  %6228 = vrot.lane.b32.xlu0 %v6227_v17, %s6355_s2  ;;  %v1244_v25 = vpop.f32.mrb[20].mxu0 }
 0x205   :  { %v1869_v20 = vmax.f32 %v1785_v57, 0.0  ;;  %v1687_v24 = vmul.f32 %v7266_v45, %v1244_v25  ;;  %v1246_v27 = vpop.f32.mrb[21].mxu0 }
 0x206   :  { %v1870_v35 = vmax.f32 %v1786_v19, 0.0  ;;  %v1688_v39 = vmul.f32 %v7270_v23, %v1246_v27 }
 0x207   :  { %v7353_v43 = vmax.f32 %v1866_v26, %v1869_v20  ;;  %v1788_v49 = vadd.f32 %v7275_v55, %v1687_v24 }
 0x208   :  { %v7355_v46 = vmax.f32 %v1867_v29, %v1870_v35  ;;  %2044 = vrot.lane.b32.xlu1 %v7208_v48, %s6355_s2  ;;  %v1250_v47 = vpop.f32.mrb[22].mxu0  ;;  %v1789_v52 = vadd.f32 %v7280_v30, %v1688_v39 }
 0x209   :  { %v1690_v59 = vmul.f32 %v7266_v45, %v1250_v47  ;;  %v1252_v51 = vpop.f32.mrb[23].mxu0  ;;  %v1872_v56 = vmax.f32 %v1788_v49, 0.0 }
 0x20a   :  { %v1691_v53 = vmul.f32 %v7270_v23, %v1252_v51  ;;  %v6232_v54 = vpack.i.bf16 %v7353_v43, %v7355_v46  ;;  %v1873_v6 = vmax.f32 %v1789_v52, 0.0 }
 0x20b   :  { %v1791_v61 = vadd.f32 %v7275_v55, %v1690_v59 }
 0x20c   :  { %v1792_v62 = vadd.f32 %v7280_v30, %v1691_v53  ;;  %2050 = vrot.lane.b32.xlu1 %v7218_v60, %s6355_s2  ;;  %6233 = vrot.lane.b32.xlu0 %v6232_v54, %s6355_s2  ;;  %v1256_v1 = vpop.f32.mrb[24].mxu0  ;;  %v2341_v53 = vld [vmem:[#allocation2 + $0x428] sm:$0xff]  ;;  %v2343_v54 = vld [vmem:[#allocation2 + $0x438] sm:$0x3f] }
 0x20d   :  { %v1875_v21 = vmax.f32 %v1791_v61, 0.0  ;;  %v1693_v3 = vmul.f32 %v7266_v45, %v1256_v1  ;;  %v1258_v5 = vpop.f32.mrb[25].mxu0  ;;  %v5463_v1 = vpack.c.bf16 %v2343_v54, %v2341_v53 }
 0x20e   :  { %v1876_v33 = vmax.f32 %v1792_v62, 0.0  ;;  %v1694_v12 = vmul.f32 %v7270_v23, %v1258_v5 }
 0x20f   :  { %v7372_v14 = vmax.f32 %v1872_v56, %v1875_v21  ;;  %v1794_v16 = vadd.f32 %v7275_v55, %v1693_v3  ;;  %5465 = vmatprep.subr.msk.bf16.mxu1 %vm6458_vm2, %v5463_v1 }
 0x210   :  { %v7374_v32 = vmax.f32 %v1873_v6, %v1876_v33  ;;  %2056 = vrot.lane.b32.xlu1 %v7224_v4, %s6355_s2  ;;  %v1262_v38 = vpop.f32.mrb[26].mxu0  ;;  %v1795_v19 = vadd.f32 %v7280_v30, %v1694_v12 }
 0x211   :  { %v1696_v17 = vmul.f32 %v7266_v45, %v1262_v38  ;;  %v1264_v57 = vpop.f32.mrb[27].mxu0  ;;  %v1878_v29 = vmax.f32 %v1794_v16, 0.0 }
 0x212   :  { %v1697_v25 = vmul.f32 %v7270_v23, %v1264_v57  ;;  %v6237_v26 = vpack.i.bf16 %v7372_v14, %v7374_v32  ;;  %v1879_v49 = vmax.f32 %v1795_v19, 0.0 }
 0x213   :  { %v1797_v20 = vadd.f32 %v7275_v55, %v1696_v17 }
 0x214   :  { %v1798_v24 = vadd.f32 %v7280_v30, %v1697_v25  ;;  %2062 = vrot.lane.b32.xlu1 %v7230_v15, %s6355_s2  ;;  %6238 = vrot.lane.b32.xlu0 %v6237_v26, %s6355_s2  ;;  %v1268_v27 = vpop.f32.mrb[28].mxu0 }
 0x215   :  { %v1881_v35 = vmax.f32 %v1797_v20, 0.0  ;;  %v1699_v39 = vmul.f32 %v7266_v45, %v1268_v27  ;;  %v1270_v47 = vpop.f32.mrb[29].mxu0 }
 0x216   :  { %v1882_v59 = vmax.f32 %v1798_v24, 0.0  ;;  %v1700_v51 = vmul.f32 %v7270_v23, %v1270_v47 }
 0x217   :  { %v7391_v52 = vmax.f32 %v1878_v29, %v1881_v35  ;;  %v1800_v56 = vadd.f32 %v7275_v55, %v1699_v39 }
 0x218   :  { %v7393_v61 = vmax.f32 %v1879_v49, %v1882_v59  ;;  %2068 = vrot.lane.b32.xlu1 %v7236_v22, %s6355_s2  ;;  %v1274_v62 = vpop.f32.mrb[30].mxu0  ;;  %v1801_v5 = vadd.f32 %v7280_v30, %v1700_v51 }
 0x219   :  { %v1702_v21 = vmul.f32 %v7266_v45, %v1274_v62  ;;  %v1276_v3 = vpop.f32.mrb[31].mxu0  ;;  %v1884_v17 = vmax.f32 %v1800_v56, 0.0 }
 0x21a   :  { %v1703_v6 = vmul.f32 %v7270_v23, %v1276_v3  ;;  %v6242_v33 = vpack.i.bf16 %v7391_v52, %v7393_v61  ;;  %v1885_v26 = vmax.f32 %v1801_v5, 0.0 }
 0x21b   :  { %v1803_v12 = vadd.f32 %v7275_v55, %v1702_v21 }
 0x21c   :  { %v1804_v38 = vadd.f32 %v7280_v30, %v1703_v6  ;;  %2074 = vrot.lane.b32.xlu1 %v7242_v40, %s6355_s2  ;;  %6243 = vrot.lane.b32.xlu0 %v6242_v33, %s6355_s2  ;;  %v1280_v16 = vpop.f32.mrb[32].mxu0 }
 0x21d   :  { %v1887_v57 = vmax.f32 %v1803_v12, 0.0  ;;  %v1705_v19 = vmul.f32 %v7266_v45, %v1280_v16  ;;  %v1282_v25 = vpop.f32.mrb[33].mxu0 }
 0x21e   :  { %v1888_v20 = vmax.f32 %v1804_v38, 0.0  ;;  %v1706_v24 = vmul.f32 %v7270_v23, %v1282_v25 }
 0x21f   :  { %v7412_v27 = vmax.f32 %v1884_v17, %v1887_v57  ;;  %v1806_v39 = vadd.f32 %v7275_v55, %v1705_v19 }
 0x220   :  { %v7414_v29 = vmax.f32 %v1885_v26, %v1888_v20  ;;  %2080 = vrot.lane.b32.xlu1 %v7248_v50, %s6355_s2  ;;  %v1286_v35 = vpop.f32.mrb[34].mxu0  ;;  %v1807_v59 = vadd.f32 %v7280_v30, %v1706_v24 }
 0x221   :  { %v1708_v47 = vmul.f32 %v7266_v45, %v1286_v35  ;;  %v1288_v49 = vpop.f32.mrb[35].mxu0  ;;  %v1890_v56 = vmax.f32 %v1806_v39, 0.0 }
 0x222   :  { %v1709_v51 = vmul.f32 %v7270_v23, %v1288_v49  ;;  %v6247_v53 = vpack.i.bf16 %v7412_v27, %v7414_v29  ;;  %v1891_v6 = vmax.f32 %v1807_v59, 0.0 }
 0x223   :  { %v1809_v54 = vadd.f32 %v7275_v55, %v1708_v47 }
 0x224   :  { %v1810_v62 = vadd.f32 %v7280_v30, %v1709_v51  ;;  %2086 = vrot.lane.b32.xlu1 %v7254_v63, %s6355_s2  ;;  %6248 = vrot.lane.b32.xlu0 %v6247_v53, %s6355_s2  ;;  %v1292_v1 = vpop.f32.mrb[36].mxu0 }
 0x225   :  { %v1893_v21 = vmax.f32 %v1809_v54, 0.0  ;;  %v1711_v3 = vmul.f32 %v7266_v45, %v1292_v1  ;;  %v1294_v5 = vpop.f32.mrb[37].mxu0 }
 0x226   :  { %v1894_v33 = vmax.f32 %v1810_v62, 0.0  ;;  %v1712_v12 = vmul.f32 %v7270_v23, %v1294_v5 }
 0x227   :  { %v7431_v38 = vmax.f32 %v1890_v56, %v1893_v21  ;;  %v1812_v57 = vadd.f32 %v7275_v55, %v1711_v3 }
 0x228   :  { %v7433_v16 = vmax.f32 %v1891_v6, %v1894_v33  ;;  %2014 = vrot.lane.b32.xlu1 %v7179_v13, %s6355_s2  ;;  %v1298_v17 = vpop.f32.mrb[38].mxu0  ;;  %v1813_v26 = vadd.f32 %v7280_v30, %v1712_v12 }
 0x229   :  { %v1714_v19 = vmul.f32 %v7266_v45, %v1298_v17  ;;  %v1300_v25 = vpop.f32.mrb[39].mxu0  ;;  %v1896_v49 = vmax.f32 %v1812_v57, 0.0 }
 0x22a   :  { %v1715_v20 = vmul.f32 %v7270_v23, %v1300_v25  ;;  %v6252_v24 = vpack.i.bf16 %v7431_v38, %v7433_v16  ;;  %v1897_v54 = vmax.f32 %v1813_v26, 0.0 }
 0x22b   :  { %v1815_v35 = vadd.f32 %v7275_v55, %v1714_v19 }
 0x22c   :  { %v1816_v39 = vadd.f32 %v7280_v30, %v1715_v20  ;;  %2092 = vrot.lane.b32.xlu1 %v7256_v2, %s6355_s2  ;;  %6253 = vrot.lane.b32.xlu0 %v6252_v24, %s6355_s2  ;;  %v1304_v47 = vpop.f32.mrb[40].mxu0 }
 0x22d   :  { %v1899_v59 = vmax.f32 %v1815_v35, 0.0  ;;  %v1717_v51 = vmul.f32 %v7266_v45, %v1304_v47  ;;  %v1306_v53 = vpop.f32.mrb[41].mxu0 }
 0x22e   :  { %v1900_v62 = vmax.f32 %v1816_v39, 0.0  ;;  %v1718_v1 = vmul.f32 %v7270_v23, %v1306_v53 }
 0x22f   :  { %v7450_v56 = vmax.f32 %v1896_v49, %v1899_v59  ;;  %v1818_v5 = vadd.f32 %v7275_v55, %v1717_v51 }
 0x230   :  { %v7452_v21 = vmax.f32 %v1897_v54, %v1900_v62  ;;  %v1310_v3 = vpop.f32.mrb[42].mxu0  ;;  %v1819_v12 = vadd.f32 %v7280_v30, %v1718_v1 }
 0x231   :  { %v1720_v6 = vmul.f32 %v7266_v45, %v1310_v3  ;;  %v1312_v33 = vpop.f32.mrb[43].mxu0  ;;  %v1902_v20 = vmax.f32 %v1818_v5, 0.0 }
 0x232   :  { %v1721_v17 = vmul.f32 %v7270_v23, %v1312_v33  ;;  %v6257_v57 = vpack.i.bf16 %v7450_v56, %v7452_v21  ;;  %v1903_v47 = vmax.f32 %v1819_v12, 0.0 }
 0x233   :  { %v1821_v19 = vadd.f32 %v7275_v55, %v1720_v6 }
 0x234   :  { %v1822_v25 = vadd.f32 %v7280_v30, %v1721_v17  ;;  %6258 = vrot.lane.b32.xlu0 %v6257_v57, %s6355_s2  ;;  %v1316_v26 = vpop.f32.mrb[44].mxu0 }
 0x235   :  { %v1905_v24 = vmax.f32 %v1821_v19, 0.0  ;;  %v1723_v35 = vmul.f32 %v7266_v45, %v1316_v26  ;;  %v1318_v39 = vpop.f32.mrb[45].mxu0 }
 0x236   :  { %v1906_v49 = vmax.f32 %v1822_v25, 0.0  ;;  %v1724_v59 = vmul.f32 %v7270_v23, %v1318_v39 }
 0x237   :  { %v7465_v51 = vmax.f32 %v1902_v20, %v1905_v24  ;;  %v1824_v62 = vadd.f32 %v7275_v55, %v1723_v35 }
 0x238   :  { %v7467_v53 = vmax.f32 %v1903_v47, %v1906_v49  ;;  %v1322_v54 = vpop.f32.mrb[46].mxu0  ;;  %v1825_v5 = vadd.f32 %v7280_v30, %v1724_v59 }
 0x239   :  { %v1726_v1 = vmul.f32 %v7266_v45, %v1322_v54  ;;  %v1324_v3 = vpop.f32.mrb[47].mxu0  ;;  %v1908_v19 = vmax.f32 %v1824_v62, 0.0 }
 0x23a   :  { %v1727_v6 = vmul.f32 %v7270_v23, %v1324_v3  ;;  %v6262_v33 = vpack.i.bf16 %v7465_v51, %v7467_v53  ;;  %v1909_v24 = vmax.f32 %v1825_v5, 0.0 }
 0x23b   :  { %v1827_v12 = vadd.f32 %v7275_v55, %v1726_v1 }
 0x23c   :  { %v1828_v17 = vadd.f32 %v7280_v30, %v1727_v6  ;;  %6263 = vrot.lane.b32.xlu0 %v6262_v33, %s6355_s2  ;;  %v1328_v57 = vpop.f32.mrb[48].mxu0 }
 0x23d   :  { %v1911_v25 = vmax.f32 %v1827_v12, 0.0  ;;  %v1729_v26 = vmul.f32 %v7266_v45, %v1328_v57  ;;  %v1330_v20 = vpop.f32.mrb[49].mxu0 }
 0x23e   :  { %v1912_v35 = vmax.f32 %v1828_v17, 0.0  ;;  %v1730_v39 = vmul.f32 %v7270_v23, %v1330_v20 }
 0x23f   :  { %v7480_v47 = vmax.f32 %v1908_v19, %v1911_v25  ;;  %v1830_v54 = vadd.f32 %v7275_v55, %v1729_v26 }
 0x240   :  { %v7482_v49 = vmax.f32 %v1909_v24, %v1912_v35  ;;  %v1334_v59 = vpop.f32.mrb[50].mxu0  ;;  %v1831_v62 = vadd.f32 %v7280_v30, %v1730_v39 }
 0x241   :  { %v1732_v1 = vmul.f32 %v7266_v45, %v1334_v59  ;;  %v1336_v3 = vpop.f32.mrb[51].mxu0  ;;  %v1914_v57 = vmax.f32 %v1830_v54, 0.0 }
 0x242   :  { %v1733_v6 = vmul.f32 %v7270_v23, %v1336_v3  ;;  %v6267_v5 = vpack.i.bf16 %v7480_v47, %v7482_v49  ;;  %v1915_v20 = vmax.f32 %v1831_v62, 0.0 }
 0x243   :  { %v1833_v33 = vadd.f32 %v7275_v55, %v1732_v1 }
 0x244   :  { %v1834_v12 = vadd.f32 %v7280_v30, %v1733_v6  ;;  %6268 = vrot.lane.b32.xlu0 %v6267_v5, %s6355_s2  ;;  %v1340_v17 = vpop.f32.mrb[52].mxu0 }
 0x245   :  { %v1917_v19 = vmax.f32 %v1833_v33, 0.0  ;;  %v1735_v25 = vmul.f32 %v7266_v45, %v1340_v17  ;;  %v1342_v26 = vpop.f32.mrb[53].mxu0 }
 0x246   :  { %v1918_v24 = vmax.f32 %v1834_v12, 0.0  ;;  %v1736_v35 = vmul.f32 %v7270_v23, %v1342_v26 }
 0x247   :  { %v7495_v39 = vmax.f32 %v1914_v57, %v1917_v19  ;;  %v1836_v1 = vadd.f32 %v7275_v55, %v1735_v25 }
 0x248   :  { %v7497_v59 = vmax.f32 %v1915_v20, %v1918_v24  ;;  %v1346_v3 = vpop.f32.mrb[54].mxu0  ;;  %v1837_v54 = vadd.f32 %v7280_v30, %v1736_v35 }
 0x249   :  { %v1738_v6 = vmul.f32 %v7266_v45, %v1346_v3  ;;  %v1348_v5 = vpop.f32.mrb[55].mxu0  ;;  %v1920_v57 = vmax.f32 %v1836_v1, 0.0  ;;  %v6277_v45 = vpack.i.bf16 %v7290_v36, %v7292_v58  ;;  %v2340_v3 = vld [vmem:[#allocation2 + $0x420] sm:$0xff]  ;;  %v2342_v1 = vld [vmem:[#allocation2 + $0x430] sm:$0x3f] }
 0x24a   :  { %v1739_v33 = vmul.f32 %v7270_v23, %v1348_v5  ;;  %v6272_v62 = vpack.i.bf16 %v7495_v39, %v7497_v59  ;;  %v1921_v26 = vmax.f32 %v1837_v54, 0.0 }
 0x24b   :  { %v1839_v12 = vadd.f32 %v7275_v55, %v1738_v6  ;;  %v7518_v6 = vpop.permute.xlu1 %2026 }
 0x24c   :  { %v1840_v17 = vadd.f32 %v7280_v30, %v1739_v33  ;;  %6273 = vrot.lane.b32.xlu0 %v6272_v62, %s6355_s2  ;;  %v2208_v33 = vld [vmem:[#allocation2 + $0x8] sm:$0xff]  ;;  %v2210_v62 = vld [vmem:[#allocation2 + $0x18] sm:$0xff] }
 0x24d   :  { %v1923_v19 = vmax.f32 %v1839_v12, 0.0 }
 0x24e   :  { %v1924_v25 = vmax.f32 %v1840_v17, 0.0 }
 0x24f   :  { %v7510_v20 = vmax.f32 %v1920_v57, %v1923_v19  ;;  %v5466_v57 = vpack.c.bf16 %v2342_v1, %v2340_v3 }
 0x250   :  { %v7512_v24 = vmax.f32 %v1921_v26, %v1924_v25  ;;  %6278 = vrot.lane.b32.xlu0 %v6277_v45, %s6355_s2  ;;  %v5469_v26 = vpack.c.bf16 %v2210_v62, %v2208_v33 }
 0x251   :  { %9065 = vst [vmem:[#allocation8_spill] sm:$0xff] %v7510_v20 }
 0x252   :  { %9066 = vst [vmem:[#allocation9_spill] sm:$0xff] %v7512_v24  ;;  %v6282_v23 = vpack.i.bf16 %v7510_v20, %v7512_v24  ;;  %v2214_v20 = vld [vmem:[#allocation2 + $0x38] sm:$0xff] }
 0x254   :  { %6283 = vrot.lane.b32.xlu0 %v6282_v23, %s6355_s2  ;;  %s6359_s2 = smov 104  }
 0x266   :  { %v6219_v55 = vpop.permute.xlu0 %6218 }
 0x267   :  { %v6221_v30 = vunpack.i.h.bf16 %v6219_v55  ;;  %v6220_v35 = vunpack.i.l.bf16 %v6219_v55 }
 0x269   :  { %v2097_v5 = vsel %vm2094_vm4, %v6221_v30, %v6220_v35 }
 0x26a   :  { %v7521_v54 = vpop.permute.xlu0 %2020  ;;  %v7529_v19 = vmax.f32 %v7302_v9, %v2097_v5 }
 0x26b   :  { %v2098_v12 = vsel %vm2094_vm4, %v6220_v35, %v7521_v54 }
 0x26c   :  { %v7526_v17 = vmax.f32 %v7304_v11, %v2098_v12 }
 0x26e   :  { %2451 = vmatprep.mubr.f32.mxu1 %v7526_v17  ;;  %v6224_v25 = vpop.permute.xlu1 %6223 }
 0x26f   :  { %v6226_v45 = vunpack.i.h.bf16 %v6224_v25  ;;  %v6225_v23 = vunpack.i.l.bf16 %v6224_v25  ;;  %2452 = vmatmul.mubr.f32.vlgmr.msra.gmra.mrb[28].mxu1 %v7529_v19 }
 0x270   :  { %5468 = vmatpush1.bf16.msk.msra.mxu1 %vm6458_vm2, %v5466_v57 }
 0x271   :  { %v2100_v55 = vsel %vm2094_vm4, %v6225_v23, %v7518_v6  ;;  %v2099_v11 = vsel %vm2094_vm4, %v6226_v45, %v6225_v23  ;;  %5470 = vmatprep.subr.bf16.mxu1 %v5469_v26 }
 0x272   :  { %v7539_v9 = vmax.f32 %v7319_v42, %v2100_v55  ;;  %v7542_v30 = vmax.f32 %v7317_v41, %v2099_v11  ;;  %v7546_v5 = vpop.permute.xlu1 %2032 }
 0x274   :  { %2457 = vmatprep.mubr.f32.mxu1 %v7539_v9 }
 0x275   :  { %2458 = vmatmul.mubr.f32.gmra.mrb[30].mxu1 %v7542_v30 }
 0x276   :  { %v6229_v35 = vpop.permute.xlu0 %6228  ;;  %v7559_v25 = vpop.permute.xlu1 %2038 }
 0x277   :  { %v6231_v3 = vunpack.i.h.bf16 %v6229_v35  ;;  %v6230_v1 = vunpack.i.l.bf16 %v6229_v35 }
 0x279   :  { %v2102_v33 = vsel %vm2094_vm4, %v6230_v1, %v7546_v5  ;;  %v2101_v62 = vsel %vm2094_vm4, %v6231_v3, %v6230_v1 }
 0x27a   :  { %v7552_v42 = vmax.f32 %v7336_v8, %v2102_v33  ;;  %v7555_v41 = vmax.f32 %v7334_v7, %v2101_v62  ;;  %v7572_v3 = vpop.permute.xlu1 %2044 }
 0x27c   :  { %2463 = vmatprep.mubr.f32.mxu1 %v7552_v42 }
 0x27d   :  { %2464 = vmatmul.mubr.f32.gmra.mrb[32].mxu1 %v7555_v41 }
 0x27e   :  { %v6234_v12 = vpop.permute.xlu0 %6233 }
 0x27f   :  { %v6236_v57 = vunpack.i.h.bf16 %v6234_v12  ;;  %v6235_v26 = vunpack.i.l.bf16 %v6234_v12 }
 0x281   :  { %v2104_v45 = vsel %vm2094_vm4, %v6235_v26, %v7559_v25  ;;  %v2103_v23 = vsel %vm2094_vm4, %v6236_v57, %v6235_v26  ;;  %v7585_v26 = vpop.permute.xlu1 %2050 }
 0x282   :  { %v7565_v8 = vmax.f32 %v7355_v46, %v2104_v45  ;;  %v7568_v7 = vmax.f32 %v7353_v43, %v2103_v23 }
 0x284   :  { %2469 = vmatprep.mubr.f32.mxu1 %v7565_v8 }
 0x285   :  { %2470 = vmatmul.mubr.f32.gmra.mrb[34].mxu1 %v7568_v7 }
 0x286   :  { %v6239_v55 = vpop.permute.xlu0 %6238 }
 0x287   :  { %v6241_v11 = vunpack.i.h.bf16 %v6239_v55  ;;  %v6240_v35 = vunpack.i.l.bf16 %v6239_v55 }
 0x289   :  { %v2106_v1 = vsel %vm2094_vm4, %v6240_v35, %v7572_v3  ;;  %v2105_v33 = vsel %vm2094_vm4, %v6241_v11, %v6240_v35 }
 0x28a   :  { %v7578_v46 = vmax.f32 %v7374_v32, %v2106_v1  ;;  %v7581_v43 = vmax.f32 %v7372_v14, %v2105_v33  ;;  %v7598_v1 = vpop.permute.xlu1 %2056 }
 0x28c   :  { %2475 = vmatprep.mubr.f32.mxu1 %v7578_v46 }
 0x28d   :  { %2476 = vmatmul.mubr.f32.gmra.mrb[36].mxu1 %v7581_v43 }
 0x28e   :  { %v6244_v62 = vpop.permute.xlu0 %6243 }
 0x28f   :  { %v6246_v12 = vunpack.i.h.bf16 %v6244_v62  ;;  %v6245_v57 = vunpack.i.l.bf16 %v6244_v62 }
 0x291   :  { %v2108_v45 = vsel %vm2094_vm4, %v6245_v57, %v7585_v26  ;;  %v2107_v23 = vsel %vm2094_vm4, %v6246_v12, %v6245_v57 }
 0x292   :  { %v7591_v32 = vmax.f32 %v7393_v61, %v2108_v45  ;;  %v7594_v14 = vmax.f32 %v7391_v52, %v2107_v23  ;;  %v7611_v23 = vpop.permute.xlu1 %2062 }
 0x294   :  { %2481 = vmatprep.mubr.f32.mxu1 %v7591_v32 }
 0x295   :  { %2482 = vmatmul.mubr.f32.gmra.mrb[38].mxu1 %v7594_v14 }
 0x296   :  { %v6249_v55 = vpop.permute.xlu0 %6248 }
 0x297   :  { %v6251_v11 = vunpack.i.h.bf16 %v6249_v55  ;;  %v6250_v35 = vunpack.i.l.bf16 %v6249_v55 }
 0x299   :  { %v2110_v33 = vsel %vm2094_vm4, %v6250_v35, %v7598_v1  ;;  %v2109_v62 = vsel %vm2094_vm4, %v6251_v11, %v6250_v35 }
 0x29a   :  { %v7604_v61 = vmax.f32 %v7414_v29, %v2110_v33  ;;  %v7607_v52 = vmax.f32 %v7412_v27, %v2109_v62 }
 0x29c   :  { %2487 = vmatprep.mubr.f32.mxu1 %v7604_v61 }
 0x29d   :  { %2488 = vmatmul.mubr.f32.gmra.mrb[40].mxu1 %v7607_v52 }
 0x29e   :  { %v6254_v12 = vpop.permute.xlu0 %6253 }
 0x29f   :  { %v6256_v57 = vunpack.i.h.bf16 %v6254_v12  ;;  %v6255_v45 = vunpack.i.l.bf16 %v6254_v12  ;;  %v7624_v12 = vpop.permute.xlu1 %2068 }
 0x2a1   :  { %v2112_v55 = vsel %vm2094_vm4, %v6255_v45, %v7611_v23  ;;  %v2111_v11 = vsel %vm2094_vm4, %v6256_v57, %v6255_v45 }
 0x2a2   :  { %v7617_v29 = vmax.f32 %v7433_v16, %v2112_v55  ;;  %v7620_v27 = vmax.f32 %v7431_v38, %v2111_v11 }
 0x2a4   :  { %2493 = vmatprep.mubr.f32.mxu1 %v7617_v29 }
 0x2a5   :  { %2494 = vmatmul.mubr.f32.gmra.mrb[42].mxu1 %v7620_v27 }
 0x2a6   :  { %v6259_v35 = vpop.permute.xlu0 %6258 }
 0x2a7   :  { %v6261_v33 = vunpack.i.h.bf16 %v6259_v35  ;;  %v6260_v62 = vunpack.i.l.bf16 %v6259_v35  ;;  %v7637_v35 = vpop.permute.xlu1 %2074 }
 0x2a9   :  { %v2114_v0 = vsel %vm2094_vm4, %v6260_v62, %v7624_v12  ;;  %v2113_v57 = vsel %vm2094_vm4, %v6261_v33, %v6260_v62 }
 0x2aa   :  { %v7630_v16 = vmax.f32 %v7452_v21, %v2114_v0  ;;  %v7633_v38 = vmax.f32 %v7450_v56, %v2113_v57 }
 0x2ac   :  { %2499 = vmatprep.mubr.f32.mxu1 %v7630_v16 }
 0x2ad   :  { %2500 = vmatmul.mubr.f32.gmra.mrb[44].mxu1 %v7633_v38 }
 0x2ae   :  { %v6264_v45 = vpop.permute.xlu0 %6263 }
 0x2af   :  { %v6266_v55 = vunpack.i.h.bf16 %v6264_v45  ;;  %v6265_v11 = vunpack.i.l.bf16 %v6264_v45  ;;  %v7650_v45 = vpop.permute.xlu1 %2080 }
 0x2b1   :  { %v2116_v34 = vsel %vm2094_vm4, %v6265_v11, %v7637_v35  ;;  %v2115_v33 = vsel %vm2094_vm4, %v6266_v55, %v6265_v11 }
 0x2b2   :  { %v7643_v0 = vmax.f32 %v7467_v53, %v2116_v34  ;;  %v7646_v56 = vmax.f32 %v7465_v51, %v2115_v33 }
 0x2b4   :  { %2505 = vmatprep.mubr.f32.mxu1 %v7643_v0 }
 0x2b5   :  { %2506 = vmatmul.mubr.f32.gmra.mrb[46].mxu1 %v7646_v56 }
 0x2b6   :  { %v6269_v21 = vpop.permute.xlu0 %6268 }
 0x2b7   :  { %v6271_v62 = vunpack.i.h.bf16 %v6269_v21  ;;  %v6270_v57 = vunpack.i.l.bf16 %v6269_v21  ;;  %v7663_v21 = vpop.permute.xlu1 %2086 }
 0x2b9   :  { %v2118_v28 = vsel %vm2094_vm4, %v6270_v57, %v7650_v45  ;;  %v2117_v55 = vsel %vm2094_vm4, %v6271_v62, %v6270_v57  ;;  %v2209_v57 = vld [vmem:[#allocation2 + $0x10] sm:$0xff] }
 0x2ba   :  { %v7656_v34 = vmax.f32 %v7482_v49, %v2118_v28  ;;  %v7659_v51 = vmax.f32 %v7480_v47, %v2117_v55  ;;  %v2207_v49 = vld [vmem:[#allocation2] sm:$0xff]  ;;  %v2212_v55 = vld [vmem:[#allocation2 + $0x28] sm:$0xff] }
 0x2bb   :  { %v5471_v24 = vpack.c.bf16 %v2209_v57, %v2207_v49  ;;  %v2222_v57 = vld [vmem:[#allocation2 + $0x78] sm:$0xff] }
 0x2bc   :  { %2511 = vmatprep.mubr.f32.mxu1 %v7656_v34 }
 0x2bd   :  { %2512 = vmatmul.mubr.f32.gmra.mrb[48].mxu1 %v7659_v51 }
 0x2be   :  { %v6274_v53 = vpop.permute.xlu0 %6273 }
 0x2bf   :  { %v6276_v11 = vunpack.i.h.bf16 %v6274_v53  ;;  %v6275_v33 = vunpack.i.l.bf16 %v6274_v53  ;;  %v9069_v53 = vmov 0.0  }
 0x2c1   :  { %v2120_v2 = vsel %vm2094_vm4, %v6275_v33, %v7663_v21  ;;  %v2119_v62 = vsel %vm2094_vm4, %v6276_v11, %v6275_v33  ;;  %v7679_v11 = vmax.f32 %v7194_v31, %v7521_v54  ;;  %v2216_v33 = vld [vmem:[#allocation2 + $0x48] sm:$0xff]  ;;  %v2215_v31 = vld [vmem:[#allocation2 + $0x40] sm:$0xff]  ;;  %v2217_v54 = vld [vmem:[#allocation2 + $0x50] sm:$0xff] }
 0x2c2   :  { %v7669_v28 = vmax.f32 %v7497_v59, %v2120_v2  ;;  %v7672_v47 = vmax.f32 %v7495_v39, %v2119_v62  ;;  %v5473_v2 = vpack.c.bf16 %v2214_v20, %v2212_v55  ;;  %v2211_v59 = vld [vmem:[#allocation2 + $0x20] sm:$0xff]  ;;  %v2213_v39 = vld [vmem:[#allocation2 + $0x30] sm:$0xff]  ;;  %v2218_v62 = vld [vmem:[#allocation2 + $0x58] sm:$0xff]  ;;  %v7693_v55 = vmax.f32 %v7183_v18, %v7546_v5 }
 0x2c3   :  { %v5477_v49 = vpack.c.bf16 %v2218_v62, %v2216_v33  ;;  %v2220_v20 = vld [vmem:[#allocation2 + $0x68] sm:$0xff]  ;;  %v7700_v33 = vmax.f32 %v7197_v37, %v7559_v25  ;;  %v2223_v5 = vld [vmem:[#allocation2 + $0x80] sm:$0xff]  ;;  %v2225_v62 = vld [vmem:[#allocation2 + $0x90] sm:$0xff] }
 0x2c4   :  { %9067 = vst [vmem:[#allocation10_spill] sm:$0xff] %v7669_v28  ;;  %9068 = vst [vmem:[#allocation11_spill] sm:$0xff] %v7672_v47  ;;  %2517 = vmatprep.mubr.f32.mxu1 %v7669_v28  ;;  %v7686_v28 = vmax.f32 %v7203_v44, %v7518_v6  ;;  %v5481_v44 = vpack.c.bf16 %v2222_v57, %v2220_v20  ;;  %v2219_v6 = vld [vmem:[#allocation2 + $0x60] sm:$0xff]  ;;  %v7707_v20 = vmax.f32 %v7208_v48, %v7572_v3  ;;  %v2229_v57 = vld [vmem:[#allocation2 + $0xb0] sm:$0xff] }
 0x2c5   :  { %2518 = vmatmul.mubr.f32.gmra.mrb[50].mxu1 %v7672_v47  ;;  %v5475_v47 = vpack.c.bf16 %v2213_v39, %v2211_v59  ;;  %v2224_v59 = vld [vmem:[#allocation2 + $0x88] sm:$0xff]  ;;  %v2226_v39 = vld [vmem:[#allocation2 + $0x98] sm:$0xff]  ;;  %v2227_v25 = vld [vmem:[#allocation2 + $0xa0] sm:$0xff] }
 0x2c6   :  { %2588 = vmatprep.mubr.f32.mxu1 %v9069_v53  ;;  %v5485_v18 = vpack.c.bf16 %v2226_v39, %v2224_v59  ;;  %v2231_v3 = vld [vmem:[#allocation2 + $0xc0] sm:$0xff]  ;;  %v2233_v59 = vld [vmem:[#allocation2 + $0xd0] sm:$0xff]  ;;  %v2236_v39 = vld [vmem:[#allocation2 + $0xe8] sm:$0xff] }
 0x2c9   :  { %4819 = vmatmul.mubr.msk.f32.vlgmr.msra.gmra.mrb[28].mxu1 %vm2344_vm5, %v7679_v11 }
 0x2ca   :  { %5472 = vmatpush1.bf16.msra.mxu1 %v5471_v24  ;;  %2594 = vmatprep.mubr.f32.mxu1 %v9069_v53  ;;  %v5479_v24 = vpack.c.bf16 %v2217_v54, %v2215_v31  ;;  %v2230_v31 = vld [vmem:[#allocation2 + $0xb8] sm:$0xff]  ;;  %v5487_v54 = vpack.c.bf16 %v2225_v62, %v2223_v5  ;;  %v7721_v5 = vmax.f32 %v7224_v4, %v7598_v1  ;;  %v2237_v62 = vld [vmem:[#allocation2 + $0xf0] sm:$0xff]  ;;  %v2239_v1 = vld [vmem:[#allocation2 + $0x100] sm:$0xff] }
 0x2cb   :  { %5474 = vmatprep.subr.bf16.mxu1 %v5473_v2  ;;  %v2221_v2 = vld [vmem:[#allocation2 + $0x70] sm:$0xff] }
 0x2cd   :  { %4820 = vmatmul.mubr.msk.f32.gmra.mrb[30].mxu1 %vm2344_vm5, %v7686_v28 }
 0x2ce   :  { %5476 = vmatpush1.bf16.msra.mxu1 %v5475_v47  ;;  %2600 = vmatprep.mubr.f32.mxu1 %v9069_v53  ;;  %v5483_v47 = vpack.c.bf16 %v2221_v2, %v2219_v6  ;;  %v5491_v6 = vpack.c.bf16 %v2229_v57, %v2227_v25  ;;  %v7714_v2 = vmax.f32 %v7218_v60, %v7585_v26  ;;  %v2235_v26 = vld [vmem:[#allocation2 + $0xe0] sm:$0xff]  ;;  %v2241_v25 = vld [vmem:[#allocation2 + $0x110] sm:$0xff]  ;;  %v2244_v57 = vld [vmem:[#allocation2 + $0x128] sm:$0xff] }
 0x2cf   :  { %5478 = vmatprep.subr.bf16.mxu1 %v5477_v49  ;;  %v2228_v49 = vld [vmem:[#allocation2 + $0xa8] sm:$0xff] }
 0x2d0   :  { %v5489_v37 = vpack.c.bf16 %v2230_v31, %v2228_v49  ;;  %v2240_v49 = vld [vmem:[#allocation2 + $0x108] sm:$0xff]  ;;  %v2242_v31 = vld [vmem:[#allocation2 + $0x118] sm:$0xff] }
 0x2d1   :  { %4821 = vmatmul.mubr.msk.f32.gmra.mrb[32].mxu1 %vm2344_vm5, %v7693_v55  ;;  %v5501_v4 = vpack.c.bf16 %v2242_v31, %v2240_v49 }
 0x2d2   :  { %5480 = vmatpush1.bf16.msra.mxu1 %v5479_v24  ;;  %2606 = vmatprep.mubr.f32.mxu1 %v9069_v53  ;;  %v2232_v24 = vld [vmem:[#allocation2 + $0xc8] sm:$0xff] }
 0x2d3   :  { %5482 = vmatprep.subr.bf16.mxu1 %v5481_v44  ;;  %v2234_v44 = vld [vmem:[#allocation2 + $0xd8] sm:$0xff] }
 0x2d4   :  { %v5493_v48 = vpack.c.bf16 %v2234_v44, %v2232_v24  ;;  %v2246_v24 = vld [vmem:[#allocation2 + $0x138] sm:$0xff]  ;;  %v5503_v44 = vpack.c.bf16 %v2241_v25, %v2239_v1  ;;  %v7754_v1 = vpop.permute.xlu1 %2014  ;;  %v2256_v25 = vld [vmem:[#allocation2 + $0x188] sm:$0xff] }
 0x2d5   :  { %4822 = vmatmul.mubr.msk.f32.gmra.mrb[34].mxu1 %vm2344_vm5, %v7700_v33 }
 0x2d6   :  { %5484 = vmatpush1.bf16.msra.mxu1 %v5483_v47  ;;  %2612 = vmatprep.mubr.f32.mxu1 %v9069_v53  ;;  %v2238_v47 = vld [vmem:[#allocation2 + $0xf8] sm:$0xff] }
 0x2d7   :  { %5486 = vmatprep.subr.bf16.mxu1 %v5485_v18  ;;  %v5495_v18 = vpack.c.bf16 %v2233_v59, %v2231_v3  ;;  %v5497_v60 = vpack.c.bf16 %v2238_v47, %v2236_v39  ;;  %v2248_v3 = vld [vmem:[#allocation2 + $0x148] sm:$0xff]  ;;  %v2250_v59 = vld [vmem:[#allocation2 + $0x158] sm:$0xff]  ;;  %v7739_v39 = vpop.permute.xlu0 %6278 }
 0x2d8   :  { %v6280_v49 = vunpack.i.l.bf16 %v7739_v39 }
 0x2d9   :  { %4823 = vmatmul.mubr.msk.f32.gmra.mrb[36].mxu1 %vm2344_vm5, %v7707_v20 }
 0x2da   :  { %5488 = vmatpush1.bf16.msra.mxu1 %v5487_v54  ;;  %2618 = vmatprep.mubr.f32.mxu1 %v9069_v53  ;;  %v5499_v54 = vpack.c.bf16 %v2237_v62, %v2235_v26  ;;  %v2252_v26 = vld [vmem:[#allocation2 + $0x168] sm:$0xff]  ;;  %v2254_v62 = vld [vmem:[#allocation2 + $0x178] sm:$0xff] }
 0x2db   :  { %5490 = vmatprep.subr.bf16.mxu1 %v5489_v37  ;;  %v7728_v37 = vmax.f32 %v7230_v15, %v7611_v23  ;;  %v5505_v15 = vpack.c.bf16 %v2246_v24, %v2244_v57  ;;  %v2243_v23 = vld [vmem:[#allocation2 + $0x120] sm:$0xff]  ;;  %v2258_v57 = vld [vmem:[#allocation2 + $0x198] sm:$0xff]  ;;  %v2096_v24 = vsel %vm2094_vm4, %v6280_v49, %v7754_v1  ;;  %v6284_v10 = vpop.permute.xlu0 %6283 }
 0x2dd   :  { %4824 = vmatmul.mubr.msk.f32.gmra.mrb[38].mxu1 %vm2344_vm5, %v7714_v2 }
 0x2de   :  { %5492 = vmatpush1.bf16.msra.mxu1 %v5491_v6  ;;  %2624 = vmatprep.mubr.f32.mxu1 %v9069_v53  ;;  %v7735_v6 = vmax.f32 %v7236_v22, %v7624_v12  ;;  %v5509_v22 = vpack.c.bf16 %v2250_v59, %v2248_v3  ;;  %v2247_v12 = vld [vmem:[#allocation2 + $0x140] sm:$0xff]  ;;  %v2260_v3 = vld [vmem:[#allocation2 + $0x1a8] sm:$0xff]  ;;  %v2262_v59 = vld [vmem:[#allocation2 + $0x1b8] sm:$0xff] }
 0x2df   :  { %5494 = vmatprep.subr.bf16.mxu1 %v5493_v48  ;;  %v2245_v48 = vld [vmem:[#allocation2 + $0x130] sm:$0xff] }
 0x2e0   :  { %v5507_v47 = vpack.c.bf16 %v2245_v48, %v2243_v23  ;;  %v2257_v23 = vld [vmem:[#allocation2 + $0x190] sm:$0xff]  ;;  %v2166_v48 = vmax.f32 %v7292_v58, %v2096_v24 }
 0x2e1   :  { %4825 = vmatmul.mubr.msk.f32.gmra.mrb[40].mxu1 %vm2344_vm5, %v7721_v5  ;;  %v2265_v58 = vld [vmem:[#allocation2 + $0x1d0] sm:$0xff] }
 0x2e2   :  { %5496 = vmatpush1.bf16.msra.mxu1 %v5495_v18  ;;  %2630 = vmatprep.mubr.f32.mxu1 %v9069_v53  ;;  %v7744_v18 = vmax.f32 %v7242_v40, %v7637_v35  ;;  %v5513_v40 = vpack.c.bf16 %v2254_v62, %v2252_v26  ;;  %v2251_v35 = vld [vmem:[#allocation2 + $0x160] sm:$0xff]  ;;  %v2269_v24 = vld [vmem:[#allocation2 + $0x1f0] sm:$0xff] }
 0x2e3   :  { %5498 = vmatprep.subr.bf16.mxu1 %v5497_v60  ;;  %v2249_v60 = vld [vmem:[#allocation2 + $0x150] sm:$0xff] }
 0x2e4   :  { %v5511_v31 = vpack.c.bf16 %v2249_v60, %v2247_v12  ;;  %v2259_v12 = vld [vmem:[#allocation2 + $0x1a0] sm:$0xff]  ;;  %v2261_v60 = vld [vmem:[#allocation2 + $0x1b0] sm:$0xff] }
 0x2e5   :  { %4826 = vmatmul.mubr.msk.f32.gmra.mrb[42].mxu1 %vm2344_vm5, %v7728_v37  ;;  %v5523_v26 = vpack.c.bf16 %v2261_v60, %v2259_v12  ;;  %v2948_v12 = vld [vmem:[#allocation2 + $0x458] sm:$0xff] }
 0x2e6   :  { %5500 = vmatpush1.bf16.msra.mxu1 %v5499_v54  ;;  %2636 = vmatprep.mubr.f32.mxu1 %v9069_v53  ;;  %v7752_v54 = vmax.f32 %v7248_v50, %v7650_v45  ;;  %v7763_v50 = vmax.f32 %v7254_v63, %v7663_v21  ;;  %v5517_v45 = vpack.c.bf16 %v2258_v57, %v2256_v25  ;;  %v2264_v63 = vld [vmem:[#allocation2 + $0x1c8] sm:$0xff]  ;;  %v2266_v21 = vld [vmem:[#allocation2 + $0x1d8] sm:$0xff]  ;;  %v2267_v57 = vld [vmem:[#allocation2 + $0x1e0] sm:$0xff] }
 0x2e7   :  { %5502 = vmatprep.subr.bf16.mxu1 %v5501_v4  ;;  %v2253_v4 = vld [vmem:[#allocation2 + $0x170] sm:$0xff]  ;;  %v5525_v62 = vpack.c.bf16 %v2266_v21, %v2264_v63 }
 0x2e9   :  { %4827 = vmatmul.mubr.msk.f32.gmra.mrb[44].mxu1 %vm2344_vm5, %v7735_v6 }
 0x2ea   :  { %5504 = vmatpush1.bf16.msra.mxu1 %v5503_v44  ;;  %2642 = vmatprep.mubr.f32.mxu1 %v9069_v53  ;;  %v5515_v44 = vpack.c.bf16 %v2253_v4, %v2251_v35  ;;  %v2270_v35 = vld [vmem:[#allocation2 + $0x1f8] sm:$0xff] }
 0x2eb   :  { %5506 = vmatprep.subr.bf16.mxu1 %v5505_v15  ;;  %v2255_v15 = vld [vmem:[#allocation2 + $0x180] sm:$0xff] }
 0x2ed   :  { %4828 = vmatmul.mubr.msk.f32.gmra.mrb[46].mxu1 %vm2344_vm5, %v7744_v18 }
 0x2ee   :  { %5508 = vmatpush1.bf16.msra.mxu1 %v5507_v47  ;;  %2648 = vmatprep.mubr.f32.mxu1 %v9069_v53  ;;  %v5519_v47 = vpack.c.bf16 %v2257_v23, %v2255_v15  ;;  %v2274_v15 = vld [vmem:[#allocation2 + $0x218] sm:$0x3f]  ;;  %v5531_v23 = vpack.c.bf16 %v2269_v24, %v2267_v57  ;;  %v2953_v57 = vld [vmem:[#allocation2 + $0x480] sm:$0xff]  ;;  %v2955_v24 = vld [vmem:[#allocation2 + $0x490] sm:$0xff] }
 0x2ef   :  { %5510 = vmatprep.subr.bf16.mxu1 %v5509_v22  ;;  %v5521_v22 = vpack.c.bf16 %v2262_v59, %v2260_v3  ;;  %v2271_v3 = vld [vmem:[#allocation2 + $0x200] sm:$0xff]  ;;  %v2273_v59 = vld [vmem:[#allocation2 + $0x210] sm:$0x3f] }
 0x2f0   :  { %v5536_v60 = vpack.c.bf16 %v2273_v59, %v2271_v3  ;;  %v2964_v3 = vld [vmem:[#allocation2 + $0x4d8] sm:$0xff] }
 0x2f1   :  { %4829 = vmatmul.mubr.msk.f32.gmra.mrb[48].mxu1 %vm2344_vm5, %v7752_v54 }
 0x2f2   :  { %5512 = vmatpush1.bf16.msra.mxu1 %v5511_v31  ;;  %2654 = vmatprep.mubr.f32.mxu1 %v9069_v53  ;;  %v2263_v31 = vld [vmem:[#allocation2 + $0x1c0] sm:$0xff] }
 0x2f3   :  { %5514 = vmatprep.subr.bf16.mxu1 %v5513_v40  ;;  %v2268_v40 = vld [vmem:[#allocation2 + $0x1e8] sm:$0xff]  ;;  %v5527_v4 = vpack.c.bf16 %v2265_v58, %v2263_v31  ;;  %v2949_v31 = vld [vmem:[#allocation2 + $0x460] sm:$0xff]  ;;  %v2951_v58 = vld [vmem:[#allocation2 + $0x470] sm:$0xff] }
 0x2f4   :  { %v5529_v25 = vpack.c.bf16 %v2270_v35, %v2268_v40  ;;  %v2954_v40 = vld [vmem:[#allocation2 + $0x488] sm:$0xff]  ;;  %v2956_v35 = vld [vmem:[#allocation2 + $0x498] sm:$0xff] }
 0x2f5   :  { %4830 = vmatmul.mubr.msk.f32.gmra.mrb[50].mxu1 %vm2344_vm5, %v7763_v50 }
 0x2f6   :  { %5516 = vmatpush1.bf16.msra.mxu1 %v5515_v44  ;;  %2734 = vmatprep.mubr.f32.mxu1 %v2166_v48  ;;  %v6281_v44 = vunpack.i.h.bf16 %v7739_v39 }
 0x2f7   :  { %5518 = vmatprep.subr.bf16.mxu1 %v5517_v45  ;;  %v2272_v45 = vld [vmem:[#allocation2 + $0x208] sm:$0xff] }
 0x2f8   :  { %v5533_v48 = vpack.c.bf16 %v2274_v15, %v2272_v45  ;;  %v2960_v45 = vld [vmem:[#allocation2 + $0x4b8] sm:$0xff]  ;;  %v2957_v15 = vld [vmem:[#allocation2 + $0x4a0] sm:$0xff] }
 0x2fa   :  { %5520 = vmatpush1.bf16.msra.mxu1 %v5519_v47  ;;  %v2095_v47 = vsel %vm2094_vm4, %v6281_v44, %v6280_v49  ;;  %v2952_v49 = vld [vmem:[#allocation2 + $0x478] sm:$0xff]  ;;  %v2958_v44 = vld [vmem:[#allocation2 + $0x4a8] sm:$0xff] }
 0x2fb   :  { %5522 = vmatprep.subr.bf16.mxu1 %v5521_v22  ;;  %v2946_v22 = vld [vmem:[#allocation2 + $0x448] sm:$0xff]  ;;  %v2165_v63 = vmax.f32 %v7290_v36, %v2095_v47  ;;  %v2945_v36 = vld [vmem:[#allocation2 + $0x440] sm:$0xff] }
 0x2fc   :  { %v5539_v39 = vpack.c.bf16 %v2948_v12, %v2946_v22  ;;  %v2963_v22 = vld [vmem:[#allocation2 + $0x4d0] sm:$0xff]  ;;  %v2966_v12 = vld [vmem:[#allocation2 + $0x4e8] sm:$0xff] }
 0x2fe   :  { %5524 = vmatpush1.bf16.msra.mxu1 %v5523_v26  ;;  %v2167_v26 = vmax.f32 %v7179_v13, %v7754_v1  ;;  %v5549_v13 = vpack.c.bf16 %v2955_v24, %v2953_v57  ;;  %v5551_v1 = vpack.c.bf16 %v2960_v45, %v2958_v44  ;;  %v2975_v57 = vld [vmem:[#allocation2 + $0x530] sm:$0xff]  ;;  %v2978_v24 = vld [vmem:[#allocation2 + $0x548] sm:$0xff]  ;;  %v2980_v44 = vld [vmem:[#allocation2 + $0x558] sm:$0xff] }
 0x2ff   :  { %5526 = vmatprep.subr.bf16.mxu1 %v5525_v62 }
 0x302   :  { %5528 = vmatpush1.bf16.msra.mxu1 %v5527_v4  ;;  %v5545_v4 = vpack.c.bf16 %v2951_v58, %v2949_v31  ;;  %v2971_v31 = vld [vmem:[#allocation2 + $0x510] sm:$0xff]  ;;  %v2974_v58 = vld [vmem:[#allocation2 + $0x528] sm:$0xff] }
 0x303   :  { %5530 = vmatprep.subr.bf16.mxu1 %v5529_v25  ;;  %v5547_v25 = vpack.c.bf16 %v2956_v35, %v2954_v40  ;;  %v2976_v40 = vld [vmem:[#allocation2 + $0x538] sm:$0xff] }
 0x306   :  { %5532 = vmatpush1.bf16.msra.mxu1 %v5531_v23  ;;  %v2959_v23 = vld [vmem:[#allocation2 + $0x4b0] sm:$0xff] }
 0x307   :  { %5535 = vmatprep.subr.msk.bf16.mxu1 %vm6458_vm2, %v5533_v48  ;;  %v2962_v48 = vld [vmem:[#allocation2 + $0x4c8] sm:$0xff]  ;;  %v5553_v59 = vpack.c.bf16 %v2959_v23, %v2957_v15  ;;  %v2979_v15 = vld [vmem:[#allocation2 + $0x550] sm:$0xff] }
 0x308   :  { %v5555_v47 = vpack.c.bf16 %v2964_v3, %v2962_v48  ;;  %v2982_v23 = vld [vmem:[#allocation2 + $0x568] sm:$0xff]  ;;  %v2984_v48 = vld [vmem:[#allocation2 + $0x578] sm:$0xff]  ;;  %v2981_v3 = vld [vmem:[#allocation2 + $0x560] sm:$0xff] }
 0x309   :  { %2735 = vmatmul.mubr.f32.vlgmr.msra.gmra.mrb[28].mxu1 %v2165_v63 }
 0x30a   :  { %2740 = vmatprep.mubr.f32.mxu1 %v7526_v17  ;;  %5538 = vmatpush1.bf16.msk.msra.mxu1 %vm6458_vm2, %v5536_v60  ;;  %v2947_v17 = vld [vmem:[#allocation2 + $0x450] sm:$0xff]  ;;  %v2968_v60 = vld [vmem:[#allocation2 + $0x4f8] sm:$0xff] }
 0x30b   :  { %5540 = vmatprep.subr.bf16.mxu1 %v5539_v39  ;;  %v5541_v21 = vpack.c.bf16 %v2947_v17, %v2945_v36  ;;  %v5559_v39 = vpack.c.bf16 %v2968_v60, %v2966_v12  ;;  %v2965_v36 = vld [vmem:[#allocation2 + $0x4e0] sm:$0xff]  ;;  %v2967_v17 = vld [vmem:[#allocation2 + $0x4f0] sm:$0xff] }
 0x30d   :  { %2741 = vmatmul.mubr.f32.gmra.mrb[30].mxu1 %v7529_v19  ;;  %v2950_v19 = vld [vmem:[#allocation2 + $0x468] sm:$0xff] }
 0x30e   :  { %2746 = vmatprep.mubr.f32.mxu1 %v7539_v9  ;;  %v5543_v62 = vpack.c.bf16 %v2952_v49, %v2950_v19  ;;  %v2970_v19 = vld [vmem:[#allocation2 + $0x508] sm:$0xff]  ;;  %v2972_v49 = vld [vmem:[#allocation2 + $0x518] sm:$0xff] }
 0x311   :  { %2747 = vmatmul.mubr.f32.gmra.mrb[32].mxu1 %v7542_v30 }
 0x312   :  { %2752 = vmatprep.mubr.f32.mxu1 %v7552_v42 }
 0x315   :  { %2753 = vmatmul.mubr.f32.gmra.mrb[34].mxu1 %v7555_v41 }
 0x316   :  { %2758 = vmatprep.mubr.f32.mxu1 %v7565_v8 }
 0x319   :  { %2759 = vmatmul.mubr.f32.gmra.mrb[36].mxu1 %v7568_v7 }
 0x31a   :  { %2764 = vmatprep.mubr.f32.mxu1 %v7578_v46 }
 0x31d   :  { %2765 = vmatmul.mubr.f32.gmra.mrb[38].mxu1 %v7581_v43 }
 0x31e   :  { %2770 = vmatprep.mubr.f32.mxu1 %v7591_v32 }
 0x321   :  { %2771 = vmatmul.mubr.f32.gmra.mrb[40].mxu1 %v7594_v14 }
 0x322   :  { %2776 = vmatprep.mubr.f32.mxu1 %v7604_v61 }
 0x325   :  { %2777 = vmatmul.mubr.f32.gmra.mrb[42].mxu1 %v7607_v52 }
 0x326   :  { %2782 = vmatprep.mubr.f32.mxu1 %v7617_v29 }
 0x329   :  { %2783 = vmatmul.mubr.f32.gmra.mrb[44].mxu1 %v7620_v27 }
 0x32a   :  { %2788 = vmatprep.mubr.f32.mxu1 %v7630_v16 }
 0x32d   :  { %2789 = vmatmul.mubr.f32.gmra.mrb[46].mxu1 %v7633_v38 }
 0x32e   :  { %2794 = vmatprep.mubr.f32.mxu1 %v7643_v0 }
 0x331   :  { %2795 = vmatmul.mubr.f32.gmra.mrb[48].mxu1 %v7646_v56 }
 0x332   :  { %2800 = vmatprep.mubr.f32.mxu1 %v7656_v34 }
 0x335   :  { %2801 = vmatmul.mubr.f32.gmra.mrb[50].mxu1 %v7659_v51 }
 0x336   :  { %2871 = vmatprep.mubr.f32.mxu1 %v9069_v53 }
 0x339   :  { %4833 = vmatmul.mubr.msk.f32.vlgmr.msra.gmra.mrb[28].mxu1 %vm2344_vm5, %v2167_v26  ;;  %v5563_v26 = vpack.c.bf16 %v2972_v49, %v2970_v19  ;;  %v2986_v19 = vld [vmem:[#allocation2 + $0x588] sm:$0xff] }
 0x33a   :  { %5542 = vmatpush1.bf16.msra.mxu1 %v5541_v21  ;;  %2877 = vmatprep.mubr.f32.mxu1 %v9069_v53  ;;  %v5561_v21 = vpack.c.bf16 %v2967_v17, %v2965_v36  ;;  %v4866_v36 = vld [vmem:[%s9043_s7 + $0x1b8] sm:$0xff]  ;;  %v5575_v17 = vpack.c.bf16 %v2984_v48, %v2982_v23  ;;  %v4872_v23 = vld [vmem:[%s9043_s7 + $0x1e8] sm:$0xff] }
 0x33b   :  { %5544 = vmatprep.subr.bf16.mxu1 %v5543_v62  ;;  %v2969_v62 = vld [vmem:[#allocation2 + $0x500] sm:$0xff]  ;;  %v4874_v48 = vld [vmem:[%s9043_s7 + $0x1f8] sm:$0xff] }
 0x33c   :  { %v5565_v35 = vpack.c.bf16 %v2971_v31, %v2969_v62  ;;  %v4865_v62 = vld [vmem:[%s9043_s7 + $0x1b0] sm:$0xff]  ;;  %v2988_v31 = vld [vmem:[#allocation2 + $0x598] sm:$0xff] }
 0x33d   :  { %4834 = vmatmul.mubr.msk.f32.gmra.mrb[30].mxu1 %vm2344_vm5, %v7679_v11  ;;  %v2961_v11 = vld [vmem:[#allocation2 + $0x4c0] sm:$0xff] }
 0x33e   :  { %5546 = vmatpush1.bf16.msra.mxu1 %v5545_v4  ;;  %2883 = vmatprep.mubr.f32.mxu1 %v9069_v53  ;;  %v5557_v63 = vpack.c.bf16 %v2963_v22, %v2961_v11  ;;  %v5567_v4 = vpack.c.bf16 %v2976_v40, %v2974_v58  ;;  %v4862_v11 = vld [vmem:[%s9043_s7 + $0x198] sm:$0xff]  ;;  %v4859_v22 = vld [vmem:[%s9043_s7 + $0x180] sm:$0xff]  ;;  %v4868_v58 = vld [vmem:[%s9043_s7 + $0x1c8] sm:$0xff] }
 0x33f   :  { %5548 = vmatprep.subr.bf16.mxu1 %v5547_v25  ;;  %v2973_v25 = vld [vmem:[#allocation2 + $0x520] sm:$0xff]  ;;  %v4870_v40 = vld [vmem:[%s9043_s7 + $0x1d8] sm:$0xff] }
 0x340   :  { %v5569_v45 = vpack.c.bf16 %v2975_v57, %v2973_v25  ;;  %v4867_v25 = vld [vmem:[%s9043_s7 + $0x1c0] sm:$0xff]  ;;  %v4869_v57 = vld [vmem:[%s9043_s7 + $0x1d0] sm:$0xff] }
 0x341   :  { %4835 = vmatmul.mubr.msk.f32.gmra.mrb[32].mxu1 %vm2344_vm5, %v7686_v28 }
 0x342   :  { %5550 = vmatpush1.bf16.msra.mxu1 %v5549_v13  ;;  %2889 = vmatprep.mubr.f32.mxu1 %v9069_v53  ;;  %v5571_v13 = vpack.c.bf16 %v2980_v44, %v2978_v24  ;;  %v5579_v24 = vpack.c.bf16 %v2988_v31, %v2986_v19  ;;  %v2985_v44 = vld [vmem:[#allocation2 + $0x580] sm:$0xff]  ;;  %v4878_v19 = vld [vmem:[%s9043_s7 + $0x218] sm:$0xff]  ;;  %v4877_v31 = vld [vmem:[%s9043_s7 + $0x210] sm:$0xff] }
 0x343   :  { %5552 = vmatprep.subr.bf16.mxu1 %v5551_v1  ;;  %v2977_v1 = vld [vmem:[#allocation2 + $0x540] sm:$0xff] }
 0x344   :  { %v5573_v12 = vpack.c.bf16 %v2979_v15, %v2977_v1  ;;  %v5617_v1 = vpack.c.bf16 %v4870_v40, %v4868_v58  ;;  %v2992_v15 = vld [vmem:[#allocation2 + $0x5b8] sm:$0xff]  ;;  %v2995_v40 = vld [vmem:[#allocation2 + $0x5d0] sm:$0xff] }
 0x345   :  { %4836 = vmatmul.mubr.msk.f32.gmra.mrb[34].mxu1 %vm2344_vm5, %v7693_v55 }
 0x346   :  { %5554 = vmatpush1.bf16.msra.mxu1 %v5553_v59  ;;  %2895 = vmatprep.mubr.f32.mxu1 %v9069_v53  ;;  %v2983_v59 = vld [vmem:[#allocation2 + $0x570] sm:$0xff] }
 0x347   :  { %5556 = vmatprep.subr.bf16.mxu1 %v5555_v47  ;;  %v4860_v47 = vld [vmem:[%s9043_s7 + $0x188] sm:$0xff] }
 0x348   :  { %v5609_v60 = vpack.c.bf16 %v4862_v11, %v4860_v47  ;;  %v4871_v47 = vld [vmem:[%s9043_s7 + $0x1e0] sm:$0xff]  ;;  %v4873_v11 = vld [vmem:[%s9043_s7 + $0x1f0] sm:$0xff] }
 0x349   :  { %4837 = vmatmul.mubr.msk.f32.gmra.mrb[36].mxu1 %vm2344_vm5, %v7700_v33 }
 0x34a   :  { %5558 = vmatpush1.bf16.msra.mxu1 %v5557_v63  ;;  %2901 = vmatprep.mubr.f32.mxu1 %v9069_v53  ;;  %v4861_v63 = vld [vmem:[%s9043_s7 + $0x190] sm:$0xff] }
 0x34b   :  { %5560 = vmatprep.subr.bf16.mxu1 %v5559_v39  ;;  %v4864_v39 = vld [vmem:[%s9043_s7 + $0x1a8] sm:$0xff]  ;;  %v5611_v49 = vpack.c.bf16 %v4861_v63, %v4859_v22  ;;  %5610 = vmatprep.subr.bf16.mxu0 %v5609_v60  ;;  %v2991_v60 = vld [vmem:[#allocation2 + $0x5b0] sm:$0xff] }
 0x34c   :  { %v2994_v63 = vld [vmem:[#allocation2 + $0x5c8] sm:$0xff] }
 0x34d   :  { %4838 = vmatmul.mubr.msk.f32.gmra.mrb[38].mxu1 %vm2344_vm5, %v7707_v20  ;;  %5612 = vmatpush1.bf16.msra.mxu0 %v5611_v49  ;;  %v5623_v49 = vpack.c.bf16 %v4873_v11, %v4871_v47  ;;  %v3002_v47 = vld [vmem:[#allocation2 + $0x608] sm:$0xff]  ;;  %v3004_v11 = vld [vmem:[#allocation2 + $0x618] sm:$0xff] }
 0x34e   :  { %5562 = vmatpush1.bf16.msra.mxu1 %v5561_v21  ;;  %2907 = vmatprep.mubr.f32.mxu1 %v9069_v53  ;;  %v5613_v21 = vpack.c.bf16 %v4866_v36, %v4864_v39  ;;  %v5621_v39 = vpack.c.bf16 %v4874_v48, %v4872_v23  ;;  %v2996_v36 = vld [vmem:[#allocation2 + $0x5d8] sm:$0xff]  ;;  %v4881_v23 = vld [vmem:[%s9043_s7 + $0x230] sm:$0xff] }
 0x34f   :  { %5564 = vmatprep.subr.bf16.mxu1 %v5563_v26  ;;  %v4863_v26 = vld [vmem:[%s9043_s7 + $0x1a0] sm:$0xff]  ;;  %v5587_v58 = vpack.c.bf16 %v2996_v36, %v2994_v63  ;;  %v4885_v36 = vld [vmem:[%s9043_s7 + $0x250] sm:$0xff] }
 0x350   :  { %5614 = vmatprep.subr.bf16.mxu0 %v5613_v21 }
 0x351   :  { %4839 = vmatmul.mubr.msk.f32.gmra.mrb[40].mxu1 %vm2344_vm5, %v7714_v2 }
 0x352   :  { %5566 = vmatpush1.bf16.msra.mxu1 %v5565_v35  ;;  %2913 = vmatprep.mubr.f32.mxu1 %v9069_v53  ;;  %v5615_v35 = vpack.c.bf16 %v4865_v62, %v4863_v26  ;;  %v2993_v26 = vld [vmem:[#allocation2 + $0x5c0] sm:$0xff] }
 0x353   :  { %5568 = vmatprep.subr.bf16.mxu1 %v5567_v4  ;;  %v5577_v4 = vpack.c.bf16 %v2983_v59, %v2981_v3  ;;  %v5619_v3 = vpack.c.bf16 %v4869_v57, %v4867_v25  ;;  %v4875_v62 = vld [vmem:[%s9043_s7 + $0x200] sm:$0xff]  ;;  %v4882_v25 = vld [vmem:[%s9043_s7 + $0x238] sm:$0xff]  ;;  %v2998_v57 = vld [vmem:[#allocation2 + $0x5e8] sm:$0xff] }
 0x354   :  { %5616 = vmatpush1.bf16.msra.mxu0 %v5615_v35 }
 0x355   :  { %4840 = vmatmul.mubr.msk.f32.gmra.mrb[42].mxu1 %vm2344_vm5, %v7721_v5  ;;  %5618 = vmatprep.subr.bf16.mxu0 %v5617_v1 }
 0x356   :  { %5570 = vmatpush1.bf16.msra.mxu1 %v5569_v45  ;;  %2919 = vmatprep.mubr.f32.mxu1 %v9069_v53  ;;  %v2987_v45 = vld [vmem:[#allocation2 + $0x590] sm:$0xff] }
 0x357   :  { %5572 = vmatprep.subr.bf16.mxu1 %v5571_v13  ;;  %v2990_v13 = vld [vmem:[#allocation2 + $0x5a8] sm:$0xff]  ;;  %v5581_v59 = vpack.c.bf16 %v2987_v45, %v2985_v44  ;;  %v5627_v44 = vpack.c.bf16 %v4877_v31, %v4875_v62  ;;  %v5589_v45 = vpack.c.bf16 %v2995_v40, %v2993_v26  ;;  %v3008_v62 = vld [vmem:[#allocation2 + $0x638] sm:$0xff]  ;;  %v3005_v40 = vld [vmem:[#allocation2 + $0x620] sm:$0xff] }
 0x358   :  { %v5583_v22 = vpack.c.bf16 %v2992_v15, %v2990_v13  ;;  %5620 = vmatpush1.bf16.msra.mxu0 %v5619_v3  ;;  %v2997_v13 = vld [vmem:[#allocation2 + $0x5e0] sm:$0xff]  ;;  %v2999_v3 = vld [vmem:[#allocation2 + $0x5f0] sm:$0xff]  ;;  %v3006_v26 = vld [vmem:[#allocation2 + $0x628] sm:$0xff] }
 0x359   :  { %4841 = vmatmul.mubr.msk.f32.gmra.mrb[44].mxu1 %vm2344_vm5, %v7728_v37  ;;  %5622 = vmatprep.subr.bf16.mxu0 %v5621_v39  ;;  %v4879_v15 = vld [vmem:[%s9043_s7 + $0x220] sm:$0xff] }
 0x35a   :  { %5574 = vmatpush1.bf16.msra.mxu1 %v5573_v12  ;;  %2925 = vmatprep.mubr.f32.mxu1 %v9069_v53  ;;  %v2989_v12 = vld [vmem:[#allocation2 + $0x5a0] sm:$0xff] }
 0x35b   :  { %5576 = vmatprep.subr.bf16.mxu1 %v5575_v17  ;;  %v4876_v17 = vld [vmem:[%s9043_s7 + $0x208] sm:$0xff]  ;;  %v5585_v21 = vpack.c.bf16 %v2991_v60, %v2989_v12  ;;  %v5593_v12 = vpack.c.bf16 %v2999_v3, %v2997_v13  ;;  %v3001_v60 = vld [vmem:[#allocation2 + $0x600] sm:$0xff] }
 0x35c   :  { %v5625_v35 = vpack.c.bf16 %v4878_v19, %v4876_v17  ;;  %5624 = vmatpush1.bf16.msra.mxu0 %v5623_v49  ;;  %v4883_v39 = vld [vmem:[%s9043_s7 + $0x240] sm:$0xff]  ;;  %v5595_v17 = vpack.c.bf16 %v3004_v11, %v3002_v47  ;;  %v3003_v19 = vld [vmem:[#allocation2 + $0x610] sm:$0xff]  ;;  %v4888_v49 = vld [vmem:[%s9043_s7 + $0x268] sm:$0xff] }
 0x35d   :  { %4842 = vmatmul.mubr.msk.f32.gmra.mrb[46].mxu1 %vm2344_vm5, %v7735_v6  ;;  %v5635_v31 = vpack.c.bf16 %v4885_v36, %v4883_v39  ;;  %v3010_v13 = vld [vmem:[#allocation2 + $0x648] sm:$0xff]  ;;  %v4891_v3 = vld [vmem:[%s9043_s7 + $0x280] sm:$0xff]  ;;  %v3011_v11 = vld [vmem:[#allocation2 + $0x650] sm:$0x3f] }
 0x35e   :  { %5578 = vmatpush1.bf16.msra.mxu1 %v5577_v4  ;;  %2931 = vmatprep.mubr.f32.mxu1 %v9069_v53  ;;  %v4880_v4 = vld [vmem:[%s9043_s7 + $0x228] sm:$0xff]  ;;  %v3009_v47 = vld [vmem:[#allocation2 + $0x640] sm:$0xff]  ;;  %v4897_v36 = vld [vmem:[%s9043_s7 + $0x2b0] sm:$0xff] }
 0x35f   :  { %5580 = vmatprep.subr.bf16.mxu1 %v5579_v24  ;;  %v3000_v24 = vld [vmem:[#allocation2 + $0x5f8] sm:$0xff]  ;;  %v5629_v1 = vpack.c.bf16 %v4882_v25, %v4880_v4  ;;  %5626 = vmatprep.subr.bf16.mxu0 %v5625_v35  ;;  %v4887_v4 = vld [vmem:[%s9043_s7 + $0x260] sm:$0xff]  ;;  %v4889_v25 = vld [vmem:[%s9043_s7 + $0x270] sm:$0xff] }
 0x360   :  { %v5591_v48 = vpack.c.bf16 %v3000_v24, %v2998_v57  ;;  %5628 = vmatpush1.bf16.msra.mxu0 %v5627_v44  ;;  %v5599_v57 = vpack.c.bf16 %v3008_v62, %v3006_v26  ;;  %v3007_v24 = vld [vmem:[#allocation2 + $0x630] sm:$0xff]  ;;  %v4892_v44 = vld [vmem:[%s9043_s7 + $0x288] sm:$0xff]  ;;  %v4895_v39 = vld [vmem:[%s9043_s7 + $0x2a0] sm:$0xff] }
 0x361   :  { %4843 = vmatmul.mubr.msk.f32.gmra.mrb[48].mxu1 %vm2344_vm5, %v7744_v18  ;;  %5630 = vmatprep.subr.bf16.mxu0 %v5629_v1  ;;  %v3012_v1 = vld [vmem:[#allocation2 + $0x658] sm:$0x3f]  ;;  %v4899_v62 = vld [vmem:[%s9043_s7 + $0x2c0] sm:$0xff] }
 0x362   :  { %5582 = vmatpush1.bf16.msra.mxu1 %v5581_v59  ;;  %2937 = vmatprep.mubr.f32.mxu1 %v9069_v53  ;;  %v4884_v59 = vld [vmem:[%s9043_s7 + $0x248] sm:$0xff] }
 0x363   :  { %5584 = vmatprep.subr.bf16.mxu1 %v5583_v22  ;;  %v5631_v22 = vpack.c.bf16 %v4881_v23, %v4879_v15  ;;  %v5639_v15 = vpack.c.bf16 %v4889_v25, %v4887_v4  ;;  %v5601_v23 = vpack.c.bf16 %v3007_v24, %v3005_v40 }
 0x365   :  { %4844 = vmatmul.mubr.msk.f32.gmra.mrb[50].mxu1 %vm2344_vm5, %v7752_v54  ;;  %5632 = vmatpush1.bf16.msra.mxu0 %v5631_v22  ;;  %v4896_v22 = vld [vmem:[%s9043_s7 + $0x2a8] sm:$0xff] }
 0x366   :  { %5586 = vmatpush1.bf16.msra.mxu1 %v5585_v21  ;;  %3086 = vmatprep.mubr.f32.mxu1 %v7539_v9  ;;  %v4886_v9 = vld [vmem:[%s9043_s7 + $0x258] sm:$0xff] }
 0x367   :  { %5588 = vmatprep.subr.bf16.mxu1 %v5587_v58  ;;  %v5633_v63 = vpack.c.bf16 %v4886_v9, %v4884_v59  ;;  %v4890_v21 = vld [vmem:[%s9043_s7 + $0x278] sm:$0xff]  ;;  %v5597_v58 = vpack.c.bf16 %v3003_v19, %v3001_v60  ;;  %v4893_v59 = vld [vmem:[%s9043_s7 + $0x290] sm:$0xff]  ;;  %v5603_v9 = vpack.c.bf16 %v3012_v1, %v3010_v13  ;;  %v4900_v19 = vld [vmem:[%s9043_s7 + $0x2c8] sm:$0xff] }
 0x368   :  { %v5637_v35 = vpack.c.bf16 %v4890_v21, %v4888_v49  ;;  %v5643_v60 = vpack.c.bf16 %v4893_v59, %v4891_v3  ;;  %v4902_v49 = vld [vmem:[%s9043_s7 + $0x2d8] sm:$0xff]  ;;  %v5647_v21 = vpack.c.bf16 %v4897_v36, %v4895_v39  ;;  %v3418_v13 = vld [vmem:[%s9043_s7 + $0x10] sm:$0xff] }
 0x369   :  { %5634 = vmatprep.subr.bf16.mxu0 %v5633_v63  ;;  %v5606_v63 = vpack.c.bf16 %v3011_v11, %v3009_v47  ;;  %v5649_v26 = vpack.c.bf16 %v4902_v49, %v4900_v19  ;;  %v3422_v39 = vld [vmem:[%s9043_s7 + $0x30] sm:$0xff]  ;;  %v3425_v19 = vld [vmem:[%s9043_s7 + $0x48] sm:$0xff]  ;;  %v3427_v49 = vld [vmem:[%s9043_s7 + $0x58] sm:$0xff] }
 0x36a   :  { %5590 = vmatpush1.bf16.msra.mxu1 %v5589_v45  ;;  %v4894_v45 = vld [vmem:[%s9043_s7 + $0x298] sm:$0xff]  ;;  %5636 = vmatpush1.bf16.msra.mxu0 %v5635_v31  ;;  %v4901_v31 = vld [vmem:[%s9043_s7 + $0x2d0] sm:$0xff] }
 0x36b   :  { %5592 = vmatprep.subr.bf16.mxu1 %v5591_v48  ;;  %5638 = vmatprep.subr.bf16.mxu0 %v5637_v35  ;;  %v5641_v48 = vpack.c.bf16 %v4894_v45, %v4892_v44  ;;  %v3416_v45 = vld [vmem:[%s9043_s7] sm:$0xff] }
 0x36c   :  { %v5659_v11 = vpack.c.bf16 %v3418_v13, %v3416_v45 }
 0x36e   :  { %5594 = vmatpush1.bf16.msra.mxu1 %v5593_v12  ;;  %v4898_v12 = vld [vmem:[%s9043_s7 + $0x2b8] sm:$0xff]  ;;  %5640 = vmatpush1.bf16.msra.mxu0 %v5639_v15 }
 0x36f   :  { %5596 = vmatprep.subr.bf16.mxu1 %v5595_v17  ;;  %5642 = vmatprep.subr.bf16.mxu0 %v5641_v48  ;;  %v5645_v17 = vpack.c.bf16 %v4898_v12, %v4896_v22  ;;  %v3423_v48 = vld [vmem:[%s9043_s7 + $0x38] sm:$0xff] }
 0x372   :  { %5598 = vmatpush1.bf16.msra.mxu1 %v5597_v58  ;;  %5644 = vmatpush1.bf16.msra.mxu0 %v5643_v60 }
 0x373   :  { %5600 = vmatprep.subr.bf16.mxu1 %v5599_v57  ;;  %5646 = vmatprep.subr.bf16.mxu0 %v5645_v17 }
 0x376   :  { %5602 = vmatpush1.bf16.msra.mxu1 %v5601_v23  ;;  %5648 = vmatpush1.bf16.msra.mxu0 %v5647_v21  ;;  %v3421_v23 = vld [vmem:[%s9043_s7 + $0x28] sm:$0xff] }
 0x377   :  { %5605 = vmatprep.subr.msk.bf16.mxu1 %vm6458_vm2, %v5603_v9  ;;  %5650 = vmatprep.subr.bf16.mxu0 %v5649_v26  ;;  %v5661_v60 = vpack.c.bf16 %v3423_v48, %v3421_v23  ;;  %v3434_v23 = vld [vmem:[%s9043_s7 + $0x90] sm:$0xff] }
 0x379   :  { %3087 = vmatmul.mubr.f32.vlgmr.msra.gmra.mrb[28].mxu1 %v7542_v30  ;;  %v5651_v30 = vpack.c.bf16 %v4901_v31, %v4899_v62 }
 0x37a   :  { %3092 = vmatprep.mubr.f32.mxu1 %v7552_v42  ;;  %5608 = vmatpush1.bf16.msk.msra.mxu1 %vm6458_vm2, %v5606_v63  ;;  %v6285_v42 = vunpack.i.l.bf16 %v6284_v10  ;;  %v3420_v63 = vld [vmem:[%s9043_s7 + $0x20] sm:$0xff] }
 0x37b   :  { %5652 = vmatpush1.bf16.msra.mxu0 %v5651_v30  ;;  %v5663_v30 = vpack.c.bf16 %v3422_v39, %v3420_v63 }
 0x37d   :  { %3093 = vmatmul.mubr.f32.gmra.mrb[30].mxu1 %v7555_v41  ;;  %v2093_v41 = vpop.permute.xlu1 %2092 }
 0x37e   :  { %3098 = vmatprep.mubr.f32.mxu1 %v7565_v8  ;;  %v6286_v8 = vunpack.i.h.bf16 %v6284_v10 }
 0x381   :  { %3099 = vmatmul.mubr.f32.gmra.mrb[32].mxu1 %v7568_v7  ;;  %v2122_v7 = vsel %vm2094_vm4, %v6285_v42, %v2093_v41 }
 0x382   :  { %3104 = vmatprep.mubr.f32.mxu1 %v7578_v46  ;;  %v9070_v46 = vld [vmem:[#allocation10_spill] sm:$0xff] }
 0x385   :  { %3105 = vmatmul.mubr.f32.gmra.mrb[34].mxu1 %v7581_v43  ;;  %v9071_v43 = vld [vmem:[#allocation9_spill] sm:$0xff] }
 0x386   :  { %3110 = vmatprep.mubr.f32.mxu1 %v7591_v32  ;;  %v2205_v32 = vmax.f32 %v9071_v43, %v2122_v7  ;;  %v3426_v7 = vld [vmem:[%s9043_s7 + $0x50] sm:$0xff] }
 0x389   :  { %3111 = vmatmul.mubr.f32.gmra.mrb[36].mxu1 %v7594_v14  ;;  %v2121_v14 = vsel %vm2094_vm4, %v6286_v8, %v6285_v42  ;;  %v3424_v8 = vld [vmem:[%s9043_s7 + $0x40] sm:$0xff] }
 0x38a   :  { %3116 = vmatprep.mubr.f32.mxu1 %v7604_v61  ;;  %v9072_v61 = vld [vmem:[#allocation11_spill] sm:$0xff] }
 0x38d   :  { %3117 = vmatmul.mubr.f32.gmra.mrb[38].mxu1 %v7607_v52  ;;  %v9073_v52 = vld [vmem:[#allocation8_spill] sm:$0xff] }
 0x38e   :  { %3122 = vmatprep.mubr.f32.mxu1 %v7617_v29  ;;  %v2204_v29 = vmax.f32 %v9073_v52, %v2121_v14  ;;  %v3431_v14 = vld [vmem:[%s9043_s7 + $0x78] sm:$0xff] }
 0x391   :  { %3123 = vmatmul.mubr.f32.gmra.mrb[40].mxu1 %v7620_v27  ;;  %v9074_v27 = vld [vmem:[#allocation5_spill] sm:$0xff] }
 0x392   :  { %3128 = vmatprep.mubr.f32.mxu1 %v7630_v16  ;;  %v2206_v16 = vmax.f32 %v9074_v27, %v2093_v41  ;;  %v5665_v41 = vpack.c.bf16 %v3427_v49, %v3425_v19  ;;  %v3436_v49 = vld [vmem:[%s9043_s7 + $0xa0] sm:$0xff] }
 0x395   :  { %3129 = vmatmul.mubr.f32.gmra.mrb[42].mxu1 %v7633_v38  ;;  %v4904_v38 = vld [vmem:[%s9043_s7 + $0x2e8] sm:$0xff] }
 0x396   :  { %3134 = vmatprep.mubr.f32.mxu1 %v7643_v0  ;;  %v4906_v0 = vld [vmem:[%s9043_s7 + $0x2f8] sm:$0xff] }
 0x399   :  { %3135 = vmatmul.mubr.f32.gmra.mrb[44].mxu1 %v7646_v56  ;;  %v5653_v56 = vpack.c.bf16 %v4906_v0, %v4904_v38 }
 0x39a   :  { %3140 = vmatprep.mubr.f32.mxu1 %v7656_v34  ;;  %v4903_v34 = vld [vmem:[%s9043_s7 + $0x2e0] sm:$0xff] }
 0x39b   :  { %5654 = vmatprep.subr.bf16.mxu0 %v5653_v56 }
 0x39d   :  { %3141 = vmatmul.mubr.f32.gmra.mrb[46].mxu1 %v7659_v51  ;;  %v4905_v51 = vld [vmem:[%s9043_s7 + $0x2f0] sm:$0xff] }
 0x39e   :  { %3146 = vmatprep.mubr.f32.mxu1 %v9070_v46 }
 0x3a1   :  { %3147 = vmatmul.mubr.f32.gmra.mrb[48].mxu1 %v9072_v61 }
 0x3a2   :  { %3152 = vmatprep.mubr.f32.mxu1 %v2205_v32  ;;  %v3429_v32 = vld [vmem:[%s9043_s7 + $0x68] sm:$0xff] }
 0x3a3   :  { %v5669_v56 = vpack.c.bf16 %v3431_v14, %v3429_v32 }
 0x3a5   :  { %3153 = vmatmul.mubr.f32.gmra.mrb[50].mxu1 %v2204_v29 }
 0x3a6   :  { %3223 = vmatprep.mubr.f32.mxu1 %v9069_v53 }
 0x3a9   :  { %4847 = vmatmul.mubr.msk.f32.vlgmr.msra.gmra.mrb[28].mxu1 %vm2344_vm5, %v7686_v28  ;;  %v5655_v28 = vpack.c.bf16 %v4905_v51, %v4903_v34  ;;  %v3428_v34 = vld [vmem:[%s9043_s7 + $0x60] sm:$0xff]  ;;  %v3430_v51 = vld [vmem:[%s9043_s7 + $0x70] sm:$0xff] }
 0x3aa   :  { %3229 = vmatprep.mubr.f32.mxu1 %v9069_v53 }
 0x3ab   :  { %5656 = vmatpush1.bf16.msra.mxu0 %v5655_v28 }
 0x3ad   :  { %4848 = vmatmul.mubr.msk.f32.gmra.mrb[30].mxu1 %vm2344_vm5, %v7693_v55  ;;  %v3417_v55 = vld [vmem:[%s9043_s7 + $0x8] sm:$0xff] }
 0x3ae   :  { %3235 = vmatprep.mubr.f32.mxu1 %v9069_v53 }
 0x3b1   :  { %4849 = vmatmul.mubr.msk.f32.gmra.mrb[32].mxu1 %vm2344_vm5, %v7700_v33  ;;  %v3419_v33 = vld [vmem:[%s9043_s7 + $0x18] sm:$0xff] }
 0x3b2   :  { %3241 = vmatprep.mubr.f32.mxu1 %v9069_v53 }
 0x3b5   :  { %4850 = vmatmul.mubr.msk.f32.gmra.mrb[34].mxu1 %vm2344_vm5, %v7707_v20  ;;  %v5657_v20 = vpack.c.bf16 %v3419_v33, %v3417_v55  ;;  %v3433_v33 = vld [vmem:[%s9043_s7 + $0x88] sm:$0xff] }
 0x3b6   :  { %3247 = vmatprep.mubr.f32.mxu1 %v9069_v53 }
 0x3b7   :  { %5658 = vmatprep.subr.bf16.mxu0 %v5657_v20  ;;  %v3435_v20 = vld [vmem:[%s9043_s7 + $0x98] sm:$0xff] }
 0x3b8   :  { %v5673_v13 = vpack.c.bf16 %v3435_v20, %v3433_v33 }
 0x3b9   :  { %4851 = vmatmul.mubr.msk.f32.gmra.mrb[36].mxu1 %vm2344_vm5, %v7714_v2 }
 0x3ba   :  { %3253 = vmatprep.mubr.f32.mxu1 %v9069_v53 }
 0x3bd   :  { %4852 = vmatmul.mubr.msk.f32.gmra.mrb[38].mxu1 %vm2344_vm5, %v7721_v5  ;;  %v3320_v5 = vld [vmem:[%s9041_s5] sm:$0x3] }
 0x3be   :  { %3259 = vmatprep.mubr.f32.mxu1 %v9069_v53 }
 0x3c1   :  { %4853 = vmatmul.mubr.msk.f32.gmra.mrb[40].mxu1 %vm2344_vm5, %v7728_v37 }
 0x3c2   :  { %3265 = vmatprep.mubr.f32.mxu1 %v9069_v53 }
 0x3c5   :  { %4854 = vmatmul.mubr.msk.f32.gmra.mrb[42].mxu1 %vm2344_vm5, %v7735_v6  ;;  %v3356_v6 = vld [vmem:[%s9042_s6] sm:$0x3] }
 0x3c6   :  { %3271 = vmatprep.mubr.f32.mxu1 %v9069_v53 }
 0x3c9   :  { %4855 = vmatmul.mubr.msk.f32.gmra.mrb[44].mxu1 %vm2344_vm5, %v7744_v18  ;;  %v9075_v18 = vld [vmem:[#allocation6_spill] sm:$0xff] }
 0x3ca   :  { %3277 = vmatprep.mubr.f32.mxu1 %v9069_v53  ;;  %v8067_v35 = vrot.slane %v3356_v6, %v9075_v18 }
 0x3cd   :  { %4856 = vmatmul.mubr.msk.f32.gmra.mrb[46].mxu1 %vm2344_vm5, %v7752_v54  ;;  %v8061_v54 = vrot.slane %v3320_v5, %v9075_v18 }
 0x3ce   :  { %3283 = vmatprep.mubr.f32.mxu1 %v9069_v53 }
 0x3d1   :  { %4857 = vmatmul.mubr.msk.f32.gmra.mrb[48].mxu1 %vm2344_vm5, %v7763_v50  ;;  %v9076_v50 = vld [vmem:[#allocation7_spill] sm:$0xff] }
 0x3d2   :  { %3289 = vmatprep.mubr.f32.mxu1 %v9069_v53  ;;  %v8064_v58 = vrot.slane %v3320_v5, %v9076_v50  ;;  %v8071_v57 = vrot.slane %v3356_v6, %v9076_v50 }
 0x3d5   :  { %4858 = vmatmul.mubr.msk.f32.gmra.mrb[50].mxu1 %vm2344_vm5, %v2206_v16  ;;  %v5667_v16 = vpack.c.bf16 %v3426_v7, %v3424_v8 }
 0x47c   :  { %v8050_v2 = vpop.f32.mrb[28].mxu1 }
 0x47d   :  { %v8055_v37 = vpop.f32.mrb[29].mxu1 }
 0x480   :  { %v3231_v40 = vpop.f32.mrb[30].mxu1 }
 0x481   :  { %v3334_v4 = vmul.f32 %v8061_v54, %v3231_v40  ;;  %v3233_v25 = vpop.f32.mrb[31].mxu1 }
 0x482   :  { %v3335_v24 = vmul.f32 %v8064_v58, %v3233_v25  ;;  %v5671_v25 = vpack.c.bf16 %v3430_v51, %v3428_v34  ;;  %v3447_v34 = vld [vmem:[%s9043_s7 + $0xf8] sm:$0xff] }
 0x483   :  { %v8075_v44 = vadd.f32 %v8067_v35, %v3334_v4 }
 0x484   :  { %v8084_v1 = vadd.f32 %v8071_v57, %v3335_v24  ;;  %v3237_v15 = vpop.f32.mrb[32].mxu1 }
 0x485   :  { %v3336_v3 = vmul.f32 %v8061_v54, %v3237_v15  ;;  %v3239_v59 = vpop.f32.mrb[33].mxu1  ;;  %v3394_v22 = vmax.f32 %v8075_v44, 0.0  ;;  %v3432_v15 = vld [vmem:[%s9043_s7 + $0x80] sm:$0xff]  ;;  %v4944_v44 = vld [vmem:[%s9043_s7 + $0x388] sm:$0xff] }
 0x486   :  { %v3395_v9 = vmax.f32 %v8084_v1, 0.0  ;;  %v3337_v47 = vmul.f32 %v8064_v58, %v3239_v59  ;;  %v3437_v59 = vld [vmem:[%s9043_s7 + $0xa8] sm:$0xff]  ;;  %v5675_v39 = vpack.c.bf16 %v3434_v23, %v3432_v15  ;;  %v4942_v1 = vld [vmem:[%s9043_s7 + $0x378] sm:$0xff] }
 0x487   :  { %v3372_v12 = vadd.f32 %v8067_v35, %v3336_v3  ;;  %v3449_v23 = vld [vmem:[%s9043_s7 + $0x108] sm:$0xff] }
 0x488   :  { %v3373_v36 = vadd.f32 %v8071_v57, %v3337_v47  ;;  %v3243_v17 = vpop.f32.mrb[34].mxu1  ;;  %4907 = vmatprep.mubr.msk.f32.mxu0 %vm3513_vm6, %v3395_v9  ;;  %v3439_v47 = vld [vmem:[%s9043_s7 + $0xb8] sm:$0xff] }
 0x489   :  { %v3338_v21 = vmul.f32 %v8061_v54, %v3243_v17  ;;  %v3245_v26 = vpop.f32.mrb[35].mxu1  ;;  %3609 = vmatmul.mubr.f32.vlgmr.msra.gmra.mrb[62].mxu0 %v3394_v22  ;;  %v8119_v10 = vmax.f32 %v3372_v12, 0.0  ;;  %v5677_v19 = vpack.c.bf16 %v3439_v47, %v3437_v59 }
 0x48a   :  { %v8116_v62 = vmax.f32 %v3373_v36, 0.0  ;;  %v3339_v31 = vmul.f32 %v8064_v58, %v3245_v26  ;;  %5660 = vmatpush1.bf16.msra.mxu0 %v5659_v11 }
 0x48b   :  { %v3374_v42 = vadd.f32 %v8067_v35, %v3338_v21  ;;  %5662 = vmatprep.subr.bf16.mxu0 %v5661_v60  ;;  %v3438_v21 = vld [vmem:[%s9043_s7 + $0xb0] sm:$0xff] }
 0x48c   :  { %v3375_v46 = vadd.f32 %v8071_v57, %v3339_v31  ;;  %v3249_v43 = vpop.f32.mrb[36].mxu1  ;;  %4908 = vmatprep.mubr.msk.f32.mxu0 %vm3513_vm6, %v8116_v62 }
 0x48d   :  { %v3340_v61 = vmul.f32 %v8061_v54, %v3249_v43  ;;  %v3251_v52 = vpop.f32.mrb[37].mxu1  ;;  %3615 = vmatmul.mubr.f32.gmra.mrb[64].mxu0 %v8119_v10  ;;  %v8142_v38 = vmax.f32 %v3374_v42, 0.0  ;;  %v3443_v42 = vld [vmem:[%s9043_s7 + $0xd8] sm:$0xff]  ;;  %v5679_v43 = vpack.c.bf16 %v3438_v21, %v3436_v49  ;;  %v3450_v49 = vld [vmem:[%s9043_s7 + $0x110] sm:$0xff]  ;;  %v3333_v21 = vmul.f32 %v8064_v58, %v8055_v37 }
 0x48e   :  { %v8139_v29 = vmax.f32 %v3375_v46, 0.0  ;;  %v3341_v27 = vmul.f32 %v8064_v58, %v3251_v52  ;;  %5664 = vmatpush1.bf16.msra.mxu0 %v5663_v30  ;;  %v3441_v30 = vld [vmem:[%s9043_s7 + $0xc8] sm:$0xff]  ;;  %v3440_v52 = vld [vmem:[%s9043_s7 + $0xc0] sm:$0xff] }
 0x48f   :  { %v3376_v0 = vadd.f32 %v8067_v35, %v3340_v61  ;;  %5666 = vmatprep.subr.bf16.mxu0 %v5665_v41  ;;  %v5681_v61 = vpack.c.bf16 %v3443_v42, %v3441_v30  ;;  %v3453_v30 = vld [vmem:[%s9043_s7 + $0x128] sm:$0xff]  ;;  %v3455_v42 = vld [vmem:[%s9043_s7 + $0x138] sm:$0xff] }
 0x490   :  { %v3377_v28 = vadd.f32 %v8071_v57, %v3341_v27  ;;  %v3255_v55 = vpop.f32.mrb[38].mxu1  ;;  %4909 = vmatprep.mubr.msk.f32.mxu0 %vm3513_vm6, %v8139_v29  ;;  %v3442_v27 = vld [vmem:[%s9043_s7 + $0xd0] sm:$0xff] }
 0x491   :  { %v3342_v5 = vmul.f32 %v8061_v54, %v3255_v55  ;;  %v3257_v6 = vpop.f32.mrb[39].mxu1  ;;  %3621 = vmatmul.mubr.f32.gmra.mrb[66].mxu0 %v8142_v38  ;;  %v8165_v24 = vmax.f32 %v3376_v0, 0.0  ;;  %v5683_v20 = vpack.c.bf16 %v3442_v27, %v3440_v52  ;;  %v5693_v52 = vpack.c.bf16 %v3455_v42, %v3453_v30  ;;  %v3452_v27 = vld [vmem:[%s9043_s7 + $0x120] sm:$0xff]  ;;  %v4929_v30 = vld [vmem:[%s9043_s7 + $0x310] sm:$0xff]  ;;  %v4932_v42 = vld [vmem:[%s9043_s7 + $0x328] sm:$0xff] }
 0x492   :  { %v8162_v40 = vmax.f32 %v3377_v28, 0.0  ;;  %v3343_v4 = vmul.f32 %v8064_v58, %v3257_v6  ;;  %5668 = vmatpush1.bf16.msra.mxu0 %v5667_v16 }
 0x493   :  { %v3378_v45 = vadd.f32 %v8067_v35, %v3342_v5  ;;  %5670 = vmatprep.subr.bf16.mxu0 %v5669_v56  ;;  %v3445_v56 = vld [vmem:[%s9043_s7 + $0xe8] sm:$0xff] }
 0x494   :  { %v3379_v48 = vadd.f32 %v8071_v57, %v3343_v4  ;;  %v3261_v3 = vpop.f32.mrb[40].mxu1  ;;  %4910 = vmatprep.mubr.msk.f32.mxu0 %vm3513_vm6, %v8162_v40  ;;  %v5685_v4 = vpack.c.bf16 %v3447_v34, %v3445_v56 }
 0x495   :  { %v3344_v11 = vmul.f32 %v8061_v54, %v3261_v3  ;;  %v3263_v12 = vpop.f32.mrb[41].mxu1  ;;  %3627 = vmatmul.mubr.f32.gmra.mrb[68].mxu0 %v8165_v24  ;;  %v8188_v36 = vmax.f32 %v3378_v45, 0.0  ;;  %v3446_v45 = vld [vmem:[%s9043_s7 + $0xf0] sm:$0xff] }
 0x496   :  { %v8185_v60 = vmax.f32 %v3379_v48, 0.0  ;;  %v3345_v63 = vmul.f32 %v8064_v58, %v3263_v12  ;;  %5672 = vmatpush1.bf16.msra.mxu0 %v5671_v25  ;;  %v3444_v25 = vld [vmem:[%s9043_s7 + $0xe0] sm:$0xff]  ;;  %v3451_v48 = vld [vmem:[%s9043_s7 + $0x118] sm:$0xff] }
 0x497   :  { %v3380_v17 = vadd.f32 %v8067_v35, %v3344_v11  ;;  %5674 = vmatprep.subr.bf16.mxu0 %v5673_v13  ;;  %v5687_v12 = vpack.c.bf16 %v3446_v45, %v3444_v25 }
 0x498   :  { %v3381_v26 = vadd.f32 %v8071_v57, %v3345_v63  ;;  %v3267_v31 = vpop.f32.mrb[42].mxu1  ;;  %4911 = vmatprep.mubr.msk.f32.mxu0 %vm3513_vm6, %v8185_v60 }
 0x499   :  { %v3346_v41 = vmul.f32 %v8061_v54, %v3267_v31  ;;  %v3269_v8 = vpop.f32.mrb[43].mxu1  ;;  %3633 = vmatmul.mubr.f32.gmra.mrb[70].mxu0 %v8188_v36  ;;  %v8211_v32 = vmax.f32 %v3380_v17, 0.0  ;;  %v5689_v17 = vpack.c.bf16 %v3451_v48, %v3449_v23  ;;  %v3456_v23 = vld [vmem:[%s9043_s7 + $0x140] sm:$0xff]  ;;  %v3458_v48 = vld [vmem:[%s9043_s7 + $0x150] sm:$0xff] }
 0x49a   :  { %v8208_v7 = vmax.f32 %v3381_v26, 0.0  ;;  %v3347_v46 = vmul.f32 %v8064_v58, %v3269_v8  ;;  %5676 = vmatpush1.bf16.msra.mxu0 %v5675_v39 }
 0x49b   :  { %v3382_v14 = vadd.f32 %v8067_v35, %v3346_v41  ;;  %5678 = vmatprep.subr.bf16.mxu0 %v5677_v19  ;;  %v3448_v19 = vld [vmem:[%s9043_s7 + $0x100] sm:$0xff] }
 0x49c   :  { %v3383_v16 = vadd.f32 %v8071_v57, %v3347_v46  ;;  %v3273_v0 = vpop.f32.mrb[44].mxu1  ;;  %4912 = vmatprep.mubr.msk.f32.mxu0 %vm3513_vm6, %v8208_v7 }
 0x49d   :  { %v3348_v51 = vmul.f32 %v8061_v54, %v3273_v0  ;;  %v3275_v28 = vpop.f32.mrb[45].mxu1  ;;  %3639 = vmatmul.mubr.f32.gmra.mrb[72].mxu0 %v8211_v32  ;;  %v8234_v5 = vmax.f32 %v3382_v14, 0.0  ;;  %v3369_v0 = vadd.f32 %v8071_v57, %v3333_v21  ;;  %v4930_v21 = vld [vmem:[%s9043_s7 + $0x318] sm:$0xff] }
 0x49e   :  { %v8231_v55 = vmax.f32 %v3383_v16, 0.0  ;;  %v3349_v33 = vmul.f32 %v8064_v58, %v3275_v28  ;;  %5680 = vmatpush1.bf16.msra.mxu0 %v5679_v43  ;;  %v5691_v43 = vpack.c.bf16 %v3450_v49, %v3448_v19  ;;  %v3454_v16 = vld [vmem:[%s9043_s7 + $0x130] sm:$0xff]  ;;  %v3459_v28 = vld [vmem:[%s9043_s7 + $0x158] sm:$0xff]  ;;  %v4928_v49 = vld [vmem:[%s9043_s7 + $0x308] sm:$0xff] }
 0x49f   :  { %v3384_v6 = vadd.f32 %v8067_v35, %v3348_v51  ;;  %5682 = vmatprep.subr.bf16.mxu0 %v5681_v61  ;;  %v3457_v51 = vld [vmem:[%s9043_s7 + $0x148] sm:$0xff]  ;;  %v5695_v25 = vpack.c.bf16 %v3454_v16, %v3452_v27  ;;  %v3462_v19 = vld [vmem:[%s9043_s7 + $0x170] sm:$0xff]  ;;  %v4938_v16 = vld [vmem:[%s9043_s7 + $0x358] sm:$0xff] }
 0x4a0   :  { %v3385_v13 = vadd.f32 %v8071_v57, %v3349_v33  ;;  %v3279_v15 = vpop.f32.mrb[46].mxu1  ;;  %4913 = vmatprep.mubr.msk.f32.mxu0 %vm3513_vm6, %v8231_v55  ;;  %v4936_v27 = vld [vmem:[%s9043_s7 + $0x348] sm:$0xff] }
 0x4a1   :  { %v3350_v3 = vmul.f32 %v8061_v54, %v3279_v15  ;;  %v3281_v59 = vpop.f32.mrb[47].mxu1  ;;  %3645 = vmatmul.mubr.f32.gmra.mrb[74].mxu0 %v8234_v5  ;;  %v8257_v63 = vmax.f32 %v3384_v6, 0.0  ;;  %v5697_v15 = vpack.c.bf16 %v3459_v28, %v3457_v51  ;;  %v4935_v51 = vld [vmem:[%s9043_s7 + $0x340] sm:$0xff]  ;;  %v4937_v28 = vld [vmem:[%s9043_s7 + $0x350] sm:$0xff] }
 0x4a2   :  { %v8254_v47 = vmax.f32 %v3385_v13, 0.0  ;;  %v3351_v11 = vmul.f32 %v8064_v58, %v3281_v59  ;;  %5684 = vmatpush1.bf16.msra.mxu0 %v5683_v20  ;;  %v3461_v59 = vld [vmem:[%s9043_s7 + $0x168] sm:$0xff] }
 0x4a3   :  { %v3386_v39 = vadd.f32 %v8067_v35, %v3350_v3  ;;  %5686 = vmatprep.subr.bf16.mxu0 %v5685_v4  ;;  %v3393_v3 = vmax.f32 %v3369_v0, 0.0 }
 0x4a4   :  { %v3387_v26 = vadd.f32 %v8071_v57, %v3351_v11  ;;  %v3285_v31 = vpop.f32.mrb[48].mxu1  ;;  %4914 = vmatprep.mubr.msk.f32.mxu0 %vm3513_vm6, %v8254_v47  ;;  %v3463_v11 = vld [vmem:[%s9043_s7 + $0x178] sm:$0xff] }
 0x4a5   :  { %v3352_v41 = vmul.f32 %v8061_v54, %v3285_v31  ;;  %v3287_v8 = vpop.f32.mrb[49].mxu1  ;;  %3651 = vmatmul.mubr.f32.gmra.mrb[76].mxu0 %v8257_v63  ;;  %v8282_v14 = vmax.f32 %v3386_v39, 0.0  ;;  %v5701_v39 = vpack.c.bf16 %v3463_v11, %v3461_v59  ;;  %v4927_v31 = vld [vmem:[%s9043_s7 + $0x300] sm:$0xff]  ;;  %v4948_v59 = vld [vmem:[%s9043_s7 + $0x3a8] sm:$0xff]  ;;  %v4950_v11 = vld [vmem:[%s9043_s7 + $0x3b8] sm:$0xff] }
 0x4a6   :  { %v8279_v37 = vmax.f32 %v3387_v26, 0.0  ;;  %v3353_v46 = vmul.f32 %v8064_v58, %v3287_v8  ;;  %5688 = vmatpush1.bf16.msra.mxu0 %v5687_v12  ;;  %v3332_v12 = vmul.f32 %v8061_v54, %v8050_v2  ;;  %v5705_v26 = vpack.c.bf16 %v4930_v21, %v4928_v49  ;;  %v4954_v49 = vld [vmem:[%s9043_s7 + $0x3d8] sm:$0xff] }
 0x4a7   :  { %v8285_v61 = vadd.f32 %v8067_v35, %v3352_v41  ;;  %5690 = vmatprep.subr.bf16.mxu0 %v5689_v17  ;;  %v3460_v17 = vld [vmem:[%s9043_s7 + $0x160] sm:$0xff]  ;;  %v4934_v41 = vld [vmem:[%s9043_s7 + $0x338] sm:$0xff] }
 0x4a8   :  { %v8295_v56 = vadd.f32 %v8071_v57, %v3353_v46  ;;  %v3291_v34 = vpop.f32.mrb[50].mxu1  ;;  %4915 = vmatprep.mubr.msk.f32.mxu0 %vm3513_vm6, %v8279_v37  ;;  %v5703_v2 = vpack.c.bf16 %v3462_v19, %v3460_v17  ;;  %v5709_v46 = vpack.c.bf16 %v4934_v41, %v4932_v42  ;;  %v4949_v17 = vld [vmem:[%s9043_s7 + $0x3b0] sm:$0xff]  ;;  %v4952_v19 = vld [vmem:[%s9043_s7 + $0x3c8] sm:$0xff] }
 0x4a9   :  { %v3354_v33 = vmul.f32 %v8061_v54, %v3291_v34  ;;  %v3293_v20 = vpop.f32.mrb[51].mxu1  ;;  %3657 = vmatmul.mubr.f32.gmra.mrb[78].mxu0 %v8282_v14  ;;  %v3412_v45 = vmax.f32 %v8285_v61, 0.0  ;;  %v3368_v54 = vadd.f32 %v8067_v35, %v3332_v12  ;;  %v5713_v34 = vpack.c.bf16 %v4938_v16, %v4936_v27  ;;  %v4959_v16 = vld [vmem:[%s9043_s7 + $0x400] sm:$0xff] }
 0x4aa   :  { %v3413_v6 = vmax.f32 %v8295_v56, 0.0  ;;  %v3355_v4 = vmul.f32 %v8064_v58, %v3293_v20  ;;  %5692 = vmatpush1.bf16.msra.mxu0 %v5691_v43  ;;  %v4931_v43 = vld [vmem:[%s9043_s7 + $0x320] sm:$0xff]  ;;  %v5725_v12 = vpack.c.bf16 %v4950_v11, %v4948_v59 }
 0x4ab   :  { %v8311_v13 = vadd.f32 %v8067_v35, %v3354_v33  ;;  %5694 = vmatprep.subr.bf16.mxu0 %v5693_v52  ;;  %v5707_v35 = vpack.c.bf16 %v4929_v30, %v4927_v31  ;;  %v3392_v8 = vmax.f32 %v3368_v54, 0.0  ;;  %v4933_v52 = vld [vmem:[%s9043_s7 + $0x330] sm:$0xff]  ;;  %v4940_v33 = vld [vmem:[%s9043_s7 + $0x368] sm:$0xff]  ;;  %v4951_v54 = vld [vmem:[%s9043_s7 + $0x3c0] sm:$0xff] }
 0x4ac   :  { %v8320_v58 = vadd.f32 %v8071_v57, %v3355_v4  ;;  %4916 = vmatprep.mubr.msk.f32.mxu0 %vm3513_vm6, %v3413_v6  ;;  %v5699_v57 = vpack.c.bf16 %v3458_v48, %v3456_v23  ;;  %v5711_v0 = vpack.c.bf16 %v4933_v52, %v4931_v43  ;;  %v5717_v20 = vpack.c.bf16 %v4942_v1, %v4940_v33  ;;  %v4939_v4 = vld [vmem:[%s9043_s7 + $0x360] sm:$0xff]  ;;  %v4956_v31 = vld [vmem:[%s9043_s7 + $0x3e8] sm:$0xff]  ;;  %v4958_v30 = vld [vmem:[%s9043_s7 + $0x3f8] sm:$0xff] }
 0x4ad   :  { %3663 = vmatmul.mubr.f32.gmra.mrb[80].mxu0 %v3412_v45  ;;  %v4943_v48 = vld [vmem:[%s9043_s7 + $0x380] sm:$0xff]  ;;  %v5733_v41 = vpack.c.bf16 %v4958_v30, %v4956_v31  ;;  %v4962_v43 = vld [vmem:[%s9043_s7 + $0x418] sm:$0xff] }
 0x4ae   :  { %5696 = vmatpush1.bf16.msra.mxu0 %v5695_v25  ;;  %4917 = vmatprep.mubr.msk.f32.mxu0 %vm3513_vm6, %v3393_v3  ;;  %v4941_v25 = vld [vmem:[%s9043_s7 + $0x370] sm:$0xff]  ;;  %v4963_v1 = vld [vmem:[%s9043_s7 + $0x420] sm:$0xff] }
 0x4af   :  { %5698 = vmatprep.subr.bf16.mxu0 %v5697_v15  ;;  %v5719_v15 = vpack.c.bf16 %v4941_v25, %v4939_v4  ;;  %v4945_v3 = vld [vmem:[%s9043_s7 + $0x390] sm:$0xff]  ;;  %v4970_v4 = vld [vmem:[%s9043_s7 + $0x458] sm:$0xff]  ;;  %v4971_v11 = vld [vmem:[%s9043_s7 + $0x460] sm:$0xff] }
 0x4b2   :  { %5700 = vmatpush1.bf16.msra.mxu0 %v5699_v57  ;;  %v5723_v57 = vpack.c.bf16 %v4945_v3, %v4943_v48  ;;  %v4974_v48 = vld [vmem:[%s9043_s7 + $0x478] sm:$0xff] }
 0x4b3   :  { %5702 = vmatprep.subr.bf16.mxu0 %v5701_v39  ;;  %v4947_v39 = vld [vmem:[%s9043_s7 + $0x3a0] sm:$0xff] }
 0x4b4   :  { %v5727_v21 = vpack.c.bf16 %v4949_v17, %v4947_v39 }
 0x4b6   :  { %5704 = vmatpush1.bf16.msra.mxu0 %v5703_v2  ;;  %v5729_v2 = vpack.c.bf16 %v4954_v49, %v4952_v19 }
 0x4b7   :  { %5706 = vmatprep.subr.bf16.mxu0 %v5705_v26  ;;  %v4953_v26 = vld [vmem:[%s9043_s7 + $0x3d0] sm:$0xff] }
 0x4b8   :  { %v5731_v42 = vpack.c.bf16 %v4953_v26, %v4951_v54 }
 0x4b9   :  { %3737 = vmatmul.mubr.f32.vlgmr.msra.gmra.mrb[62].mxu0 %v3392_v8  ;;  %v4957_v8 = vld [vmem:[%s9043_s7 + $0x3f0] sm:$0xff] }
 0x4ba   :  { %4918 = vmatprep.mubr.msk.f32.mxu0 %vm3513_vm6, %v3395_v9  ;;  %5708 = vmatpush1.bf16.msra.mxu0 %v5707_v35  ;;  %v5715_v9 = vpack.c.bf16 %v4937_v28, %v4935_v51  ;;  %v4955_v35 = vld [vmem:[%s9043_s7 + $0x3e0] sm:$0xff]  ;;  %v4966_v51 = vld [vmem:[%s9043_s7 + $0x438] sm:$0xff] }
 0x4bb   :  { %5710 = vmatprep.subr.bf16.mxu0 %v5709_v46  ;;  %v4960_v46 = vld [vmem:[%s9043_s7 + $0x408] sm:$0xff]  ;;  %v5735_v52 = vpack.c.bf16 %v4957_v8, %v4955_v35 }
 0x4bc   :  { %v5737_v27 = vpack.c.bf16 %v4962_v43, %v4960_v46 }
 0x4bd   :  { %3743 = vmatmul.mubr.f32.gmra.mrb[64].mxu0 %v3394_v22  ;;  %v4946_v22 = vld [vmem:[%s9043_s7 + $0x398] sm:$0xff] }
 0x4be   :  { %4919 = vmatprep.mubr.msk.f32.mxu0 %vm3513_vm6, %v8116_v62  ;;  %5712 = vmatpush1.bf16.msra.mxu0 %v5711_v0  ;;  %v5721_v23 = vpack.c.bf16 %v4946_v22, %v4944_v44  ;;  %v4961_v0 = vld [vmem:[%s9043_s7 + $0x410] sm:$0xff]  ;;  %v4967_v22 = vld [vmem:[%s9043_s7 + $0x440] sm:$0xff] }
 0x4bf   :  { %5714 = vmatprep.subr.bf16.mxu0 %v5713_v34  ;;  %v4964_v34 = vld [vmem:[%s9043_s7 + $0x428] sm:$0xff]  ;;  %v5739_v28 = vpack.c.bf16 %v4961_v0, %v4959_v16 }
 0x4c0   :  { %v5741_v33 = vpack.c.bf16 %v4966_v51, %v4964_v34 }
 0x4c1   :  { %3749 = vmatmul.mubr.f32.gmra.mrb[66].mxu0 %v8119_v10 }
 0x4c2   :  { %4920 = vmatprep.mubr.msk.f32.mxu0 %vm3513_vm6, %v8139_v29  ;;  %5716 = vmatpush1.bf16.msra.mxu0 %v5715_v9  ;;  %v4965_v9 = vld [vmem:[%s9043_s7 + $0x430] sm:$0xff] }
 0x4c3   :  { %5718 = vmatprep.subr.bf16.mxu0 %v5717_v20  ;;  %v4968_v20 = vld [vmem:[%s9043_s7 + $0x448] sm:$0xff]  ;;  %v5743_v25 = vpack.c.bf16 %v4965_v9, %v4963_v1 }
 0x4c4   :  { %v5745_v44 = vpack.c.bf16 %v4970_v4, %v4968_v20 }
 0x4c5   :  { %3755 = vmatmul.mubr.f32.gmra.mrb[68].mxu0 %v8142_v38 }
 0x4c6   :  { %4921 = vmatprep.mubr.msk.f32.mxu0 %vm3513_vm6, %v8162_v40  ;;  %5720 = vmatpush1.bf16.msra.mxu0 %v5719_v15  ;;  %v4969_v15 = vld [vmem:[%s9043_s7 + $0x450] sm:$0xff] }
 0x4c7   :  { %5722 = vmatprep.subr.bf16.mxu0 %v5721_v23  ;;  %v4972_v23 = vld [vmem:[%s9043_s7 + $0x468] sm:$0xff]  ;;  %v5747_v3 = vpack.c.bf16 %v4969_v15, %v4967_v22 }
 0x4c8   :  { %v5749_v59 = vpack.c.bf16 %v4974_v48, %v4972_v23 }
 0x4c9   :  { %3761 = vmatmul.mubr.f32.gmra.mrb[70].mxu0 %v8165_v24 }
 0x4ca   :  { %4922 = vmatprep.mubr.msk.f32.mxu0 %vm3513_vm6, %v8185_v60  ;;  %5724 = vmatpush1.bf16.msra.mxu0 %v5723_v57  ;;  %v4973_v57 = vld [vmem:[%s9043_s7 + $0x470] sm:$0xff]  ;;  %s6360_s7 = smov 28  }
 0x4cb   :  { %5726 = vmatprep.subr.bf16.mxu0 %v5725_v12  ;;  %v5751_v12 = vpack.c.bf16 %v4973_v57, %v4971_v11 }
 0x4cd   :  { %3767 = vmatmul.mubr.f32.gmra.mrb[72].mxu0 %v8188_v36 }
 0x4ce   :  { %4923 = vmatprep.mubr.msk.f32.mxu0 %vm3513_vm6, %v8208_v7  ;;  %5728 = vmatpush1.bf16.msra.mxu0 %v5727_v21 }
 0x4cf   :  { %5730 = vmatprep.subr.bf16.mxu0 %v5729_v2 }
 0x4d1   :  { %3773 = vmatmul.mubr.f32.gmra.mrb[74].mxu0 %v8211_v32 }
 0x4d2   :  { %4924 = vmatprep.mubr.msk.f32.mxu0 %vm3513_vm6, %v8231_v55  ;;  %5732 = vmatpush1.bf16.msra.mxu0 %v5731_v42 }
 0x4d3   :  { %5734 = vmatprep.subr.bf16.mxu0 %v5733_v41 }
 0x4d5   :  { %3779 = vmatmul.mubr.f32.gmra.mrb[76].mxu0 %v8234_v5 }
 0x4d6   :  { %4925 = vmatprep.mubr.msk.f32.mxu0 %vm3513_vm6, %v8254_v47  ;;  %5736 = vmatpush1.bf16.msra.mxu0 %v5735_v52 }
 0x4d7   :  { %5738 = vmatprep.subr.bf16.mxu0 %v5737_v27 }
 0x4d9   :  { %3785 = vmatmul.mubr.f32.gmra.mrb[78].mxu0 %v8257_v63 }
 0x4da   :  { %4926 = vmatprep.mubr.msk.f32.mxu0 %vm3513_vm6, %v8279_v37  ;;  %5740 = vmatpush1.bf16.msra.mxu0 %v5739_v28 }
 0x4db   :  { %5742 = vmatprep.subr.bf16.mxu0 %v5741_v33 }
 0x4dd   :  { %3791 = vmatmul.mubr.f32.gmra.mrb[80].mxu0 %v8282_v14 }
 0x4de   :  { %5744 = vmatpush1.bf16.msra.mxu0 %v5743_v25  ;;  %4975 = vmatprep.mubr.msk.f32.mxu0 %vm3513_vm6, %v8116_v62  ;;  %v3415_v62 = vmax.f32 %v8320_v58, 0.0 }
 0x4df   :  { %5746 = vmatprep.subr.bf16.mxu0 %v5745_v44 }
 0x4e2   :  { %5748 = vmatpush1.bf16.msra.mxu0 %v5747_v3 }
 0x4e3   :  { %5750 = vmatprep.subr.bf16.mxu0 %v5749_v59 }
 0x4e6   :  { %5752 = vmatpush1.bf16.msra.mxu0 %v5751_v12 }
 0x4e9   :  { %3914 = vmatmul.mubr.f32.vlgmr.msra.gmra.mrb[62].mxu0 %v8119_v10  ;;  %v3414_v10 = vmax.f32 %v8311_v13, 0.0 }
 0x4ea   :  { %4976 = vmatprep.mubr.msk.f32.mxu0 %vm3513_vm6, %v8139_v29  ;;  %v3994_v29 = vld [vmem:[%s9044_s8] sm:$0x3]  ;;  %s6356_s8 = smov 108  }
 0x4ed   :  { %3920 = vmatmul.mubr.f32.gmra.mrb[64].mxu0 %v8142_v38  ;;  %v8552_v38 = vrot.slane %v3994_v29, %v9075_v18 }
 0x4ee   :  { %4977 = vmatprep.mubr.msk.f32.mxu0 %vm3513_vm6, %v8162_v40  ;;  %v4026_v40 = vld [vmem:[%s9045_s9] sm:$0x3] }
 0x4f1   :  { %3926 = vmatmul.mubr.f32.gmra.mrb[66].mxu0 %v8165_v24  ;;  %v8558_v24 = vrot.slane %v3994_v29, %v9076_v50 }
 0x4f2   :  { %4978 = vmatprep.mubr.msk.f32.mxu0 %vm3513_vm6, %v8185_v60 }
 0x4f5   :  { %3932 = vmatmul.mubr.f32.gmra.mrb[68].mxu0 %v8188_v36 }
 0x4f6   :  { %4979 = vmatprep.mubr.msk.f32.mxu0 %vm3513_vm6, %v8208_v7  ;;  %v8562_v7 = vrot.slane %v4026_v40, %v9075_v18 }
 0x4f9   :  { %3938 = vmatmul.mubr.f32.gmra.mrb[70].mxu0 %v8211_v32 }
 0x4fa   :  { %4980 = vmatprep.mubr.msk.f32.mxu0 %vm3513_vm6, %v8231_v55 }
 0x4fd   :  { %3944 = vmatmul.mubr.f32.gmra.mrb[72].mxu0 %v8234_v5  ;;  %v8566_v5 = vrot.slane %v4026_v40, %v9076_v50 }
 0x4fe   :  { %4981 = vmatprep.mubr.msk.f32.mxu0 %vm3513_vm6, %v8254_v47 }
 0x501   :  { %3950 = vmatmul.mubr.f32.gmra.mrb[74].mxu0 %v8257_v63 }
 0x502   :  { %4982 = vmatprep.mubr.msk.f32.mxu0 %vm3513_vm6, %v8279_v37 }
 0x505   :  { %3956 = vmatmul.mubr.f32.gmra.mrb[76].mxu0 %v8282_v14 }
 0x506   :  { %4983 = vmatprep.mubr.msk.f32.mxu0 %vm3513_vm6, %v3413_v6 }
 0x509   :  { %3962 = vmatmul.mubr.f32.gmra.mrb[78].mxu0 %v3412_v45 }
 0x50a   :  { %4984 = vmatprep.mubr.msk.f32.mxu0 %vm3513_vm6, %v3415_v62 }
 0x50d   :  { %3968 = vmatmul.mubr.f32.gmra.mrb[80].mxu0 %v3414_v10 }
 0x5bc   :  { %v3915_v60 = vpop.f32.mrb[62].mxu0 }
 0x5bd   :  { %v4006_v36 = vmul.f32 %v8552_v38, %v3915_v60  ;;  %v3917_v32 = vpop.f32.mrb[63].mxu0 }
 0x5be   :  { %v4007_v55 = vmul.f32 %v8558_v24, %v3917_v32 }
 0x5bf   :  { %v4038_v63 = vadd.f32 %v8562_v7, %v4006_v36 }
 0x5c0   :  { %v3921_v47 = vpop.f32.mrb[64].mxu0  ;;  %v4039_v61 = vadd.f32 %v8566_v5, %v4007_v55 }
 0x5c1   :  { %v4008_v37 = vmul.f32 %v8552_v38, %v3921_v47  ;;  %v3923_v14 = vpop.f32.mrb[65].mxu0  ;;  %v4058_v13 = vmax.f32 %v4038_v63, 0.0 }
 0x5c2   :  { %v4009_v56 = vmul.f32 %v8558_v24, %v3923_v14  ;;  %v4059_v17 = vmax.f32 %v4039_v61, 0.0 }
 0x5c3   :  { %v4040_v6 = vadd.f32 %v8562_v7, %v4008_v37 }
 0x5c4   :  { %v4041_v18 = vadd.f32 %v8566_v5, %v4009_v56  ;;  %v3927_v45 = vpop.f32.mrb[66].mxu0 }
 0x5c5   :  { %v4060_v58 = vmax.f32 %v4040_v6, 0.0  ;;  %v4010_v50 = vmul.f32 %v8552_v38, %v3927_v45  ;;  %v3929_v39 = vpop.f32.mrb[67].mxu0 }
 0x5c6   :  { %v4061_v19 = vmax.f32 %v4041_v18, 0.0  ;;  %v4011_v49 = vmul.f32 %v8558_v24, %v3929_v39 }
 0x5c7   :  { %v8576_v21 = vmax.f32 %v4058_v13, %v4060_v58  ;;  %v4042_v26 = vadd.f32 %v8562_v7, %v4010_v50 }
 0x5c8   :  { %v8578_v2 = vmax.f32 %v4059_v17, %v4061_v19  ;;  %v3933_v54 = vpop.f32.mrb[68].mxu0  ;;  %v4043_v42 = vadd.f32 %v8566_v5, %v4011_v49 }
 0x5c9   :  { %v4012_v31 = vmul.f32 %v8552_v38, %v3933_v54  ;;  %v3935_v30 = vpop.f32.mrb[69].mxu0  ;;  %v4062_v43 = vmax.f32 %v4042_v26, 0.0 }
 0x5ca   :  { %v4013_v41 = vmul.f32 %v8558_v24, %v3935_v30  ;;  %v4063_v0 = vmax.f32 %v4043_v42, 0.0 }
 0x5cb   :  { %v4044_v35 = vadd.f32 %v8562_v7, %v4012_v31 }
 0x5cc   :  { %v4045_v8 = vadd.f32 %v8566_v5, %v4013_v41  ;;  %v3939_v46 = vpop.f32.mrb[70].mxu0 }
 0x5cd   :  { %v4064_v52 = vmax.f32 %v4044_v35, 0.0  ;;  %v4014_v27 = vmul.f32 %v8552_v38, %v3939_v46  ;;  %v3941_v16 = vpop.f32.mrb[71].mxu0  ;;  %v4238_v46 = vld [vmem:[%s9046_s10 + $0x188] sm:$0xff] }
 0x5ce   :  { %v4065_v34 = vmax.f32 %v4045_v8, 0.0  ;;  %v4015_v51 = vmul.f32 %v8558_v24, %v3941_v16  ;;  %v4237_v8 = vld [vmem:[%s9046_s10 + $0x180] sm:$0xff] }
 0x5cf   :  { %v8588_v28 = vmax.f32 %v4062_v43, %v4064_v52  ;;  %v4046_v9 = vadd.f32 %v8562_v7, %v4014_v27  ;;  %v4205_v52 = vld [vmem:[%s9046_s10 + $0x80] sm:$0xff]  ;;  %v4206_v27 = vld [vmem:[%s9046_s10 + $0x88] sm:$0xff] }
 0x5d0   :  { %v8590_v33 = vmax.f32 %v4063_v0, %v4065_v34  ;;  %v3945_v1 = vpop.f32.mrb[72].mxu0  ;;  %v4047_v25 = vadd.f32 %v8566_v5, %v4015_v51  ;;  %v5753_v51 = vpack.c.bf16 %v4206_v27, %v4205_v52  ;;  %v4229_v52 = vld [vmem:[%s9046_s10 + $0x140] sm:$0xff]  ;;  %v4230_v27 = vld [vmem:[%s9046_s10 + $0x148] sm:$0xff] }
 0x5d1   :  { %v4016_v20 = vmul.f32 %v8552_v38, %v3945_v1  ;;  %v3947_v4 = vpop.f32.mrb[73].mxu0  ;;  %v4066_v3 = vmax.f32 %v4046_v9, 0.0  ;;  %v4190_v1 = vld [vmem:[%s9046_s10 + $0x8] sm:$0xff]  ;;  %v4239_v9 = vld [vmem:[%s9046_s10 + $0x190] sm:$0xff] }
 0x5d2   :  { %v4017_v44 = vmul.f32 %v8558_v24, %v3947_v4  ;;  %v6287_v22 = vpack.i.bf16 %v8590_v33, %v8588_v28  ;;  %v4067_v12 = vmax.f32 %v4047_v25, 0.0  ;;  %5754 = vmatprep.subr.bf16.mxu0 %v5753_v51  ;;  %v4247_v51 = vld [vmem:[%s9046_s10 + $0x1d0] sm:$0xff] }
 0x5d3   :  { %v4048_v15 = vadd.f32 %v8562_v7, %v4016_v20 }
 0x5d4   :  { %v4049_v23 = vadd.f32 %v8566_v5, %v4017_v44  ;;  %6288 = vrot.lane.b32.xlu0 %v6287_v22, %s6356_s8  ;;  %v3951_v48 = vpop.f32.mrb[74].mxu0  ;;  %v4240_v44 = vld [vmem:[%s9046_s10 + $0x198] sm:$0xff]  ;;  %v4223_v22 = vld [vmem:[%s9046_s10 + $0x110] sm:$0xff] }
 0x5d5   :  { %v4068_v59 = vmax.f32 %v4048_v15, 0.0  ;;  %v4018_v11 = vmul.f32 %v8552_v38, %v3951_v48  ;;  %v3953_v57 = vpop.f32.mrb[75].mxu0  ;;  %v4224_v15 = vld [vmem:[%s9046_s10 + $0x118] sm:$0xff]  ;;  %v5789_v48 = vpack.c.bf16 %v4240_v44, %v4239_v9  ;;  %v4231_v44 = vld [vmem:[%s9046_s10 + $0x150] sm:$0xff] }
 0x5d6   :  { %v4069_v62 = vmax.f32 %v4049_v23, 0.0  ;;  %v4019_v10 = vmul.f32 %v8558_v24, %v3953_v57  ;;  %v4191_v57 = vld [vmem:[%s9046_s10 + $0x10] sm:$0xff]  ;;  %v4248_v9 = vld [vmem:[%s9046_s10 + $0x1d8] sm:$0xff] }
 0x5d7   :  { %v8603_v29 = vmax.f32 %v4066_v3, %v4068_v59  ;;  %v4050_v36 = vadd.f32 %v8562_v7, %v4018_v11  ;;  %v5791_v3 = vpack.c.bf16 %v4224_v15, %v4223_v22  ;;  %v4207_v59 = vld [vmem:[%s9046_s10 + $0x90] sm:$0xff]  ;;  %v4208_v11 = vld [vmem:[%s9046_s10 + $0x98] sm:$0xff] }
 0x5d8   :  { %v8605_v40 = vmax.f32 %v4067_v12, %v4069_v62  ;;  %v3957_v60 = vpop.f32.mrb[76].mxu0  ;;  %v4051_v47 = vadd.f32 %v8566_v5, %v4019_v10  ;;  %v5757_v62 = vpack.c.bf16 %v4208_v11, %v4207_v59  ;;  %v4192_v10 = vld [vmem:[%s9046_s10 + $0x18] sm:$0xff]  ;;  %v4217_v59 = vld [vmem:[%s9046_s10 + $0xe0] sm:$0xff]  ;;  %v4218_v11 = vld [vmem:[%s9046_s10 + $0xe8] sm:$0xff] }
 0x5d9   :  { %v4020_v32 = vmul.f32 %v8552_v38, %v3957_v60  ;;  %v3959_v55 = vpop.f32.mrb[77].mxu0  ;;  %v4070_v6 = vmax.f32 %v4050_v36, 0.0  ;;  %v4241_v60 = vld [vmem:[%s9046_s10 + $0x1a0] sm:$0xff]  ;;  %v4242_v36 = vld [vmem:[%s9046_s10 + $0x1a8] sm:$0xff]  ;;  %v4232_v22 = vld [vmem:[%s9046_s10 + $0x158] sm:$0xff] }
 0x5da   :  { %v4021_v63 = vmul.f32 %v8558_v24, %v3959_v55  ;;  %v6292_v37 = vpack.i.bf16 %v8605_v40, %v8603_v29  ;;  %v4071_v58 = vmax.f32 %v4051_v47, 0.0  ;;  %v5793_v55 = vpack.c.bf16 %v4242_v36, %v4241_v60  ;;  %v4225_v47 = vld [vmem:[%s9046_s10 + $0x120] sm:$0xff]  ;;  %v4202_v36 = vld [vmem:[%s9046_s10 + $0x68] sm:$0xff] }
 0x5db   :  { %v4052_v14 = vadd.f32 %v8562_v7, %v4020_v32  ;;  %v5759_v32 = vpack.c.bf16 %v4192_v10, %v4191_v57  ;;  %v5807_v57 = vpack.c.bf16 %v4232_v22, %v4231_v44  ;;  %v5777_v10 = vpack.c.bf16 %v4218_v11, %v4217_v59  ;;  %v4201_v60 = vld [vmem:[%s9046_s10 + $0x60] sm:$0xff]  ;;  %v4254_v11 = vld [vmem:[%s9046_s10 + $0x208] sm:$0xff] }
 0x5dc   :  { %v4053_v61 = vadd.f32 %v8566_v5, %v4021_v63  ;;  %6293 = vrot.lane.b32.xlu1 %v6292_v37, %s6356_s8  ;;  %v3963_v56 = vpop.f32.mrb[78].mxu0  ;;  %v4226_v63 = vld [vmem:[%s9046_s10 + $0x128] sm:$0xff]  ;;  %v4209_v37 = vld [vmem:[%s9046_s10 + $0xa0] sm:$0xff] }
 0x5dd   :  { %v4072_v18 = vmax.f32 %v4052_v14, 0.0  ;;  %v4022_v45 = vmul.f32 %v8552_v38, %v3963_v56  ;;  %v3965_v13 = vpop.f32.mrb[79].mxu0  ;;  %v4210_v14 = vld [vmem:[%s9046_s10 + $0xa8] sm:$0xff] }
 0x5de   :  { %v4073_v50 = vmax.f32 %v4053_v61, 0.0  ;;  %v4023_v39 = vmul.f32 %v8558_v24, %v3965_v13  ;;  %v4193_v61 = vld [vmem:[%s9046_s10 + $0x20] sm:$0xff]  ;;  %v4194_v56 = vld [vmem:[%s9046_s10 + $0x28] sm:$0xff]  ;;  %v4243_v13 = vld [vmem:[%s9046_s10 + $0x1b0] sm:$0xff] }
 0x5df   :  { %v8618_v17 = vmax.f32 %v4070_v6, %v4072_v18  ;;  %v4054_v54 = vadd.f32 %v8562_v7, %v4022_v45  ;;  %v6302_v6 = vpack.i.bf16 %v8576_v21, %v8578_v2  ;;  %v5795_v18 = vpack.c.bf16 %v4226_v63, %v4225_v47 }
 0x5e0   :  { %v8620_v19 = vmax.f32 %v4071_v58, %v4073_v50  ;;  %v3969_v49 = vpop.f32.mrb[80].mxu0  ;;  %v4055_v30 = vadd.f32 %v8566_v5, %v4023_v39  ;;  %v5761_v45 = vpack.c.bf16 %v4210_v14, %v4209_v37  ;;  %v4244_v58 = vld [vmem:[%s9046_s10 + $0x1b8] sm:$0xff]  ;;  %v4211_v50 = vld [vmem:[%s9046_s10 + $0xb0] sm:$0xff]  ;;  %v5763_v39 = vpack.c.bf16 %v4194_v56, %v4193_v61  ;;  %v4249_v56 = vld [vmem:[%s9046_s10 + $0x1e0] sm:$0xff] }
 0x5e1   :  { %v4024_v26 = vmul.f32 %v8552_v38, %v3969_v49  ;;  %v3971_v31 = vpop.f32.mrb[81].mxu0  ;;  %v4221_v38 = vld [vmem:[%s9046_s10 + $0x100] sm:$0xff]  ;;  %v4074_v16 = vmax.f32 %v4054_v54, 0.0  ;;  %v5797_v49 = vpack.c.bf16 %v4244_v58, %v4243_v13  ;;  %v4212_v54 = vld [vmem:[%s9046_s10 + $0xb8] sm:$0xff]  ;;  %v5779_v47 = vpack.c.bf16 %v4202_v36, %v4201_v60  ;;  %v4203_v37 = vld [vmem:[%s9046_s10 + $0x70] sm:$0xff] }
 0x5e2   :  { %v4025_v42 = vmul.f32 %v8558_v24, %v3971_v31  ;;  %v6297_v41 = vpack.i.bf16 %v8620_v19, %v8618_v17  ;;  %v5785_v24 = vpack.c.bf16 %v4238_v46, %v4237_v8  ;;  %v4075_v20 = vmax.f32 %v4055_v30, 0.0  ;;  %v4228_v31 = vld [vmem:[%s9046_s10 + $0x138] sm:$0xff]  ;;  %v4214_v8 = vld [vmem:[%s9046_s10 + $0xc8] sm:$0xff]  ;;  %v4269_v58 = vld [vmem:[%s9046_s10 + $0x280] sm:$0xff] }
 0x5e3   :  { %v4056_v35 = vadd.f32 %v8562_v7, %v4024_v26  ;;  %v4222_v7 = vld [vmem:[%s9046_s10 + $0x108] sm:$0xff]  ;;  %v4227_v26 = vld [vmem:[%s9046_s10 + $0x130] sm:$0xff]  ;;  %v5765_v30 = vpack.c.bf16 %v4212_v54, %v4211_v50  ;;  %v4204_v14 = vld [vmem:[%s9046_s10 + $0x78] sm:$0xff] }
 0x5e4   :  { %v4057_v43 = vadd.f32 %v8566_v5, %v4025_v42  ;;  %6298 = vrot.lane.b32.xlu0 %v6297_v41, %s6356_s8  ;;  %v5787_v34 = vpack.c.bf16 %v4222_v7, %v4221_v38  ;;  %v4189_v5 = vld [vmem:[%s9046_s10] sm:$0xff]  ;;  %5786 = vmatprep.subr.bf16.mxu1 %v5785_v24  ;;  %v4195_v42 = vld [vmem:[%s9046_s10 + $0x30] sm:$0xff]  ;;  %v4196_v41 = vld [vmem:[%s9046_s10 + $0x38] sm:$0xff]  ;;  %v5799_v46 = vpack.c.bf16 %v4228_v31, %v4227_v26 }
 0x5e5   :  { %v4076_v0 = vmax.f32 %v4056_v35, 0.0  ;;  %v5755_v25 = vpack.c.bf16 %v4190_v1, %v4189_v5  ;;  %v4213_v35 = vld [vmem:[%s9046_s10 + $0xc0] sm:$0xff]  ;;  %v5767_v24 = vpack.c.bf16 %v4196_v41, %v4195_v42  ;;  %v4215_v5 = vld [vmem:[%s9046_s10 + $0xd0] sm:$0xff]  ;;  %v4216_v1 = vld [vmem:[%s9046_s10 + $0xd8] sm:$0xff]  ;;  %v5783_v61 = vpack.c.bf16 %v4204_v14, %v4203_v37 }
 0x5e6   :  { %v4077_v4 = vmax.f32 %v4057_v43, 0.0  ;;  %5788 = vmatpush3.bf16.msra.mxu1 %v5787_v34  ;;  %v4245_v38 = vld [vmem:[%s9046_s10 + $0x1c0] sm:$0xff]  ;;  %v4246_v43 = vld [vmem:[%s9046_s10 + $0x1c8] sm:$0xff]  ;;  %v5773_v15 = vpack.c.bf16 %v4216_v1, %v4215_v5  ;;  %v4251_v26 = vld [vmem:[%s9046_s10 + $0x1f0] sm:$0xff] }
 0x5e7   :  { %v8667_v23 = vmax.f32 %v4074_v16, %v4076_v0  ;;  %5756 = vmatpush3.bf16.msra.mxu0 %v5755_v25  ;;  %5790 = vmatprep.subr.bf16.mxu1 %v5789_v48  ;;  %v5801_v7 = vpack.c.bf16 %v4246_v43, %v4245_v38  ;;  %v5769_v16 = vpack.c.bf16 %v4214_v8, %v4213_v35  ;;  %v4197_v0 = vld [vmem:[%s9046_s10 + $0x40] sm:$0xff]  ;;  %v4198_v34 = vld [vmem:[%s9046_s10 + $0x48] sm:$0xff]  ;;  %v4199_v48 = vld [vmem:[%s9046_s10 + $0x50] sm:$0xff] }
 0x5e8   :  { %v8678_v12 = vmax.f32 %v4075_v20, %v4077_v4  ;;  %5758 = vmatprep.subr.bf16.mxu0 %v5757_v62  ;;  %v5803_v20 = vpack.c.bf16 %v4230_v27, %v4229_v52  ;;  %v5771_v4 = vpack.c.bf16 %v4198_v34, %v4197_v0  ;;  %v5805_v25 = vpack.c.bf16 %v4248_v9, %v4247_v51  ;;  %v4234_v13 = vld [vmem:[%s9046_s10 + $0x168] sm:$0xff]  ;;  %v4252_v31 = vld [vmem:[%s9046_s10 + $0x1f8] sm:$0xff] }
 0x5e9   :  { %4114 = vrot.lane.b32.xlu1 %v8667_v23, %s6356_s8  ;;  %v4270_v50 = vld [vmem:[%s9046_s10 + $0x288] sm:$0xff]  ;;  %v5813_v35 = vpack.c.bf16 %v4252_v31, %v4251_v26  ;;  %v4236_v8 = vld [vmem:[%s9046_s10 + $0x178] sm:$0xff]  ;;  %v6357_v52 = vmov 0.0|0.0  }
 0x5ea   :  { %4116 = vrot.lane.b32.xlu0 %v8678_v12, %s6356_s8  ;;  %5792 = vmatpush3.bf16.msra.mxu1 %v5791_v3  ;;  %v4200_v3 = vld [vmem:[%s9046_s10 + $0x58] sm:$0xff] }
 0x5eb   :  { %5760 = vmatpush3.bf16.msra.mxu0 %v5759_v32  ;;  %5794 = vmatprep.subr.bf16.mxu1 %v5793_v55  ;;  %v5775_v62 = vpack.c.bf16 %v4200_v3, %v4199_v48  ;;  %v4219_v32 = vld [vmem:[%s9046_s10 + $0xf0] sm:$0xff]  ;;  %v4220_v55 = vld [vmem:[%s9046_s10 + $0xf8] sm:$0xff] }
 0x5ec   :  { %5762 = vmatprep.subr.bf16.mxu0 %v5761_v45  ;;  %v5781_v63 = vpack.c.bf16 %v4220_v55, %v4219_v32  ;;  %v4256_v37 = vld [vmem:[%s9046_s10 + $0x218] sm:$0xff] }
 0x5ed   :  { %6303 = vrot.lane.b32.xlu1 %v6302_v6, %s6356_s8  ;;  %v4250_v6 = vld [vmem:[%s9046_s10 + $0x1e8] sm:$0xff] }
 0x5ee   :  { %5796 = vmatpush3.bf16.msra.mxu1 %v5795_v18  ;;  %v4233_v18 = vld [vmem:[%s9046_s10 + $0x160] sm:$0xff]  ;;  %v5809_v45 = vpack.c.bf16 %v4250_v6, %v4249_v56 }
 0x5ef   :  { %5764 = vmatpush3.bf16.msra.mxu0 %v5763_v39  ;;  %5798 = vmatprep.subr.bf16.mxu1 %v5797_v49  ;;  %v5811_v39 = vpack.c.bf16 %v4234_v13, %v4233_v18  ;;  %v5817_v49 = vpack.c.bf16 %v4270_v50, %v4269_v58  ;;  %v4257_v56 = vld [vmem:[%s9046_s10 + $0x220] sm:$0xff]  ;;  %v4258_v18 = vld [vmem:[%s9046_s10 + $0x228] sm:$0xff]  ;;  %v4275_v50 = vld [vmem:[%s9046_s10 + $0x2b0] sm:$0xff] }
 0x5f0   :  { %5766 = vmatprep.subr.bf16.mxu0 %v5765_v30  ;;  %v4235_v30 = vld [vmem:[%s9046_s10 + $0x170] sm:$0xff]  ;;  %v4286_v13 = vld [vmem:[%s9046_s10 + $0x308] sm:$0xff]  ;;  %v5827_v31 = vpack.c.bf16 %v4258_v18, %v4257_v56  ;;  %v4296_v56 = vld [vmem:[%s9046_s10 + $0x358] sm:$0xff] }
 0x5f2   :  { %5800 = vmatpush3.bf16.msra.mxu1 %v5799_v46  ;;  %v5815_v46 = vpack.c.bf16 %v4236_v8, %v4235_v30 }
 0x5f3   :  { %5768 = vmatpush3.bf16.msra.mxu0 %v5767_v24  ;;  %5802 = vmatprep.subr.bf16.mxu1 %v5801_v7 }
 0x5f4   :  { %5770 = vmatprep.subr.bf16.mxu0 %v5769_v16 }
 0x5f6   :  { %5804 = vmatpush3.bf16.msra.mxu1 %v5803_v20 }
 0x5f7   :  { %5772 = vmatpush3.bf16.msra.mxu0 %v5771_v4  ;;  %5806 = vmatprep.subr.bf16.mxu1 %v5805_v25 }
 0x5f8   :  { %5774 = vmatprep.subr.bf16.mxu0 %v5773_v15 }
 0x5fa   :  { %5808 = vmatpush3.bf16.msra.mxu1 %v5807_v57 }
 0x5fb   :  { %5776 = vmatpush3.bf16.msra.mxu0 %v5775_v62  ;;  %5810 = vmatprep.subr.bf16.mxu1 %v5809_v45  ;;  %v4272_v62 = vld [vmem:[%s9046_s10 + $0x298] sm:$0xff]  ;;  %v4285_v45 = vld [vmem:[%s9046_s10 + $0x300] sm:$0xff] }
 0x5fc   :  { %5778 = vmatprep.subr.bf16.mxu0 %v5777_v10  ;;  %v5850_v30 = vpack.c.bf16 %v4286_v13, %v4285_v45  ;;  %v4297_v45 = vld [vmem:[%s9046_s10 + $0x360] sm:$0xff]  ;;  %v4298_v13 = vld [vmem:[%s9046_s10 + $0x368] sm:$0xff] }
 0x5fe   :  { %5812 = vmatpush3.bf16.msra.mxu1 %v5811_v39  ;;  %v4276_v39 = vld [vmem:[%s9046_s10 + $0x2b8] sm:$0xff] }
 0x5ff   :  { %5780 = vmatpush3.bf16.msra.mxu0 %v5779_v47  ;;  %5814 = vmatprep.subr.bf16.mxu1 %v5813_v35  ;;  %v5829_v8 = vpack.c.bf16 %v4276_v39, %v4275_v50  ;;  %v5868_v50 = vpack.c.bf16 %v4298_v13, %v4297_v45  ;;  %v4299_v39 = vld [vmem:[%s9046_s10 + $0x370] sm:$0xff] }
 0x600   :  { %5782 = vmatprep.subr.bf16.mxu0 %v5781_v63  ;;  %v4255_v63 = vld [vmem:[%s9046_s10 + $0x210] sm:$0xff] }
 0x602   :  { %5816 = vmatpush3.bf16.msra.mxu1 %v5815_v46  ;;  %v4260_v46 = vld [vmem:[%s9046_s10 + $0x238] sm:$0xff] }
 0x603   :  { %5784 = vmatpush3.bf16.msra.mxu0 %v5783_v61  ;;  %5849 = vmatprep.subr.bf16.mxu1 %v6357_v52  ;;  %v5823_v61 = vpack.c.bf16 %v4256_v37, %v4255_v63 }
 0x604   :  { %5818 = vmatprep.subr.bf16.mxu0 %v5817_v49 }
 0x646   :  { %v6289_v54 = vpop.permute.xlu0 %6288 }
 0x647   :  { %v6291_v42 = vunpack.i.h.bf16 %v6289_v54  ;;  %v6290_v41 = vunpack.i.l.bf16 %v6289_v54 }
 0x649   :  { %v4137_v38 = vmax.f32 %v8590_v33, %v6291_v42  ;;  %v4120_v43 = vsel %vm4118_vm7, %v6290_v41, %v6291_v42  ;;  %v4259_v42 = vld [vmem:[%s9046_s10 + $0x230] sm:$0xff] }
 0x64a   :  { %v4136_v24 = vmax.f32 %v8588_v28, %v4120_v43  ;;  %v4288_v43 = vld [vmem:[%s9046_s10 + $0x318] sm:$0xff] }
 0x64c   :  { %v6307_v7 = vpack.i.bf16 %v4137_v38, %v4136_v24  ;;  %v4287_v38 = vld [vmem:[%s9046_s10 + $0x310] sm:$0xff]  ;;  %v4277_v24 = vld [vmem:[%s9046_s10 + $0x2c0] sm:$0xff] }
 0x64e   :  { %v6294_v27 = vpop.permute.xlu1 %6293  ;;  %6308 = vrot.lane.b32.xlu0 %v6307_v7, %s6358_s17  ;;  %v4278_v7 = vld [vmem:[%s9046_s10 + $0x2c8] sm:$0xff] }
 0x64f   :  { %v6296_v16 = vunpack.i.h.bf16 %v6294_v27  ;;  %v6295_v0 = vunpack.i.l.bf16 %v6294_v27  ;;  %v5831_v27 = vpack.c.bf16 %v4260_v46, %v4259_v42 }
 0x651   :  { %v4139_v34 = vmax.f32 %v8605_v40, %v6296_v16  ;;  %v4121_v51 = vsel %vm4118_vm7, %v6295_v0, %v6296_v16  ;;  %v5853_v16 = vpack.c.bf16 %v4288_v43, %v4287_v38  ;;  %v4261_v0 = vld [vmem:[%s9046_s10 + $0x240] sm:$0xff] }
 0x652   :  { %v4138_v33 = vmax.f32 %v8603_v29, %v4121_v51  ;;  %v4262_v51 = vld [vmem:[%s9046_s10 + $0x248] sm:$0xff] }
 0x654   :  { %v6312_v5 = vpack.i.bf16 %v4139_v34, %v4138_v33  ;;  %v5833_v34 = vpack.c.bf16 %v4278_v7, %v4277_v24  ;;  %v4289_v33 = vld [vmem:[%s9046_s10 + $0x320] sm:$0xff] }
 0x656   :  { %v6299_v1 = vpop.permute.xlu0 %6298  ;;  %6313 = vrot.lane.b32.xlu1 %v6312_v5, %s6359_s2  ;;  %v4290_v5 = vld [vmem:[%s9046_s10 + $0x328] sm:$0xff] }
 0x657   :  { %v6301_v28 = vunpack.i.h.bf16 %v6299_v1  ;;  %v6300_v9 = vunpack.i.l.bf16 %v6299_v1 }
 0x659   :  { %v4141_v20 = vmax.f32 %v8620_v19, %v6301_v28  ;;  %v4122_v4 = vsel %vm4118_vm7, %v6300_v9, %v6301_v28  ;;  %v4279_v28 = vld [vmem:[%s9046_s10 + $0x2d0] sm:$0xff]  ;;  %v4280_v9 = vld [vmem:[%s9046_s10 + $0x2d8] sm:$0xff] }
 0x65a   :  { %v4140_v25 = vmax.f32 %v8618_v17, %v4122_v4  ;;  %v4253_v17 = vld [vmem:[%s9046_s10 + $0x200] sm:$0xff] }
 0x65b   :  { %v4115_v44 = vpop.permute.xlu1 %4114  ;;  %v5819_v36 = vpack.c.bf16 %v4254_v11, %v4253_v17  ;;  %v4281_v11 = vld [vmem:[%s9046_s10 + $0x2e0] sm:$0xff] }
 0x65c   :  { %v4117_v22 = vpop.permute.xlu0 %4116  ;;  %v6317_v15 = vpack.i.bf16 %v4141_v20, %v4140_v25 }
 0x65d   :  { %v4123_v40 = vsel %vm4118_vm7, %v4115_v44, %v4117_v22  ;;  %v4143_v29 = vmax.f32 %v8678_v12, %v4117_v22  ;;  %v4271_v12 = vld [vmem:[%s9046_s10 + $0x290] sm:$0xff]  ;;  %v5835_v44 = vpack.c.bf16 %v4262_v51, %v4261_v0  ;;  %v5856_v22 = vpack.c.bf16 %v4290_v5, %v4289_v33 }
 0x65e   :  { %v4142_v48 = vmax.f32 %v8667_v23, %v4123_v40  ;;  %6318 = vrot.lane.b32.xlu0 %v6317_v15, %s6360_s7  ;;  %v5821_v47 = vpack.c.bf16 %v4272_v62, %v4271_v12  ;;  %v4263_v15 = vld [vmem:[%s9046_s10 + $0x250] sm:$0xff]  ;;  %v4265_v62 = vld [vmem:[%s9046_s10 + $0x260] sm:$0xff] }
 0x65f   :  { %v6304_v3 = vpop.permute.xlu1 %6303 }
 0x660   :  { %4177 = vrot.lane.b32.xlu1 %v4142_v48, %s6361_s3  ;;  %v6306_v19 = vunpack.i.h.bf16 %v6304_v3  ;;  %v6305_v59 = vunpack.i.l.bf16 %v6304_v3  ;;  %v5837_v48 = vpack.c.bf16 %v4280_v9, %v4279_v28  ;;  %v4291_v3 = vld [vmem:[%s9046_s10 + $0x330] sm:$0xff] }
 0x662   :  { %4179 = vrot.lane.b32.xlu0 %v4143_v29, %s6361_s3  ;;  %v4119_v23 = vsel %vm4118_vm7, %v6306_v19, %v6305_v59  ;;  %v4135_v10 = vmax.f32 %v8578_v2, %v6305_v59  ;;  %v4273_v2 = vld [vmem:[%s9046_s10 + $0x2a0] sm:$0xff]  ;;  %v4264_v29 = vld [vmem:[%s9046_s10 + $0x258] sm:$0xff] }
 0x663   :  { %v4134_v32 = vmax.f32 %v8576_v21, %v4119_v23  ;;  %v4274_v21 = vld [vmem:[%s9046_s10 + $0x2a8] sm:$0xff]  ;;  %v4292_v19 = vld [vmem:[%s9046_s10 + $0x338] sm:$0xff] }
 0x664   :  { %v5825_v6 = vpack.c.bf16 %v4274_v21, %v4273_v2  ;;  %v4282_v23 = vld [vmem:[%s9046_s10 + $0x2e8] sm:$0xff]  ;;  %v5859_v12 = vpack.c.bf16 %v4292_v19, %v4291_v3  ;;  %v4267_v2 = vld [vmem:[%s9046_s10 + $0x270] sm:$0xff] }
 0x6c0   :  { %v6309_v57 = vpop.permute.xlu0 %6308 }
 0x6c1   :  { %v6310_v60 = vunpack.i.l.bf16 %v6309_v57  ;;  %v6311_v14 = vunpack.i.h.bf16 %v6309_v57  ;;  %v5839_v57 = vpack.c.bf16 %v4264_v29, %v4263_v15 }
 0x6c3   :  { %v4185_v55 = vsel %vm4150_vm8, %v4135_v10, %v6310_v60  ;;  %v4151_v26 = vsel %vm4150_vm8, %v6310_v60, %v6311_v14  ;;  %v5841_v10 = vpack.c.bf16 %v4282_v23, %v4281_v11  ;;  %v4266_v60 = vld [vmem:[%s9046_s10 + $0x268] sm:$0xff]  ;;  %v4268_v14 = vld [vmem:[%s9046_s10 + $0x278] sm:$0xff] }
 0x6c4   :  { %4380 = vmatprep.mubr.f32.mxu0 %v4185_v55  ;;  %v4283_v55 = vld [vmem:[%s9046_s10 + $0x2f0] sm:$0xff]  ;;  %v5843_v63 = vpack.c.bf16 %v4266_v60, %v4265_v62 }
 0x6c5   :  { %4381 = vmatmul.mubr.f32.vlgmr.msra.gmra.mrb[82].mxu0 %v4134_v32  ;;  %v4294_v32 = vld [vmem:[%s9046_s10 + $0x348] sm:$0xff] }
 0x6c6   :  { %5820 = vmatpush3.bf16.msra.mxu0 %v5819_v36  ;;  %v4293_v36 = vld [vmem:[%s9046_s10 + $0x340] sm:$0xff] }
 0x6c7   :  { %5822 = vmatprep.subr.bf16.mxu0 %v5821_v47  ;;  %v4284_v47 = vld [vmem:[%s9046_s10 + $0x2f8] sm:$0xff]  ;;  %v5862_v37 = vpack.c.bf16 %v4294_v32, %v4293_v36 }
 0x6c8   :  { %v8893_v58 = vpop.permute.xlu1 %6313  ;;  %v5845_v21 = vpack.c.bf16 %v4284_v47, %v4283_v55 }
 0x6c9   :  { %v6316_v49 = vunpack.i.h.bf16 %v8893_v58  ;;  %v6315_v54 = vunpack.i.l.bf16 %v8893_v58 }
 0x6ca   :  { %5824 = vmatpush3.bf16.msra.mxu0 %v5823_v61  ;;  %v4295_v61 = vld [vmem:[%s9046_s10 + $0x350] sm:$0xff] }
 0x6cb   :  { %v4161_v41 = vsel %vm4160_vm9, %v6315_v54, %v6316_v49  ;;  %5826 = vmatprep.subr.bf16.mxu0 %v5825_v6  ;;  %v4186_v35 = vsel %vm4160_vm9, %v4151_v26, %v6315_v54  ;;  %v5847_v6 = vpack.c.bf16 %v4268_v14, %v4267_v2  ;;  %v5865_v18 = vpack.c.bf16 %v4296_v56, %v4295_v61  ;;  %v4300_v54 = vld [vmem:[%s9046_s10 + $0x378] sm:$0xff] }
 0x6cc   :  { %4450 = vmatprep.mubr.f32.mxu1 %v4161_v41 }
 0x6cd   :  { %4451 = vmatmul.mubr.f32.vlgmr.msra.gmra.mrb[52].mxu1 %v4186_v35 }
 0x6ce   :  { %5828 = vmatpush3.bf16.msra.mxu0 %v5827_v31  ;;  %5851 = vmatpush1.bf16.msra.mxu1 %v5850_v30  ;;  %v5871_v31 = vpack.c.bf16 %v4300_v54, %v4299_v39  ;;  %v4301_v30 = vld [vmem:[%s9046_s10 + $0x380] sm:$0xf] }
 0x6cf   :  { %5830 = vmatprep.subr.bf16.mxu0 %v5829_v8  ;;  %5852 = vmatprep.subr.bf16.mxu1 %v6357_v52 }
 0x6d0   :  { %v8937_v1 = vpop.permute.xlu0 %6318 }
 0x6d1   :  { %v6321_v20 = vunpack.i.h.bf16 %v8937_v1  ;;  %v6320_v4 = vunpack.i.l.bf16 %v8937_v1 }
 0x6d2   :  { %5832 = vmatpush3.bf16.msra.mxu0 %v5831_v27  ;;  %5854 = vmatpush1.bf16.msra.mxu1 %v5853_v16  ;;  %v8947_v25 = vpop.permute.xlu1 %4177 }
 0x6d3   :  { %5834 = vmatprep.subr.bf16.mxu0 %v5833_v34  ;;  %5855 = vmatprep.subr.bf16.mxu1 %v6357_v52  ;;  %v4172_v40 = vsel %vm4171_vm10, %v6320_v4, %v6321_v20  ;;  %v4187_v26 = vsel %vm4171_vm10, %v6316_v49, %v6320_v4 }
 0x6d4   :  { %v4180_v59 = vpop.permute.xlu0 %4179  ;;  %v4188_v17 = vsel %vm4181_vm11, %v4172_v40, %v8947_v25 }
 0x6d5   :  { %4520 = vmatprep.mubr.f32.mxu0 %v4188_v17  ;;  %4987 = vmatprep.mubr.msk.f32.mxu1 %vm4309_vm12, %v4180_v59  ;;  %v4182_v42 = vsel %vm4181_vm11, %v8947_v25, %v4180_v59 }
 0x6d6   :  { %5836 = vmatpush3.bf16.msra.mxu0 %v5835_v44  ;;  %5857 = vmatpush1.bf16.msra.mxu1 %v5856_v22 }
 0x6d7   :  { %5838 = vmatprep.subr.bf16.mxu0 %v5837_v48  ;;  %5858 = vmatprep.subr.bf16.mxu1 %v6357_v52 }
 0x6da   :  { %5840 = vmatpush3.bf16.msra.mxu0 %v5839_v57  ;;  %5860 = vmatpush1.bf16.msra.mxu1 %v5859_v12 }
 0x6db   :  { %5842 = vmatprep.subr.bf16.mxu0 %v5841_v10  ;;  %5861 = vmatprep.subr.bf16.mxu1 %v6357_v52 }
 0x6de   :  { %5844 = vmatpush3.bf16.msra.mxu0 %v5843_v63  ;;  %5863 = vmatpush1.bf16.msra.mxu1 %v5862_v37 }
 0x6df   :  { %5846 = vmatprep.subr.bf16.mxu0 %v5845_v21  ;;  %5864 = vmatprep.subr.bf16.mxu1 %v6357_v52 }
 0x6e2   :  { %5848 = vmatpush3.bf16.msra.mxu0 %v5847_v6  ;;  %5866 = vmatpush1.bf16.msra.mxu1 %v5865_v18 }
 0x6e3   :  { %5867 = vmatprep.subr.bf16.mxu1 %v6357_v52 }
 0x6e5   :  { %4521 = vmatmul.mubr.f32.vlgmr.msra.gmra.mrb[84].mxu0 %v4187_v26 }
 0x6e6   :  { %5869 = vmatpush1.bf16.msra.mxu1 %v5868_v50 }
 0x6e7   :  { %5870 = vmatprep.subr.bf16.mxu1 %v6357_v52  ;;  %v4985_v52 = vld [vmem:[%s9047_s11] ss:$0 sm:$0xff] }
 0x6ea   :  { %5872 = vmatpush1.bf16.msra.mxu1 %v5871_v31 }
 0x6eb   :  { %4558 = vmatprep.subr.mxu1 %v9069_v53 }
 0x6ee   :  { %4986 = vmatpush1.msk.msra.mxu1 %vm4312_vm13, %v4301_v30 }
 0x6ef   :  { %4591 = vmatmul.mubr.f32.vlgmr.msra.gmra.mrb[54].mxu1 %v4182_v42 }
 0x798   :  { %v5116_v58 = vpop.f32.mrb[82].mxu0 }
 0x799   :  { %v5117_v49 = vpop.f32.mrb[83].mxu0 }
 0x79a   :  { %v5118_v41 = vadd.f32 %v5117_v49, %v5116_v58 }
 0x79c   :  { %v4383_v53 = vadd.f32 %v5118_v41, %v4985_v52 }
 0x7a0   :  { %v5151_v35 = vpop.f32.mrb[52].mxu1 }
 0x7a1   :  { %v5152_v8 = vpop.f32.mrb[53].mxu1 }
 0x7a2   :  { %v5153_v46 = vadd.f32 %v5152_v8, %v5151_v35 }
 0x7a4   :  { %v4453_v38 = vadd.f32 %v5153_v46, %v4383_v53 }
 0x7b8   :  { %v5186_v43 = vpop.f32.mrb[84].mxu0 }
 0x7b9   :  { %v5187_v24 = vpop.f32.mrb[85].mxu0 }
 0x7ba   :  { %v5188_v7 = vadd.f32 %v5187_v24, %v5186_v43 }
 0x7bc   :  { %v4523_v27 = vadd.f32 %v5188_v7, %v4453_v38 }
 0x7c2   :  { %v4592_v16 = vpop.f32.mrb[54].mxu1 }
 0x7c3   :  { %v4593_v0 = vadd.f32 %v4592_v16, %v4523_v27  ;;  %v4594_v34 = vpop.f32.mrb[55].mxu1 }
 0x7c5   :  { %v4597_v51 = vsel %vm4596_vm14, %v4593_v0, -inf }
 0x7c6   :  { %4598 = vmax.xlane.f32.xlu1 %v4597_v51 }
 0x853   :  { %v4599_v33 = vpop.xlane.xlu1 %4598 }
 0x854   :  { %v4600_v5 = vsub.f32 %v4593_v0, %v4599_v33 }
 0x856   :  { %v4601_v1 = vmul.f32 1.442695, %v4600_v5 }
 0x858   :  { %6322 = vpow2.f32 %v4601_v1 }
 0x862   :  { %v6323_v28 = vpop.eup %6322 }
 0x863   :  { %v4603_v9 = vsel %vm4596_vm14, %v6323_v28, 0.0 }
 0x864   :  { %4604 = vadd.xlane.f32.xlu0 %v4603_v9 }
 0x8f1   :  { %v4605_v20 = vpop.xlane.xlu0 %4604 }
 0x8f2   :  { %6324 = vlog2.f32 %v4605_v20 }
 0x8fc   :  { %v6325_v4 = vpop.eup %6324 }
 0x8fd   :  { %v4607_v25 = vmul.f32 0.6931472, %v6325_v4 }
 0x8ff   :  { %v4608_v44 = vadd.f32 %v4607_v25, %v4599_v33 }
 0x901   :  { %v4609_v22 = vsub.f32 %v4593_v0, %v4608_v44 }
 0x903   :  { %4610 = vst.msk [vmem:[%s9048_s12] sm:$0xff] %vm4596_vm14, %v4609_v22 }
 0x904   :  { %4615 = vsyncpa [#allocation3], 1 }

</bundles_post_ra>
